<compile_context>
chip_gen: v6e
topology: v6e:2x2x1
jax: 0.10.0
libtpu: 0.0.40
codegen_flags: <defaults>
</compile_context>

<pallas_src>
import numpy as np
import jax
import jax.numpy as jnp
from jax import lax
from jax.experimental import pallas as pl
from jax.experimental.pallas import tpu as pltpu

LANES = 128                 # channel padding -> lane-dense layouts / full MXU width
NEG_SLOPE = 0.01
MM_DTYPE = jnp.bfloat16     # MXU input dtype (f32 accumulation everywhere)


def _round_up(v, m):
    return (v + m - 1) // m * m


# ----------------------- trace-time constant packing ------------------------

def _build_gather_stacked(h, w, k, stride, pad, p_rows, mpad, chunk):
    """Per-SAMPLE stacked gather: g[ci, j*mpad + m, p] = 1 iff tap (ci*chunk+j)
    of output row m reads input row p.  Conv zero-padding is folded in
    (out-of-bounds taps stay all-zero).  Only indexes p < h*w <= p_rows."""
    assert h * w <= p_rows, "gather would index past valid activation rows"
    ho = (h + 2 * pad - k) // stride + 1
    wo = (w + 2 * pad - k) // stride + 1
    taps = k * k
    n_chunks = taps // chunk
    g = np.zeros((n_chunks, chunk * mpad, p_rows), np.float32)
    for oy in range(ho):
        for ox in range(wo):
            m = oy * wo + ox
            for kh in range(k):
                for kw in range(k):
                    iy = oy * stride + kh - pad
                    ix = ox * stride + kw - pad
                    if 0 <= iy < h and 0 <= ix < w:
                        t = kh * k + kw
                        ci, j = divmod(t, chunk)
                        g[ci, j * mpad + m, iy * w + ix] = 1.0
    return g


def _pack_weight_stacked(w_oihw, chunk):
    """(Cout, Cin, KH, KW) -> (n_chunks, chunk*128, 128): per chunk, the taps'
    (Cin, Cout) matrices vstacked along K in the same order as the in-kernel
    lane-concat of the gathered taps."""
    cout, cin, kh_, kw_ = w_oihw.shape
    taps = kh_ * kw_
    n_chunks = taps // chunk
    wt = np.zeros((n_chunks, chunk * LANES, LANES), np.float32)
    w_np = np.asarray(w_oihw)
    for t in range(taps):
        kh, kw = divmod(t, kw_)
        ci, j = divmod(t, chunk)
        wt[ci, j * LANES: j * LANES + cin, :cout] = w_np[:, :, kh, kw].T
    return wt


def _pack_bias(b):
    bb = np.zeros((1, LANES), np.float32)
    bv = np.asarray(b)
    bb[0, : bv.shape[0]] = bv
    return bb


def prepare(params, image_size):
    """Pack all stages (repeat_num convs + final full-spatial conv) into per-sample
    VMEM constants.  Returns (consts, meta)."""
    consts, meta = [], []

    # identity-pad matrix: lanes [0, Cin) pass through, rest are zero
    cin0 = params["convs"][0][0].shape[1]
    pad_e = np.zeros((cin0, LANES), np.float32)
    pad_e[np.arange(cin0), np.arange(cin0)] = 1.0
    consts.append(jnp.asarray(pad_e, dtype=MM_DTYPE))

    h = w = image_size
    p_rows = h * w                                           # per-sample rows
    stages = [(cw, cb, 2, 1, True) for (cw, cb) in params["convs"]]
    stages.append((params["conv2_w"], None, 1, 0, False))    # final conv: no bias / no act

    for (cw, cb, stride, pad, act) in stages:
        k = cw.shape[-1]
        ho = (h + 2 * pad - k) // stride + 1
        wo = (w + 2 * pad - k) // stride + 1
        m_real = ho * wo
        mpad = _round_up(m_real, 8)                          # sublane-aligned rows
        taps = k * k
        chunk = min(taps, max(1, 256 // mpad))               # keep chunk*mpad <= 256 rows
        while taps % chunk:
            chunk -= 1
        n_chunks = taps // chunk

        g = _build_gather_stacked(h, w, k, stride, pad, p_rows, mpad, chunk)
        consts.append(jnp.asarray(g, dtype=MM_DTYPE))
        consts.append(jnp.asarray(_pack_weight_stacked(cw, chunk), dtype=MM_DTYPE))
        if cb is not None:
            consts.append(jnp.asarray(_pack_bias(cb), dtype=jnp.float32))
        meta.append(dict(mpad=mpad, chunk=chunk, n_chunks=n_chunks, p_rows=p_rows,
                         has_bias=cb is not None, act=act))
        h, w, p_rows = ho, wo, mpad
    return consts, meta


# ------------------------------ fused kernel --------------------------------

def _make_kernel(meta):
    def kernel(*refs):
        x_ref, pad_ref = refs[0], refs[1]
        out_ref = refs[-1]
        cref = refs[2:-1]

        # Lane-pad + cast the raw (H*W, Cin) f32 input to (H*W, 128) MM_DTYPE
        # via a tiny identity-pad matmul (exact; padded lanes are exact zeros).
        x = jnp.dot(x_ref[...].astype(MM_DTYPE), pad_ref[...],
                    preferred_element_type=jnp.float32).astype(MM_DTYPE)

        idx = 0
        for si, st in enumerate(meta):
            g_ref = cref[idx]; idx += 1                      # (n_chunks, chunk*mpad, P)
            w_ref = cref[idx]; idx += 1                      # (n_chunks, chunk*128, 128)
            b_ref = None
            if st["has_bias"]:
                b_ref = cref[idx]; idx += 1                  # (1, 128) f32
            mpad, chunk, n_chunks = st["mpad"], st["chunk"], st["n_chunks"]

            acc = None
            for ci in range(n_chunks):
                # one long-M gather matmul for the whole chunk (0/1 matrix -> exact)
                gx = jnp.dot(g_ref[ci], x, preferred_element_type=jnp.float32)
                if chunk > 1:
                    # 8-row-aligned f32 slices, lane-concat at 128 boundaries
                    parts = [gx[j * mpad:(j + 1) * mpad, :] for j in range(chunk)]
                    lhs = jnp.concatenate(parts, axis=-1)    # (mpad, chunk*128)
                else:
                    lhs = gx
                # one long-K weight matmul per chunk
                z = jnp.dot(lhs.astype(MM_DTYPE), w_ref[ci],
                            preferred_element_type=jnp.float32)
                if b_ref is not None and ci == 0:
                    z = z + b_ref[...]                       # bias folded into init
                acc = z if acc is None else acc + z
            if st["act"]:
                acc = jnp.where(acc > 0.0, acc, NEG_SLOPE * acc)
            if si == len(meta) - 1:
                out_ref[...] = acc                           # lane-dense (mpad, 128) f32
            else:
                x = acc.astype(MM_DTYPE)
    return kernel


def make_forward(params, image_size, batch, c_dim):
    consts, meta = prepare(params, image_size)
    kernel = _make_kernel(meta)

    cin = params["convs"][0][0].shape[1]
    hw = image_size * image_size
    out_mpad = meta[-1]["mpad"]

    flops = 0
    for st in meta:
        flops += st["n_chunks"] * 2 * (st["chunk"] * st["mpad"]) * st["p_rows"] * LANES
        flops += st["n_chunks"] * 2 * st["mpad"] * (st["chunk"] * LANES) * LANES
    flops *= batch
    bytes_accessed = batch * hw * cin * 4 + batch * out_mpad * LANES * 4
    bytes_accessed += sum(int(c.size) * c.dtype.itemsize for c in consts)

    def _const_spec(c):
        nd = c.ndim
        return pl.BlockSpec(c.shape, lambda b, _n=nd: (0,) * _n)   # fetched once/core

    call = pl.pallas_call(
        kernel,
        out_shape=jax.ShapeDtypeStruct((batch * out_mpad, LANES), jnp.float32),
        grid=(batch,),
        in_specs=[pl.BlockSpec((hw, cin), lambda b: (b, 0))]       # per-sample x
                 + [_const_spec(c) for c in consts],
        out_specs=pl.BlockSpec((out_mpad, LANES), lambda b: (b, 0)),
        compiler_params=pltpu.CompilerParams(
            dimension_semantics=("parallel",),   # megacore: 1 sample per TC on v7x
            vmem_limit_bytes=32 * 1024 * 1024,
        ),
        cost_estimate=pl.CostEstimate(flops=flops, transcendentals=0,
                                      bytes_accessed=bytes_accessed),
    )

    @jax.jit
    def forward(x_nchw):
        n, c, hh, ww = x_nchw.shape
        # NCHW -> flattened per-sample (y, x) rows; padding/cast happen in-kernel
        x_rows = jnp.transpose(x_nchw, (0, 2, 3, 1)).reshape(n * hh * ww, c)
        out = call(x_rows, *consts)
        # final 1x1-spatial conv output lives in row 0, lanes [0, c_dim) per sample
        return out.reshape(n, out_mpad, LANES)[:, 0, :c_dim]

    return forward


# ------------------------- params & pure-JAX reference ----------------------

def init_params(key, image_size=16, conv_dim=4, c_dim=5, repeat_num=3, imput_dim=4):
    cd = conv_dim * 2 * 2
    keys = iter(jax.random.split(key, 2 * repeat_num + 1))
    convs = []
    cin, cout = imput_dim, cd * 2
    for _ in range(repeat_num):
        w = 0.05 * jax.random.normal(next(keys), (cout, cin, 4, 4), jnp.float32)
        b = 0.05 * jax.random.normal(next(keys), (cout,), jnp.float32)
        convs.append((w, b))
        cin, cout = cout, cout * 2
    ks = image_size // (2 ** repeat_num)
    conv2_w = 0.05 * jax.random.normal(next(keys), (c_dim, cin, ks, ks), jnp.float32)
    return {"convs": convs, "conv2_w": conv2_w}


def reference_forward(params, x):
    h = x
    for (w, b) in params["convs"]:
        h = lax.conv_general_dilated(h, w, window_strides=(2, 2),
                                     padding=((1, 1), (1, 1)),
                                     dimension_numbers=("NCHW", "OIHW", "NCHW"))
        h = h + b[None, :, None, None]
        h = jnp.where(h > 0, h, NEG_SLOPE * h)
    o = lax.conv_general_dilated(h, params["conv2_w"], window_strides=(1, 1),
                                 padding="VALID",
                                 dimension_numbers=("NCHW", "OIHW", "NCHW"))
    return o.reshape(o.shape[0], o.shape[1])


# ----------------------------------- main ------------------------------------

if __name__ == "__main__":
    image_size, conv_dim, c_dim, repeat_num, imput_dim = 16, 4, 5, 3, 4
    batch = 2

    key = jax.random.PRNGKey(0)
    kp, kx = jax.random.split(key)
    params = init_params(kp, image_size, conv_dim, c_dim, repeat_num, imput_dim)
    x = jax.random.normal(kx, (batch, imput_dim, image_size, image_size), jnp.float32)

    fwd = make_forward(params, image_size, batch, c_dim)
    out = jax.block_until_ready(fwd(x))

    assert out.shape == (batch, c_dim)
    assert bool(jnp.all(jnp.isfinite(out)))

    # loose tolerance: kernel uses bf16 MXU inputs with f32 accumulation
    ref = jax.block_until_ready(reference_forward(params, x))
    scale = float(jnp.max(jnp.abs(ref))) + 1e-6
    max_err = float(jnp.max(jnp.abs(out.astype(jnp.float32) - ref)))
    assert max_err <= 0.05 * scale + 0.02, (max_err, scale)

    print("KERNEL_OK")
</pallas_src>

<mosaic_0001>
module attributes {stable_mosaic.version = 11 : i64} {
  func.func @kernel(%arg0: i32, %arg1: memref<256x4xf32, #tpu.memory_space<vmem>>, %arg2: memref<4x128xbf16, #tpu.memory_space<vmem>>, %arg3: memref<4x256x256xbf16, #tpu.memory_space<vmem>>, %arg4: memref<4x512x128xbf16, #tpu.memory_space<vmem>>, %arg5: memref<1x128xf32, #tpu.memory_space<vmem>>, %arg6: memref<1x256x64xbf16, #tpu.memory_space<vmem>>, %arg7: memref<1x2048x128xbf16, #tpu.memory_space<vmem>>, %arg8: memref<1x128xf32, #tpu.memory_space<vmem>>, %arg9: memref<1x128x16xbf16, #tpu.memory_space<vmem>>, %arg10: memref<1x2048x128xbf16, #tpu.memory_space<vmem>>, %arg11: memref<1x128xf32, #tpu.memory_space<vmem>>, %arg12: memref<1x32x8xbf16, #tpu.memory_space<vmem>>, %arg13: memref<1x512x128xbf16, #tpu.memory_space<vmem>>, %arg14: memref<8x128xf32, #tpu.memory_space<vmem>>) attributes {dimension_semantics = [#tpu.dimension_semantics<parallel>], iteration_bounds = array<i64: 2>, scalar_prefetch = 0 : i64, scratch_operands = 0 : i64, tpu.core_type = #tpu.core_type<tc>, window_params = [{transform_indices = @transform_0, window_bounds = array<i64: 256, 4>}, {pipeline_mode = #tpu.pipeline_mode<synchronous>, transform_indices = @transform_1, window_bounds = array<i64: 4, 128>}, {pipeline_mode = #tpu.pipeline_mode<synchronous>, transform_indices = @transform_2, window_bounds = array<i64: 4, 256, 256>}, {pipeline_mode = #tpu.pipeline_mode<synchronous>, transform_indices = @transform_3, window_bounds = array<i64: 4, 512, 128>}, {pipeline_mode = #tpu.pipeline_mode<synchronous>, transform_indices = @transform_4, window_bounds = array<i64: 1, 128>}, {pipeline_mode = #tpu.pipeline_mode<synchronous>, transform_indices = @transform_5, window_bounds = array<i64: 1, 256, 64>}, {pipeline_mode = #tpu.pipeline_mode<synchronous>, transform_indices = @transform_6, window_bounds = array<i64: 1, 2048, 128>}, {pipeline_mode = #tpu.pipeline_mode<synchronous>, transform_indices = @transform_7, window_bounds = array<i64: 1, 128>}, {pipeline_mode = #tpu.pipeline_mode<synchronous>, transform_indices = @transform_8, window_bounds = array<i64: 1, 128, 16>}, {pipeline_mode = #tpu.pipeline_mode<synchronous>, transform_indices = @transform_9, window_bounds = array<i64: 1, 2048, 128>}, {pipeline_mode = #tpu.pipeline_mode<synchronous>, transform_indices = @transform_10, window_bounds = array<i64: 1, 128>}, {pipeline_mode = #tpu.pipeline_mode<synchronous>, transform_indices = @transform_11, window_bounds = array<i64: 1, 32, 8>}, {pipeline_mode = #tpu.pipeline_mode<synchronous>, transform_indices = @transform_12, window_bounds = array<i64: 1, 512, 128>}, {transform_indices = @transform_13, window_bounds = array<i64: 8, 128>}]} {
    %c0 = arith.constant 0 : index
    %c0_0 = arith.constant 0 : index
    %0 = vector.load %arg1[%c0, %c0_0] : memref<256x4xf32, #tpu.memory_space<vmem>>, vector<256x4xf32>
    %1 = arith.truncf %0 : vector<256x4xf32> to vector<256x4xbf16>
    %c0_1 = arith.constant 0 : index
    %c0_2 = arith.constant 0 : index
    %2 = vector.load %arg2[%c0_1, %c0_2] : memref<4x128xbf16, #tpu.memory_space<vmem>>, vector<4x128xbf16>
    %cst = arith.constant dense<0.000000e+00> : vector<256x128xf32>
    %3 = tpu.matmul %1, %2, %cst {dimension_numbers = #tpu.dot_dimension_numbers<[1], [0], [0], [1], [0, 0, 1, 1], [], []>} : vector<256x4xbf16>, vector<4x128xbf16>, vector<256x128xf32> -> vector<256x128xf32>
    %4 = arith.truncf %3 : vector<256x128xf32> to vector<256x128xbf16>
    %c0_3 = arith.constant 0 : index
    %c0_4 = arith.constant 0 : index
    %c0_5 = arith.constant 0 : index
    %5 = vector.load %arg3[%c0_3, %c0_4, %c0_5] : memref<4x256x256xbf16, #tpu.memory_space<vmem>>, vector<1x256x256xbf16>
    %6 = vector.shape_cast %5 : vector<1x256x256xbf16> to vector<256x256xbf16>
    %cst_6 = arith.constant dense<0.000000e+00> : vector<256x128xf32>
    %7 = tpu.matmul %6, %4, %cst_6 {dimension_numbers = #tpu.dot_dimension_numbers<[1], [0], [0], [1], [0, 0, 1, 1], [], []>} : vector<256x256xbf16>, vector<256x128xbf16>, vector<256x128xf32> -> vector<256x128xf32>
    %8 = vector.extract_strided_slice %7 {offsets = [0, 0], sizes = [64, 128], strides = [1, 1]} : vector<256x128xf32> to vector<64x128xf32>
    %9 = vector.extract_strided_slice %7 {offsets = [64, 0], sizes = [64, 128], strides = [1, 1]} : vector<256x128xf32> to vector<64x128xf32>
    %10 = vector.extract_strided_slice %7 {offsets = [128, 0], sizes = [64, 128], strides = [1, 1]} : vector<256x128xf32> to vector<64x128xf32>
    %11 = vector.extract_strided_slice %7 {offsets = [192, 0], sizes = [64, 128], strides = [1, 1]} : vector<256x128xf32> to vector<64x128xf32>
    %12 = tpu.concatenate %8, %9, %10, %11 in 1 : vector<64x128xf32>, vector<64x128xf32>, vector<64x128xf32>, vector<64x128xf32> -> vector<64x512xf32>
    %13 = arith.truncf %12 : vector<64x512xf32> to vector<64x512xbf16>
    %c0_7 = arith.constant 0 : index
    %c0_8 = arith.constant 0 : index
    %c0_9 = arith.constant 0 : index
    %14 = vector.load %arg4[%c0_7, %c0_8, %c0_9] : memref<4x512x128xbf16, #tpu.memory_space<vmem>>, vector<1x512x128xbf16>
    %15 = vector.shape_cast %14 : vector<1x512x128xbf16> to vector<512x128xbf16>
    %cst_10 = arith.constant dense<0.000000e+00> : vector<64x128xf32>
    %16 = tpu.matmul %13, %15, %cst_10 {dimension_numbers = #tpu.dot_dimension_numbers<[1], [0], [0], [1], [0, 0, 1, 1], [], []>} : vector<64x512xbf16>, vector<512x128xbf16>, vector<64x128xf32> -> vector<64x128xf32>
    %c0_11 = arith.constant 0 : index
    %c0_12 = arith.constant 0 : index
    %17 = vector.load %arg5[%c0_11, %c0_12] : memref<1x128xf32, #tpu.memory_space<vmem>>, vector<1x128xf32>
    %18 = vector.broadcast %17 : vector<1x128xf32> to vector<64x128xf32>
    %19 = arith.addf %16, %18 : vector<64x128xf32>
    %c1 = arith.constant 1 : index
    %c0_13 = arith.constant 0 : index
    %c0_14 = arith.constant 0 : index
    %20 = vector.load %arg3[%c1, %c0_13, %c0_14] : memref<4x256x256xbf16, #tpu.memory_space<vmem>>, vector<1x256x256xbf16>
    %21 = vector.shape_cast %20 : vector<1x256x256xbf16> to vector<256x256xbf16>
    %cst_15 = arith.constant dense<0.000000e+00> : vector<256x128xf32>
    %22 = tpu.matmul %21, %4, %cst_15 {dimension_numbers = #tpu.dot_dimension_numbers<[1], [0], [0], [1], [0, 0, 1, 1], [], []>} : vector<256x256xbf16>, vector<256x128xbf16>, vector<256x128xf32> -> vector<256x128xf32>
    %23 = vector.extract_strided_slice %22 {offsets = [0, 0], sizes = [64, 128], strides = [1, 1]} : vector<256x128xf32> to vector<64x128xf32>
    %24 = vector.extract_strided_slice %22 {offsets = [64, 0], sizes = [64, 128], strides = [1, 1]} : vector<256x128xf32> to vector<64x128xf32>
    %25 = vector.extract_strided_slice %22 {offsets = [128, 0], sizes = [64, 128], strides = [1, 1]} : vector<256x128xf32> to vector<64x128xf32>
    %26 = vector.extract_strided_slice %22 {offsets = [192, 0], sizes = [64, 128], strides = [1, 1]} : vector<256x128xf32> to vector<64x128xf32>
    %27 = tpu.concatenate %23, %24, %25, %26 in 1 : vector<64x128xf32>, vector<64x128xf32>, vector<64x128xf32>, vector<64x128xf32> -> vector<64x512xf32>
    %28 = arith.truncf %27 : vector<64x512xf32> to vector<64x512xbf16>
    %c1_16 = arith.constant 1 : index
    %c0_17 = arith.constant 0 : index
    %c0_18 = arith.constant 0 : index
    %29 = vector.load %arg4[%c1_16, %c0_17, %c0_18] : memref<4x512x128xbf16, #tpu.memory_space<vmem>>, vector<1x512x128xbf16>
    %30 = vector.shape_cast %29 : vector<1x512x128xbf16> to vector<512x128xbf16>
    %cst_19 = arith.constant dense<0.000000e+00> : vector<64x128xf32>
    %31 = tpu.matmul %28, %30, %cst_19 {dimension_numbers = #tpu.dot_dimension_numbers<[1], [0], [0], [1], [0, 0, 1, 1], [], []>} : vector<64x512xbf16>, vector<512x128xbf16>, vector<64x128xf32> -> vector<64x128xf32>
    %32 = arith.addf %19, %31 : vector<64x128xf32>
    %c2 = arith.constant 2 : index
    %c0_20 = arith.constant 0 : index
    %c0_21 = arith.constant 0 : index
    %33 = vector.load %arg3[%c2, %c0_20, %c0_21] : memref<4x256x256xbf16, #tpu.memory_space<vmem>>, vector<1x256x256xbf16>
    %34 = vector.shape_cast %33 : vector<1x256x256xbf16> to vector<256x256xbf16>
    %cst_22 = arith.constant dense<0.000000e+00> : vector<256x128xf32>
    %35 = tpu.matmul %34, %4, %cst_22 {dimension_numbers = #tpu.dot_dimension_numbers<[1], [0], [0], [1], [0, 0, 1, 1], [], []>} : vector<256x256xbf16>, vector<256x128xbf16>, vector<256x128xf32> -> vector<256x128xf32>
    %36 = vector.extract_strided_slice %35 {offsets = [0, 0], sizes = [64, 128], strides = [1, 1]} : vector<256x128xf32> to vector<64x128xf32>
    %37 = vector.extract_strided_slice %35 {offsets = [64, 0], sizes = [64, 128], strides = [1, 1]} : vector<256x128xf32> to vector<64x128xf32>
    %38 = vector.extract_strided_slice %35 {offsets = [128, 0], sizes = [64, 128], strides = [1, 1]} : vector<256x128xf32> to vector<64x128xf32>
    %39 = vector.extract_strided_slice %35 {offsets = [192, 0], sizes = [64, 128], strides = [1, 1]} : vector<256x128xf32> to vector<64x128xf32>
    %40 = tpu.concatenate %36, %37, %38, %39 in 1 : vector<64x128xf32>, vector<64x128xf32>, vector<64x128xf32>, vector<64x128xf32> -> vector<64x512xf32>
    %41 = arith.truncf %40 : vector<64x512xf32> to vector<64x512xbf16>
    %c2_23 = arith.constant 2 : index
    %c0_24 = arith.constant 0 : index
    %c0_25 = arith.constant 0 : index
    %42 = vector.load %arg4[%c2_23, %c0_24, %c0_25] : memref<4x512x128xbf16, #tpu.memory_space<vmem>>, vector<1x512x128xbf16>
    %43 = vector.shape_cast %42 : vector<1x512x128xbf16> to vector<512x128xbf16>
    %cst_26 = arith.constant dense<0.000000e+00> : vector<64x128xf32>
    %44 = tpu.matmul %41, %43, %cst_26 {dimension_numbers = #tpu.dot_dimension_numbers<[1], [0], [0], [1], [0, 0, 1, 1], [], []>} : vector<64x512xbf16>, vector<512x128xbf16>, vector<64x128xf32> -> vector<64x128xf32>
    %45 = arith.addf %32, %44 : vector<64x128xf32>
    %c3 = arith.constant 3 : index
    %c0_27 = arith.constant 0 : index
    %c0_28 = arith.constant 0 : index
    %46 = vector.load %arg3[%c3, %c0_27, %c0_28] : memref<4x256x256xbf16, #tpu.memory_space<vmem>>, vector<1x256x256xbf16>
    %47 = vector.shape_cast %46 : vector<1x256x256xbf16> to vector<256x256xbf16>
    %cst_29 = arith.constant dense<0.000000e+00> : vector<256x128xf32>
    %48 = tpu.matmul %47, %4, %cst_29 {dimension_numbers = #tpu.dot_dimension_numbers<[1], [0], [0], [1], [0, 0, 1, 1], [], []>} : vector<256x256xbf16>, vector<256x128xbf16>, vector<256x128xf32> -> vector<256x128xf32>
    %49 = vector.extract_strided_slice %48 {offsets = [0, 0], sizes = [64, 128], strides = [1, 1]} : vector<256x128xf32> to vector<64x128xf32>
    %50 = vector.extract_strided_slice %48 {offsets = [64, 0], sizes = [64, 128], strides = [1, 1]} : vector<256x128xf32> to vector<64x128xf32>
    %51 = vector.extract_strided_slice %48 {offsets = [128, 0], sizes = [64, 128], strides = [1, 1]} : vector<256x128xf32> to vector<64x128xf32>
    %52 = vector.extract_strided_slice %48 {offsets = [192, 0], sizes = [64, 128], strides = [1, 1]} : vector<256x128xf32> to vector<64x128xf32>
    %53 = tpu.concatenate %49, %50, %51, %52 in 1 : vector<64x128xf32>, vector<64x128xf32>, vector<64x128xf32>, vector<64x128xf32> -> vector<64x512xf32>
    %54 = arith.truncf %53 : vector<64x512xf32> to vector<64x512xbf16>
    %c3_30 = arith.constant 3 : index
    %c0_31 = arith.constant 0 : index
    %c0_32 = arith.constant 0 : index
    %55 = vector.load %arg4[%c3_30, %c0_31, %c0_32] : memref<4x512x128xbf16, #tpu.memory_space<vmem>>, vector<1x512x128xbf16>
    %56 = vector.shape_cast %55 : vector<1x512x128xbf16> to vector<512x128xbf16>
    %cst_33 = arith.constant dense<0.000000e+00> : vector<64x128xf32>
    %57 = tpu.matmul %54, %56, %cst_33 {dimension_numbers = #tpu.dot_dimension_numbers<[1], [0], [0], [1], [0, 0, 1, 1], [], []>} : vector<64x512xbf16>, vector<512x128xbf16>, vector<64x128xf32> -> vector<64x128xf32>
    %58 = arith.addf %45, %57 : vector<64x128xf32>
    %cst_34 = arith.constant 0.000000e+00 : f32
    %59 = vector.broadcast %cst_34 : f32 to vector<64x128xf32>
    %60 = arith.cmpf ogt, %58, %59 : vector<64x128xf32>
    %cst_35 = arith.constant 0.00999999977 : f32
    %61 = vector.broadcast %cst_35 : f32 to vector<64x128xf32>
    %62 = arith.mulf %61, %58 : vector<64x128xf32>
    %63 = arith.select %60, %58, %62 : vector<64x128xi1>, vector<64x128xf32>
    %64 = arith.truncf %63 : vector<64x128xf32> to vector<64x128xbf16>
    %c0_36 = arith.constant 0 : index
    %c0_37 = arith.constant 0 : index
    %c0_38 = arith.constant 0 : index
    %65 = vector.load %arg6[%c0_36, %c0_37, %c0_38] : memref<1x256x64xbf16, #tpu.memory_space<vmem>>, vector<1x256x64xbf16>
    %66 = vector.shape_cast %65 : vector<1x256x64xbf16> to vector<256x64xbf16>
    %cst_39 = arith.constant dense<0.000000e+00> : vector<256x128xf32>
    %67 = tpu.matmul %66, %64, %cst_39 {dimension_numbers = #tpu.dot_dimension_numbers<[1], [0], [0], [1], [0, 0, 1, 1], [], []>} : vector<256x64xbf16>, vector<64x128xbf16>, vector<256x128xf32> -> vector<256x128xf32>
    %68 = vector.extract_strided_slice %67 {offsets = [0, 0], sizes = [16, 128], strides = [1, 1]} : vector<256x128xf32> to vector<16x128xf32>
    %69 = vector.extract_strided_slice %67 {offsets = [16, 0], sizes = [16, 128], strides = [1, 1]} : vector<256x128xf32> to vector<16x128xf32>
    %70 = vector.extract_strided_slice %67 {offsets = [32, 0], sizes = [16, 128], strides = [1, 1]} : vector<256x128xf32> to vector<16x128xf32>
    %71 = vector.extract_strided_slice %67 {offsets = [48, 0], sizes = [16, 128], strides = [1, 1]} : vector<256x128xf32> to vector<16x128xf32>
    %72 = vector.extract_strided_slice %67 {offsets = [64, 0], sizes = [16, 128], strides = [1, 1]} : vector<256x128xf32> to vector<16x128xf32>
    %73 = vector.extract_strided_slice %67 {offsets = [80, 0], sizes = [16, 128], strides = [1, 1]} : vector<256x128xf32> to vector<16x128xf32>
    %74 = vector.extract_strided_slice %67 {offsets = [96, 0], sizes = [16, 128], strides = [1, 1]} : vector<256x128xf32> to vector<16x128xf32>
    %75 = vector.extract_strided_slice %67 {offsets = [112, 0], sizes = [16, 128], strides = [1, 1]} : vector<256x128xf32> to vector<16x128xf32>
    %76 = vector.extract_strided_slice %67 {offsets = [128, 0], sizes = [16, 128], strides = [1, 1]} : vector<256x128xf32> to vector<16x128xf32>
    %77 = vector.extract_strided_slice %67 {offsets = [144, 0], sizes = [16, 128], strides = [1, 1]} : vector<256x128xf32> to vector<16x128xf32>
    %78 = vector.extract_strided_slice %67 {offsets = [160, 0], sizes = [16, 128], strides = [1, 1]} : vector<256x128xf32> to vector<16x128xf32>
    %79 = vector.extract_strided_slice %67 {offsets = [176, 0], sizes = [16, 128], strides = [1, 1]} : vector<256x128xf32> to vector<16x128xf32>
    %80 = vector.extract_strided_slice %67 {offsets = [192, 0], sizes = [16, 128], strides = [1, 1]} : vector<256x128xf32> to vector<16x128xf32>
    %81 = vector.extract_strided_slice %67 {offsets = [208, 0], sizes = [16, 128], strides = [1, 1]} : vector<256x128xf32> to vector<16x128xf32>
    %82 = vector.extract_strided_slice %67 {offsets = [224, 0], sizes = [16, 128], strides = [1, 1]} : vector<256x128xf32> to vector<16x128xf32>
    %83 = vector.extract_strided_slice %67 {offsets = [240, 0], sizes = [16, 128], strides = [1, 1]} : vector<256x128xf32> to vector<16x128xf32>
    %84 = tpu.concatenate %68, %69, %70, %71, %72, %73, %74, %75, %76, %77, %78, %79, %80, %81, %82, %83 in 1 : vector<16x128xf32>, vector<16x128xf32>, vector<16x128xf32>, vector<16x128xf32>, vector<16x128xf32>, vector<16x128xf32>, vector<16x128xf32>, vector<16x128xf32>, vector<16x128xf32>, vector<16x128xf32>, vector<16x128xf32>, vector<16x128xf32>, vector<16x128xf32>, vector<16x128xf32>, vector<16x128xf32>, vector<16x128xf32> -> vector<16x2048xf32>
    %85 = arith.truncf %84 : vector<16x2048xf32> to vector<16x2048xbf16>
    %c0_40 = arith.constant 0 : index
    %c0_41 = arith.constant 0 : index
    %c0_42 = arith.constant 0 : index
    %86 = vector.load %arg7[%c0_40, %c0_41, %c0_42] : memref<1x2048x128xbf16, #tpu.memory_space<vmem>>, vector<1x2048x128xbf16>
    %87 = vector.shape_cast %86 : vector<1x2048x128xbf16> to vector<2048x128xbf16>
    %cst_43 = arith.constant dense<0.000000e+00> : vector<16x128xf32>
    %88 = tpu.matmul %85, %87, %cst_43 {dimension_numbers = #tpu.dot_dimension_numbers<[1], [0], [0], [1], [0, 0, 1, 1], [], []>} : vector<16x2048xbf16>, vector<2048x128xbf16>, vector<16x128xf32> -> vector<16x128xf32>
    %c0_44 = arith.constant 0 : index
    %c0_45 = arith.constant 0 : index
    %89 = vector.load %arg8[%c0_44, %c0_45] : memref<1x128xf32, #tpu.memory_space<vmem>>, vector<1x128xf32>
    %90 = vector.broadcast %89 : vector<1x128xf32> to vector<16x128xf32>
    %91 = arith.addf %88, %90 : vector<16x128xf32>
    %cst_46 = arith.constant 0.000000e+00 : f32
    %92 = vector.broadcast %cst_46 : f32 to vector<16x128xf32>
    %93 = arith.cmpf ogt, %91, %92 : vector<16x128xf32>
    %cst_47 = arith.constant 0.00999999977 : f32
    %94 = vector.broadcast %cst_47 : f32 to vector<16x128xf32>
    %95 = arith.mulf %94, %91 : vector<16x128xf32>
    %96 = arith.select %93, %91, %95 : vector<16x128xi1>, vector<16x128xf32>
    %97 = arith.truncf %96 : vector<16x128xf32> to vector<16x128xbf16>
    %c0_48 = arith.constant 0 : index
    %c0_49 = arith.constant 0 : index
    %c0_50 = arith.constant 0 : index
    %98 = vector.load %arg9[%c0_48, %c0_49, %c0_50] : memref<1x128x16xbf16, #tpu.memory_space<vmem>>, vector<1x128x16xbf16>
    %99 = vector.shape_cast %98 : vector<1x128x16xbf16> to vector<128x16xbf16>
    %cst_51 = arith.constant dense<0.000000e+00> : vector<128x128xf32>
    %100 = tpu.matmul %99, %97, %cst_51 {dimension_numbers = #tpu.dot_dimension_numbers<[1], [0], [0], [1], [0, 0, 1, 1], [], []>} : vector<128x16xbf16>, vector<16x128xbf16>, vector<128x128xf32> -> vector<128x128xf32>
    %101 = vector.extract_strided_slice %100 {offsets = [0, 0], sizes = [8, 128], strides = [1, 1]} : vector<128x128xf32> to vector<8x128xf32>
    %102 = vector.extract_strided_slice %100 {offsets = [8, 0], sizes = [8, 128], strides = [1, 1]} : vector<128x128xf32> to vector<8x128xf32>
    %103 = vector.extract_strided_slice %100 {offsets = [16, 0], sizes = [8, 128], strides = [1, 1]} : vector<128x128xf32> to vector<8x128xf32>
    %104 = vector.extract_strided_slice %100 {offsets = [24, 0], sizes = [8, 128], strides = [1, 1]} : vector<128x128xf32> to vector<8x128xf32>
    %105 = vector.extract_strided_slice %100 {offsets = [32, 0], sizes = [8, 128], strides = [1, 1]} : vector<128x128xf32> to vector<8x128xf32>
    %106 = vector.extract_strided_slice %100 {offsets = [40, 0], sizes = [8, 128], strides = [1, 1]} : vector<128x128xf32> to vector<8x128xf32>
    %107 = vector.extract_strided_slice %100 {offsets = [48, 0], sizes = [8, 128], strides = [1, 1]} : vector<128x128xf32> to vector<8x128xf32>
    %108 = vector.extract_strided_slice %100 {offsets = [56, 0], sizes = [8, 128], strides = [1, 1]} : vector<128x128xf32> to vector<8x128xf32>
    %109 = vector.extract_strided_slice %100 {offsets = [64, 0], sizes = [8, 128], strides = [1, 1]} : vector<128x128xf32> to vector<8x128xf32>
    %110 = vector.extract_strided_slice %100 {offsets = [72, 0], sizes = [8, 128], strides = [1, 1]} : vector<128x128xf32> to vector<8x128xf32>
    %111 = vector.extract_strided_slice %100 {offsets = [80, 0], sizes = [8, 128], strides = [1, 1]} : vector<128x128xf32> to vector<8x128xf32>
    %112 = vector.extract_strided_slice %100 {offsets = [88, 0], sizes = [8, 128], strides = [1, 1]} : vector<128x128xf32> to vector<8x128xf32>
    %113 = vector.extract_strided_slice %100 {offsets = [96, 0], sizes = [8, 128], strides = [1, 1]} : vector<128x128xf32> to vector<8x128xf32>
    %114 = vector.extract_strided_slice %100 {offsets = [104, 0], sizes = [8, 128], strides = [1, 1]} : vector<128x128xf32> to vector<8x128xf32>
    %115 = vector.extract_strided_slice %100 {offsets = [112, 0], sizes = [8, 128], strides = [1, 1]} : vector<128x128xf32> to vector<8x128xf32>
    %116 = vector.extract_strided_slice %100 {offsets = [120, 0], sizes = [8, 128], strides = [1, 1]} : vector<128x128xf32> to vector<8x128xf32>
    %117 = tpu.concatenate %101, %102, %103, %104, %105, %106, %107, %108, %109, %110, %111, %112, %113, %114, %115, %116 in 1 : vector<8x128xf32>, vector<8x128xf32>, vector<8x128xf32>, vector<8x128xf32>, vector<8x128xf32>, vector<8x128xf32>, vector<8x128xf32>, vector<8x128xf32>, vector<8x128xf32>, vector<8x128xf32>, vector<8x128xf32>, vector<8x128xf32>, vector<8x128xf32>, vector<8x128xf32>, vector<8x128xf32>, vector<8x128xf32> -> vector<8x2048xf32>
    %118 = arith.truncf %117 : vector<8x2048xf32> to vector<8x2048xbf16>
    %c0_52 = arith.constant 0 : index
    %c0_53 = arith.constant 0 : index
    %c0_54 = arith.constant 0 : index
    %119 = vector.load %arg10[%c0_52, %c0_53, %c0_54] : memref<1x2048x128xbf16, #tpu.memory_space<vmem>>, vector<1x2048x128xbf16>
    %120 = vector.shape_cast %119 : vector<1x2048x128xbf16> to vector<2048x128xbf16>
    %cst_55 = arith.constant dense<0.000000e+00> : vector<8x128xf32>
    %121 = tpu.matmul %118, %120, %cst_55 {dimension_numbers = #tpu.dot_dimension_numbers<[1], [0], [0], [1], [0, 0, 1, 1], [], []>} : vector<8x2048xbf16>, vector<2048x128xbf16>, vector<8x128xf32> -> vector<8x128xf32>
    %c0_56 = arith.constant 0 : index
    %c0_57 = arith.constant 0 : index
    %122 = vector.load %arg11[%c0_56, %c0_57] : memref<1x128xf32, #tpu.memory_space<vmem>>, vector<1x128xf32>
    %123 = vector.broadcast %122 : vector<1x128xf32> to vector<8x128xf32>
    %124 = arith.addf %121, %123 : vector<8x128xf32>
    %cst_58 = arith.constant 0.000000e+00 : f32
    %125 = vector.broadcast %cst_58 : f32 to vector<8x128xf32>
    %126 = arith.cmpf ogt, %124, %125 : vector<8x128xf32>
    %cst_59 = arith.constant 0.00999999977 : f32
    %127 = vector.broadcast %cst_59 : f32 to vector<8x128xf32>
    %128 = arith.mulf %127, %124 : vector<8x128xf32>
    %129 = arith.select %126, %124, %128 : vector<8x128xi1>, vector<8x128xf32>
    %130 = arith.truncf %129 : vector<8x128xf32> to vector<8x128xbf16>
    %c0_60 = arith.constant 0 : index
    %c0_61 = arith.constant 0 : index
    %c0_62 = arith.constant 0 : index
    %131 = vector.load %arg12[%c0_60, %c0_61, %c0_62] : memref<1x32x8xbf16, #tpu.memory_space<vmem>>, vector<1x32x8xbf16>
    %132 = vector.shape_cast %131 : vector<1x32x8xbf16> to vector<32x8xbf16>
    %cst_63 = arith.constant dense<0.000000e+00> : vector<32x128xf32>
    %133 = tpu.matmul %132, %130, %cst_63 {dimension_numbers = #tpu.dot_dimension_numbers<[1], [0], [0], [1], [0, 0, 1, 1], [], []>} : vector<32x8xbf16>, vector<8x128xbf16>, vector<32x128xf32> -> vector<32x128xf32>
    %134 = vector.extract_strided_slice %133 {offsets = [0, 0], sizes = [8, 128], strides = [1, 1]} : vector<32x128xf32> to vector<8x128xf32>
    %135 = vector.extract_strided_slice %133 {offsets = [8, 0], sizes = [8, 128], strides = [1, 1]} : vector<32x128xf32> to vector<8x128xf32>
    %136 = vector.extract_strided_slice %133 {offsets = [16, 0], sizes = [8, 128], strides = [1, 1]} : vector<32x128xf32> to vector<8x128xf32>
    %137 = vector.extract_strided_slice %133 {offsets = [24, 0], sizes = [8, 128], strides = [1, 1]} : vector<32x128xf32> to vector<8x128xf32>
    %138 = tpu.concatenate %134, %135, %136, %137 in 1 : vector<8x128xf32>, vector<8x128xf32>, vector<8x128xf32>, vector<8x128xf32> -> vector<8x512xf32>
    %139 = arith.truncf %138 : vector<8x512xf32> to vector<8x512xbf16>
    %c0_64 = arith.constant 0 : index
    %c0_65 = arith.constant 0 : index
    %c0_66 = arith.constant 0 : index
    %140 = vector.load %arg13[%c0_64, %c0_65, %c0_66] : memref<1x512x128xbf16, #tpu.memory_space<vmem>>, vector<1x512x128xbf16>
    %141 = vector.shape_cast %140 : vector<1x512x128xbf16> to vector<512x128xbf16>
    %cst_67 = arith.constant dense<0.000000e+00> : vector<8x128xf32>
    %142 = tpu.matmul %139, %141, %cst_67 {dimension_numbers = #tpu.dot_dimension_numbers<[1], [0], [0], [1], [0, 0, 1, 1], [], []>} : vector<8x512xbf16>, vector<512x128xbf16>, vector<8x128xf32> -> vector<8x128xf32>
    %c0_68 = arith.constant 0 : index
    %c0_69 = arith.constant 0 : index
    %143 = vector.load %arg14[%c0_68, %c0_69] : memref<8x128xf32, #tpu.memory_space<vmem>>, vector<8x128xf32>
    tpu.vector_store %arg14[%c0_68, %c0_69], %142 {strides = array<i32>} : memref<8x128xf32, #tpu.memory_space<vmem>>, vector<8x128xf32>,
    return
  }
  func.func @transform_0(%arg0: i32) -> (i32, i32) {
    %c0_i32 = arith.constant 0 : i32
    %c0_i32_0 = arith.constant 0 : i32
    return %arg0, %c0_i32 : i32, i32
  }
  func.func @transform_1(%arg0: i32) -> (i32, i32) {
    %c0_i32 = arith.constant 0 : i32
    %c0_i32_0 = arith.constant 0 : i32
    %c0_i32_1 = arith.constant 0 : i32
    return %c0_i32, %c0_i32_0 : i32, i32
  }
  func.func @transform_2(%arg0: i32) -> (i32, i32, i32) {
    %c0_i32 = arith.constant 0 : i32
    %c0_i32_0 = arith.constant 0 : i32
    %c0_i32_1 = arith.constant 0 : i32
    %c0_i32_2 = arith.constant 0 : i32
    return %c0_i32, %c0_i32_0, %c0_i32_1 : i32, i32, i32
  }
  func.func @transform_3(%arg0: i32) -> (i32, i32, i32) {
    %c0_i32 = arith.constant 0 : i32
    %c0_i32_0 = arith.constant 0 : i32
    %c0_i32_1 = arith.constant 0 : i32
    %c0_i32_2 = arith.constant 0 : i32
    return %c0_i32, %c0_i32_0, %c0_i32_1 : i32, i32, i32
  }
  func.func @transform_4(%arg0: i32) -> (i32, i32) {
    %c0_i32 = arith.constant 0 : i32
    %c0_i32_0 = arith.constant 0 : i32
    %c0_i32_1 = arith.constant 0 : i32
    return %c0_i32, %c0_i32_0 : i32, i32
  }
  func.func @transform_5(%arg0: i32) -> (i32, i32, i32) {
    %c0_i32 = arith.constant 0 : i32
    %c0_i32_0 = arith.constant 0 : i32
    %c0_i32_1 = arith.constant 0 : i32
    %c0_i32_2 = arith.constant 0 : i32
    return %c0_i32, %c0_i32_0, %c0_i32_1 : i32, i32, i32
  }
  func.func @transform_6(%arg0: i32) -> (i32, i32, i32) {
    %c0_i32 = arith.constant 0 : i32
    %c0_i32_0 = arith.constant 0 : i32
    %c0_i32_1 = arith.constant 0 : i32
    %c0_i32_2 = arith.constant 0 : i32
    return %c0_i32, %c0_i32_0, %c0_i32_1 : i32, i32, i32
  }
  func.func @transform_7(%arg0: i32) -> (i32, i32) {
    %c0_i32 = arith.constant 0 : i32
    %c0_i32_0 = arith.constant 0 : i32
    %c0_i32_1 = arith.constant 0 : i32
    return %c0_i32, %c0_i32_0 : i32, i32
  }
  func.func @transform_8(%arg0: i32) -> (i32, i32, i32) {
    %c0_i32 = arith.constant 0 : i32
    %c0_i32_0 = arith.constant 0 : i32
    %c0_i32_1 = arith.constant 0 : i32
    %c0_i32_2 = arith.constant 0 : i32
    return %c0_i32, %c0_i32_0, %c0_i32_1 : i32, i32, i32
  }
  func.func @transform_9(%arg0: i32) -> (i32, i32, i32) {
    %c0_i32 = arith.constant 0 : i32
    %c0_i32_0 = arith.constant 0 : i32
    %c0_i32_1 = arith.constant 0 : i32
    %c0_i32_2 = arith.constant 0 : i32
    return %c0_i32, %c0_i32_0, %c0_i32_1 : i32, i32, i32
  }
  func.func @transform_10(%arg0: i32) -> (i32, i32) {
    %c0_i32 = arith.constant 0 : i32
    %c0_i32_0 = arith.constant 0 : i32
    %c0_i32_1 = arith.constant 0 : i32
    return %c0_i32, %c0_i32_0 : i32, i32
  }
  func.func @transform_11(%arg0: i32) -> (i32, i32, i32) {
    %c0_i32 = arith.constant 0 : i32
    %c0_i32_0 = arith.constant 0 : i32
    %c0_i32_1 = arith.constant 0 : i32
    %c0_i32_2 = arith.constant 0 : i32
    return %c0_i32, %c0_i32_0, %c0_i32_1 : i32, i32, i32
  }
  func.func @transform_12(%arg0: i32) -> (i32, i32, i32) {
    %c0_i32 = arith.constant 0 : i32
    %c0_i32_0 = arith.constant 0 : i32
    %c0_i32_1 = arith.constant 0 : i32
    %c0_i32_2 = arith.constant 0 : i32
    return %c0_i32, %c0_i32_0, %c0_i32_1 : i32, i32, i32
  }
  func.func @transform_13(%arg0: i32) -> (i32, i32) {
    %c0_i32 = arith.constant 0 : i32
    %c0_i32_0 = arith.constant 0 : i32
    return %arg0, %c0_i32 : i32, i32
  }
}

</mosaic_0001>

<bundles_post_ra>
// kernel: forward.1
= control target key start
LH: loop header
LB: loop body
LE: loop exit
PB: predicated region body
PF: predicated region fallthrough
CT: control target
= control target key end

     0   :  { %18 = vsyncpa [#allocation3], 0  ;;  %s11087_s0 = inlined_call_operand.vmem [shape: f32[512,4], index: 0, kind: input, shape index: {}]   ;;  %s11088_s1 = inlined_call_operand.vmem [shape: bf16[4,128], index: 1, kind: input, shape index: {}]   ;;  %s11089_s2 = inlined_call_operand.hbm [shape: bf16[4,256,256], index: 2, kind: input, shape index: {}]   ;;  %s11090_s3 = inlined_call_operand.hbm [shape: bf16[4,512,128], index: 3, kind: input, shape index: {}]   ;;  %s11091_s4 = inlined_call_operand.vmem [shape: f32[1,128], index: 4, kind: input, shape index: {}]   ;;  %s11092_s5 = inlined_call_operand.vmem [shape: bf16[1,256,64], index: 5, kind: input, shape index: {}]   ;;  %s11093_s6 = inlined_call_operand.hbm [shape: bf16[1,2048,128], index: 6, kind: input, shape index: {}]   ;;  %s11094_s7 = inlined_call_operand.vmem [shape: f32[1,128], index: 7, kind: input, shape index: {}]   ;;  %s11095_s8 = inlined_call_operand.vmem [shape: bf16[1,128,16], index: 8, kind: input, shape index: {}]   ;;  %s11096_s9 = inlined_call_operand.hbm [shape: bf16[1,2048,128], index: 9, kind: input, shape index: {}]   ;;  %s11097_s10 = inlined_call_operand.vmem [shape: f32[1,128], index: 10, kind: input, shape index: {}]   ;;  %s11098_s11 = inlined_call_operand.vmem [shape: bf16[1,32,8], index: 11, kind: input, shape index: {}]   ;;  %s11099_s12 = inlined_call_operand.vmem [shape: bf16[1,512,128], index: 12, kind: input, shape index: {}]   ;;  %s11100_s13 = inlined_call_operand.vmem [shape: f32[16,128], index: 13, kind: output, shape index: {}]  }
   0x1   :  { %19 = vsyncpa [#allocation5], 0 }
   0x2   :  { %20 = vsyncpa [#allocation8], 0  ;;  %s10462_s25 = smov 0  }
   0x3 LB: > { %s10384_s26 = smov [#allocation4]   ;;  %s10468_s28 = sadd.s32 4294967295, %s10382_s25   ;;  %s10382_s25 = sphi %s10462_s25, %s26_s25  }
   0x4   : > { %s363_s27 = sshll.u32 %s10384_s26, 4  ;;  %p7629_p0 = scmp.ge.s32.totalorder %s10382_s25, 1  ;;  %s364_s27 = int_to_ptr.vmem [resolvable:$true] %s363_s27 }
   0x5   : > { %p335_p1 = scmp.lt.s32.totalorder %s10382_s25, 3  ;;  %p9602_p2 = scmp.eq.s32.totalorder %s10468_s28, 0 }
   0x6   : > { %s10385_s30 = smov [#allocation2]   ;;  %s10386_s16 = smov [#allocation6]  }
   0x7   : > { %p10473_p3 = pnand %p7629_p0, %p335_p1  ;;  %s350_s14 = sshll.u32 %s10385_s30, 4  ;;  %s10479_s14 = int_to_ptr.vmem [resolvable:$true] %s350_s14 }
   0x8   : > { %s10487_s17 = sshll.u32 %s10386_s16, 4  ;;  %s10271_s18 = scalar_lea.vmem %s364_s27, 16384  ;;  %s383_s17 = int_to_ptr.vmem [resolvable:$true] %s10487_s17 }
   0x9   : > { %p9589_p4 = pneg %p10473_p3  ;;  %p10272_p7 = scmp.ne.s32.totalorder %s364_s27, %s10271_s18 }
   0xa   : > { %p10279_p10 = scmp.lt.s32.totalorder %s364_s27, %s364_s27  ;;  %p10280_p11 = scmp.lt.s32.totalorder %s10271_s18, %s10271_s18 }
   0xb   : > { %p10483_p5 = pnand %p9602_p2, %p9589_p4 }
   0xc   : > { %p10281_p12 = por %p10280_p11, %p10279_p10 }
   0xd   : > { %p10262_p6 = pneg %p10483_p5 }
   0xf   : > { %p10274_p8 = pnand %p10272_p7, %p10262_p6 }
  0x11   : > { %p10275_p9 = pneg %p10274_p8 }
  0x13   : > { %p10282_p13 = pnand %p10281_p12, %p10275_p9 }
  0x15   : > { %10285 = shalt.err (!%p10282_p13)
}
  0x16   : > { %s10387_s19 = smov 64   ;;  %s10388_s20 = smov 4  }
  0x17   : > { %9595 = dma.hbm_to_vmem [thread:$0]  (!%p10483_p5), %s11090_s3, 16384, %s364_s27, [#allocation5], %s10387_s19, %s10387_s19, %s10388_s20  }
  0x18   : > { %s10297_s23 = scalar_lea.vmem %s10479_s14, 16384  ;;  %p10305_p7 = scmp.lt.s32.totalorder %s10479_s14, %s10479_s14 }
  0x19   : > { %p10298_p0 = scmp.ne.s32.totalorder %s10479_s14, %s10297_s23  ;;  %p10306_p8 = scmp.lt.s32.totalorder %s10297_s23, %s10297_s23 }
  0x1b   : > { %p10300_p1 = pnand %p10298_p0, %p10262_p6  ;;  %p10307_p9 = por %p10306_p8, %p10305_p7 }
  0x1d   : > { %p10301_p4 = pneg %p10300_p1 }
  0x1f   : > { %p10308_p10 = pnand %p10307_p9, %p10301_p4 }
  0x21   : > { %10311 = shalt.err (!%p10308_p10)
}
  0x22   : > { %s10389_s24 = smov 128   ;;  %s10390_s26 = smov 8  }
  0x23   : > { %9592 = dma.hbm_to_vmem [thread:$0]  (!%p10483_p5), %s11089_s2, 16384, %s10479_s14, [#allocation3], %s10389_s24, %s10389_s24, %s10390_s26  }
  0x24   : > { %s10391_s16 = smov [#allocation7]   ;;  %s10323_s21 = scalar_lea.vmem %s383_s17, 16384 }
  0x25   : > { %s401_s18 = sshll.u32 %s10391_s16, 4  ;;  %p10324_p11 = scmp.ne.s32.totalorder %s383_s17, %s10323_s21  ;;  %s402_s18 = int_to_ptr.vmem [resolvable:$true] %s401_s18 }
  0x26   : > { %p10331_p0 = scmp.lt.s32.totalorder %s383_s17, %s383_s17  ;;  %p10332_p1 = scmp.lt.s32.totalorder %s10323_s21, %s10323_s21 }
  0x27   : > { %p10326_p12 = pnand %p10324_p11, %p10262_p6 }
  0x28   : > { %p10333_p4 = por %p10332_p1, %p10331_p0 }
  0x29   : > { %p10327_p13 = pneg %p10326_p12 }
  0x2b   : > { %p10334_p7 = pnand %p10333_p4, %p10327_p13 }
  0x2d   : > { %10337 = shalt.err (!%p10334_p7)
}
  0x2e   : > { %9598 = dma.hbm_to_vmem [thread:$0]  (!%p10483_p5), %s11093_s6, 16384, %s383_s17, [#allocation5], %s10387_s19, %s10387_s19, %s10388_s20  }
  0x2f   : > { %s10349_s23 = scalar_lea.vmem %s402_s18, 16384  ;;  %p10357_p11 = scmp.lt.s32.totalorder %s402_s18, %s402_s18 }
  0x30   : > { %p10350_p8 = scmp.ne.s32.totalorder %s402_s18, %s10349_s23  ;;  %p10358_p12 = scmp.lt.s32.totalorder %s10349_s23, %s10349_s23 }
  0x32   : > { %p10352_p9 = pnand %p10350_p8, %p10262_p6  ;;  %p10359_p13 = por %p10358_p12, %p10357_p11 }
  0x34   : > { %p10353_p10 = pneg %p10352_p9 }
  0x36   : > { %p10360_p0 = pnand %p10359_p13, %p10353_p10 }
  0x38   : > { %10363 = shalt.err (!%p10360_p0)
}
  0x39   : > { %9601 = dma.hbm_to_vmem [thread:$0]  (!%p10483_p5), %s11096_s9, 16384, %s402_s18, [#allocation8], %s10387_s19, %s10387_s19, %s10388_s20  }
  0x3a   : > { %435 = sbr.rel (%p10473_p3) target bundleno = 3338 (0xd0a), region = 72 }
  0x3f   : > { %10369 = dma.done.wait (%p9602_p2), [#allocation3], 16384  }
  0x40   : > { %10371 = vsyncadd (%p9602_p2), [#allocation3], 4294950912 }
  0x41   : > { %10373 = dma.done.wait (%p9602_p2), [#allocation5], 32768  }
  0x42   : > { %10375 = vsyncadd (%p9602_p2), [#allocation5], 4294934528 }
  0x43   : > { %10377 = dma.done.wait (%p9602_p2), [#allocation8], 16384  }
  0x44   : > { %10379 = vsyncadd (%p9602_p2), [#allocation8], 4294950912  ;;  %s7640_s29 = sshll.u32 %s10468_s28, 5  ;;  %vm599_vm0 = vcmask 1041408   ;;  %v549_v0 = vld [vmem:[%s11088_s1] sm:$0x3] }
  0x45   : > { %p491_p3 = scmp.lt.s32.totalorder %s7640_s29, 63  ;;  %vm550_vm1 = vcmask 31744   ;;  %9571 = vmatprep.subr.msk.bf16.mxu0 %vm599_vm0, %v549_v0  ;;  %v601_v3 = vsel %vm599_vm0, %v549_v0, 0  ;;  %v9628_v50 = vld [vmem:[#allocation2 + $0x4] ss:$8 sps:$4 sm:$0xff]   ;;  %vm3977_vm2 = vcmask 523264  }
  0x46   : > { %9474 = vmatpush3.bf16.msra.mxu0 %v601_v3  ;;  %1004 = vmatprep.mubr.bf16.mxu1 %v9628_v50  ;;  %v9650_v50 = vld [vmem:[#allocation2 + $0x84] ss:$8 sps:$4 sm:$0xff]   ;;  %vm5625_vm11 = vcmask 130048   ;;  %vm7132_vm14 = vcmask 64512   ;;  %vm7139_vm0 = vcmask 1043456   ;;  %p496_p2 = scmp.lt.s32.totalorder %s10468_s28, 1 }
  0x47   : > { %s11104_s29 = smov (!%p491_p3, %s7640_s29), 63 }
  0x48   : > { %s7641_s15 = sshll.u32 %s11104_s29, 3  ;;  %s11106_s28 = smov (!%p496_p2, %s10468_s28), 1 }
  0x49   : > { %s10556_s20 = scalar_lea.vmem %s11087_s0, %s7641_s15  ;;  %s7642_s21 = sshll.u32 %s11106_s28, 3 }
  0x4a   : > { %v501_v1 = vld [vmem:[%s10556_s20] sm:$0xff]  ;;  %v502_v2 = vld [vmem:[%s10556_s20 + $0x8] sm:$0xff]  ;;  %v503_v5 = vld [vmem:[%s10556_s20 + $0x10] sm:$0xff]  ;;  %s499_s23 = scalar_lea.vmem %s11100_s13, %s7642_s21 }
  0x4b   : > { %v533_v4 = vpack.c.bf16 %v502_v2, %v501_v1  ;;  %v504_v6 = vld [vmem:[%s10556_s20 + $0x18] sm:$0xff]  ;;  %v505_v7 = vld [vmem:[%s10556_s20 + $0x20] sm:$0xff]  ;;  %v506_v9 = vld [vmem:[%s10556_s20 + $0x28] sm:$0xff] }
  0x4c   : > { %v534_v8 = vpack.c.bf16 %v504_v6, %v503_v5  ;;  %v535_v10 = vpack.c.bf16 %v506_v9, %v505_v7  ;;  %v507_v11 = vld [vmem:[%s10556_s20 + $0x30] sm:$0xff]  ;;  %v508_v12 = vld [vmem:[%s10556_s20 + $0x38] sm:$0xff]  ;;  %v509_v13 = vld [vmem:[%s10556_s20 + $0x40] sm:$0xff] }
  0x4d   : > { %9475 = vmatprep.mubr.msk.bf16.mxu0 %vm550_vm1, %v533_v4  ;;  %v510_v14 = vld [vmem:[%s10556_s20 + $0x48] sm:$0xff]  ;;  %v536_v15 = vpack.c.bf16 %v508_v12, %v507_v11  ;;  %v511_v17 = vld [vmem:[%s10556_s20 + $0x50] sm:$0xff]  ;;  %v512_v18 = vld [vmem:[%s10556_s20 + $0x58] sm:$0xff] }
  0x4e   : > { %9476 = vmatmul.mubr.msk.bf16.vlgmr.msra.gmra.mxu0 %vm550_vm1, %v534_v8  ;;  %v537_v16 = vpack.c.bf16 %v510_v14, %v509_v13  ;;  %v513_v19 = vld [vmem:[%s10556_s20 + $0x60] sm:$0xff]  ;;  %v514_v20 = vld [vmem:[%s10556_s20 + $0x68] sm:$0xff]  ;;  %v538_v21 = vpack.c.bf16 %v512_v18, %v511_v17  ;;  %v515_v23 = vld [vmem:[%s10556_s20 + $0x70] sm:$0xff] }
  0x4f   : > { %9479 = vmatprep.mubr.msk.bf16.mxu0 %vm550_vm1, %v535_v10  ;;  %v539_v22 = vpack.c.bf16 %v514_v20, %v513_v19  ;;  %v516_v24 = vld [vmem:[%s10556_s20 + $0x78] sm:$0xff]  ;;  %v517_v25 = vld [vmem:[%s10556_s20 + $0x80] sm:$0xff]  ;;  %v518_v26 = vld [vmem:[%s10556_s20 + $0x88] sm:$0xff] }
  0x50   : > { %v540_v27 = vpack.c.bf16 %v516_v24, %v515_v23  ;;  %v541_v28 = vpack.c.bf16 %v518_v26, %v517_v25  ;;  %v519_v29 = vld [vmem:[%s10556_s20 + $0x90] sm:$0xff]  ;;  %v520_v30 = vld [vmem:[%s10556_s20 + $0x98] sm:$0xff]  ;;  %v521_v31 = vld [vmem:[%s10556_s20 + $0xa0] sm:$0xff] }
  0x51   : > { %v522_v32 = vld [vmem:[%s10556_s20 + $0xa8] sm:$0xff]  ;;  %v542_v33 = vpack.c.bf16 %v520_v30, %v519_v29  ;;  %v523_v35 = vld [vmem:[%s10556_s20 + $0xb0] sm:$0xff]  ;;  %v524_v36 = vld [vmem:[%s10556_s20 + $0xb8] sm:$0xff] }
  0x52   : > { %v543_v34 = vpack.c.bf16 %v522_v32, %v521_v31  ;;  %v525_v37 = vld [vmem:[%s10556_s20 + $0xc0] sm:$0xff]  ;;  %v526_v38 = vld [vmem:[%s10556_s20 + $0xc8] sm:$0xff]  ;;  %v544_v39 = vpack.c.bf16 %v524_v36, %v523_v35  ;;  %v527_v41 = vld [vmem:[%s10556_s20 + $0xd0] sm:$0xff] }
  0x53   : > { %v545_v40 = vpack.c.bf16 %v526_v38, %v525_v37  ;;  %v528_v42 = vld [vmem:[%s10556_s20 + $0xd8] sm:$0xff]  ;;  %v529_v43 = vld [vmem:[%s10556_s20 + $0xe0] sm:$0xff]  ;;  %v530_v44 = vld [vmem:[%s10556_s20 + $0xe8] sm:$0xff] }
  0x54   : > { %v546_v45 = vpack.c.bf16 %v528_v42, %v527_v41  ;;  %v547_v46 = vpack.c.bf16 %v530_v44, %v529_v43  ;;  %v531_v47 = vld [vmem:[%s10556_s20 + $0xf0] sm:$0xff]  ;;  %v532_v48 = vld [vmem:[%s10556_s20 + $0xf8] sm:$0xff]  ;;  %v9632_v38 = vld [vmem:[#allocation2 + $0x24] ss:$8 sps:$4 sm:$0xff]  }
  0x55   : > { %v548_v49 = vpack.c.bf16 %v532_v48, %v531_v47  ;;  %v9629_v36 = vld [vmem:[#allocation2 + $0x14] ss:$8 sps:$4 sm:$0xff]   ;;  %v9631_v37 = vld [vmem:[#allocation2 + $0x10] ss:$8 sps:$4 sm:$0xff]   ;;  %v9638_v42 = vld [vmem:[#allocation2 + $0x44] ss:$8 sps:$4 sm:$0xff]  }
  0x56   : > { %9480 = vmatmul.mubr.msk.bf16.gmra.mxu0 %vm550_vm1, %v536_v15  ;;  %v9637_v41 = vld [vmem:[#allocation2 + $0x30] ss:$8 sps:$4 sm:$0xff]   ;;  %v9640_v43 = vld [vmem:[#allocation2 + $0x40] ss:$8 sps:$4 sm:$0xff]   ;;  %v9641_v44 = vld [vmem:[#allocation2 + $0x54] ss:$8 sps:$4 sm:$0xff]  }
  0x57   : > { %9483 = vmatprep.mubr.msk.bf16.mxu0 %vm550_vm1, %v537_v16  ;;  %v9646_v47 = vld [vmem:[#allocation2 + $0x60] ss:$8 sps:$4 sm:$0xff]   ;;  %v9647_v48 = vld [vmem:[#allocation2 + $0x74] ss:$8 sps:$4 sm:$0xff]  }
  0x5e   : > { %9484 = vmatmul.mubr.msk.bf16.gmra.mxu0 %vm550_vm1, %v538_v21 }
  0x5f   : > { %9487 = vmatprep.mubr.msk.bf16.mxu0 %vm550_vm1, %v539_v22 }
  0x66   : > { %9488 = vmatmul.mubr.msk.bf16.gmra.mxu0 %vm550_vm1, %v540_v27 }
  0x67   : > { %9491 = vmatprep.mubr.msk.bf16.mxu0 %vm550_vm1, %v541_v28 }
  0x6e   : > { %9492 = vmatmul.mubr.msk.bf16.gmra.mxu0 %vm550_vm1, %v542_v33 }
  0x6f   : > { %9495 = vmatprep.mubr.msk.bf16.mxu0 %vm550_vm1, %v543_v34  ;;  %v9626_v34 = vld [vmem:[#allocation2] ss:$8 sps:$4 sm:$0xff]  }
  0x76   : > { %9496 = vmatmul.mubr.msk.bf16.gmra.mxu0 %vm550_vm1, %v544_v39  ;;  %v9634_v39 = vld [vmem:[#allocation2 + $0x20] ss:$8 sps:$4 sm:$0xff]  }
  0x77   : > { %9499 = vmatprep.mubr.msk.bf16.mxu0 %vm550_vm1, %v545_v40  ;;  %v9635_v40 = vld [vmem:[#allocation2 + $0x34] ss:$8 sps:$4 sm:$0xff]  }
  0x7e   : > { %9500 = vmatmul.mubr.msk.bf16.gmra.mxu0 %vm550_vm1, %v546_v45  ;;  %v9643_v45 = vld [vmem:[#allocation2 + $0x50] ss:$8 sps:$4 sm:$0xff]  }
  0x7f   : > { %9503 = vmatprep.mubr.msk.bf16.mxu0 %vm550_vm1, %v547_v46  ;;  %v9644_v46 = vld [vmem:[#allocation2 + $0x64] ss:$8 sps:$4 sm:$0xff]  }
  0x86   : > { %9504 = vmatmul.mubr.msk.bf16.gmra.mxu0 %vm550_vm1, %v548_v49  ;;  %v9649_v49 = vld [vmem:[#allocation2 + $0x70] ss:$8 sps:$4 sm:$0xff]  }
 0x10e   : > { %v9477_v51 = vpop.f32.mrf.mxu0 }
 0x110   : > { %v637_v52 = vpop.f32.mrf.mxu0 }
 0x112   : > { %v9478_v53 = vpop.f32.mrf.mxu0 }
 0x113   : > { %v10609_v54 = vpack.c.bf16 %v9478_v53, %v9477_v51  ;;  %v9652_v51 = vld [vmem:[#allocation2 + $0x80] ss:$8 sps:$4 sm:$0xff]   ;;  %v9655_v53 = vld [vmem:[#allocation2 + $0x90] ss:$8 sps:$4 sm:$0xff]  }
 0x114   : > { %v640_v55 = vpop.f32.mrf.mxu0 }
 0x115   : > { %v10654_v35 = vpack.c.bf16 %v640_v55, %v637_v52  ;;  %v9653_v52 = vld [vmem:[#allocation2 + $0x94] ss:$8 sps:$4 sm:$0xff]   ;;  %v9656_v55 = vld [vmem:[#allocation2 + $0xa4] ss:$8 sps:$4 sm:$0xff]  }
 0x116   : > { %v9481_v56 = vpop.f32.mrf.mxu0 }
 0x118   : > { %v653_v57 = vpop.f32.mrf.mxu0 }
 0x11a   : > { %v9482_v58 = vpop.f32.mrf.mxu0 }
 0x11b   : > { %v10611_v59 = vpack.c.bf16 %v9482_v58, %v9481_v56  ;;  %v9674_v56 = vld [vmem:[#allocation4 + $0x78] sm:$0xff]   ;;  %v9658_v58 = vld [vmem:[#allocation2 + $0xa0] ss:$8 sps:$4 sm:$0xff]  }
 0x11c   : > { %v656_v60 = vpop.f32.mrf.mxu0  ;;  %8389 = vmatprep.subr.bf16.mxu0 %v9674_v56 }
 0x11d   : > { %v10644_v31 = vpack.c.bf16 %v656_v60, %v653_v57  ;;  %v9675_v57 = vld [vmem:[#allocation4 + $0x38] sm:$0xff]  }
 0x11e   : > { %v9485_v61 = vpop.f32.mrf.mxu0  ;;  %8390 = vmatpush3.bf16.msra.mxu0 %v9675_v57  ;;  %v9659_v60 = vld [vmem:[#allocation2 + $0xb4] ss:$8 sps:$4 sm:$0xff]  }
 0x120   : > { %v669_v62 = vpop.f32.mrf.mxu0 }
 0x122   : > { %v9486_v63 = vpop.f32.mrf.mxu0 }
 0x123   : > { %v10628_v26 = vpack.c.bf16 %v9486_v63, %v9485_v61  ;;  %v9676_v61 = vld [vmem:[#allocation4 + $0x70] sm:$0xff]   ;;  %v9678_v63 = vld [vmem:[#allocation4 + $0x68] sm:$0xff]  }
 0x124   : > { %v672_v0 = vpop.f32.mrf.mxu0  ;;  %8391 = vmatprep.subr.bf16.mxu0 %v9676_v61 }
 0x125   : > { %v10634_v28 = vpack.c.bf16 %v672_v0, %v669_v62  ;;  %v9677_v62 = vld [vmem:[#allocation4 + $0x30] sm:$0xff]   ;;  %v9679_v0 = vld [vmem:[#allocation4 + $0x28] sm:$0xff]  }
 0x126   : > { %v9489_v1 = vpop.f32.mrf.mxu0  ;;  %8392 = vmatpush3.bf16.msra.mxu0 %v9677_v62 }
 0x127   : > { %8393 = vmatprep.subr.bf16.mxu0 %v9678_v63  ;;  %v9691_v63 = vld [vmem:[#allocation4 + $0xb8] sm:$0xff]  }
 0x128   : > { %v685_v2 = vpop.f32.mrf.mxu0 }
 0x12a   : > { %v9490_v3 = vpop.f32.mrf.mxu0  ;;  %8394 = vmatpush3.bf16.msra.mxu0 %v9679_v0 }
 0x12b   : > { %v10615_v21 = vpack.c.bf16 %v9490_v3, %v9489_v1  ;;  %v9661_v1 = vld [vmem:[#allocation2 + $0xb0] ss:$8 sps:$4 sm:$0xff]   ;;  %v9680_v3 = vld [vmem:[#allocation4 + $0x60] sm:$0xff]  }
 0x12c   : > { %v688_v4 = vpop.f32.mrf.mxu0  ;;  %8395 = vmatprep.subr.bf16.mxu0 %v9680_v3 }
 0x12d   : > { %v10622_v24 = vpack.c.bf16 %v688_v4, %v685_v2  ;;  %v9662_v2 = vld [vmem:[#allocation2 + $0xc4] ss:$8 sps:$4 sm:$0xff]  }
 0x12e   : > { %v9493_v5 = vpop.f32.mrf.mxu0  ;;  %v9681_v4 = vld [vmem:[#allocation4 + $0x20] sm:$0xff]  }
 0x12f   : > { %8396 = vmatpush3.bf16.msra.mxu0 %v9681_v4  ;;  %v9693_v4 = vld [vmem:[#allocation4 + $0xb0] sm:$0xff]  }
 0x130   : > { %v701_v6 = vpop.f32.mrf.mxu0 }
 0x132   : > { %v9494_v7 = vpop.f32.mrf.mxu0 }
 0x133   : > { %v10646_v32 = vpack.c.bf16 %v9494_v7, %v9493_v5  ;;  %v9682_v5 = vld [vmem:[#allocation4 + $0x58] sm:$0xff]   ;;  %v9664_v7 = vld [vmem:[#allocation2 + $0xc0] ss:$8 sps:$4 sm:$0xff]  }
 0x134   : > { %v704_v8 = vpop.f32.mrf.mxu0  ;;  %8397 = vmatprep.subr.bf16.mxu0 %v9682_v5 }
 0x135   : > { %v10650_v33 = vpack.c.bf16 %v704_v8, %v701_v6  ;;  %v9683_v6 = vld [vmem:[#allocation4 + $0x18] sm:$0xff]  }
 0x136   : > { %v9497_v9 = vpop.f32.mrf.mxu0  ;;  %8398 = vmatpush3.bf16.msra.mxu0 %v9683_v6  ;;  %v9665_v8 = vld [vmem:[#allocation2 + $0xd4] ss:$8 sps:$4 sm:$0xff]  }
 0x138   : > { %v717_v10 = vpop.f32.mrf.mxu0 }
 0x13a   : > { %v9498_v11 = vpop.f32.mrf.mxu0 }
 0x13b   : > { %v10636_v29 = vpack.c.bf16 %v9498_v11, %v9497_v9  ;;  %v9684_v9 = vld [vmem:[#allocation4 + $0x50] sm:$0xff]   ;;  %v9686_v11 = vld [vmem:[#allocation4 + $0x48] sm:$0xff]  }
 0x13c   : > { %v720_v12 = vpop.f32.mrf.mxu0  ;;  %8399 = vmatprep.subr.bf16.mxu0 %v9684_v9 }
 0x13d   : > { %v10640_v30 = vpack.c.bf16 %v720_v12, %v717_v10  ;;  %v9685_v10 = vld [vmem:[#allocation4 + $0x10] sm:$0xff]   ;;  %v9687_v12 = vld [vmem:[#allocation4 + $0x8] sm:$0xff]  }
 0x13e   : > { %v9501_v13 = vpop.f32.mrf.mxu0  ;;  %8400 = vmatpush3.bf16.msra.mxu0 %v9685_v10 }
 0x13f   : > { %8401 = vmatprep.subr.bf16.mxu0 %v9686_v11 }
 0x140   : > { %v733_v14 = vpop.f32.mrf.mxu0 }
 0x142   : > { %v9502_v15 = vpop.f32.mrf.mxu0  ;;  %8402 = vmatpush3.bf16.msra.mxu0 %v9687_v12 }
 0x143   : > { %v10624_v25 = vpack.c.bf16 %v9502_v15, %v9501_v13  ;;  %v9667_v13 = vld [vmem:[#allocation2 + $0xd0] ss:$8 sps:$4 sm:$0xff]   ;;  %v9688_v15 = vld [vmem:[#allocation4 + $0x40] sm:$0xff]  }
 0x144   : > { %v736_v16 = vpop.f32.mrf.mxu0  ;;  %8403 = vmatprep.subr.bf16.mxu0 %v9688_v15 }
 0x145   : > { %v10630_v27 = vpack.c.bf16 %v736_v16, %v733_v14  ;;  %v9668_v14 = vld [vmem:[#allocation2 + $0xe4] ss:$8 sps:$4 sm:$0xff]  }
 0x146   : > { %v9505_v17 = vpop.f32.mrf.mxu0  ;;  %v9689_v16 = vld [vmem:[#allocation4] sm:$0xff]  }
 0x147   : > { %8404 = vmatpush3.bf16.msra.mxu0 %v9689_v16  ;;  %v9696_v16 = vld [vmem:[#allocation4 + $0xe0] sm:$0xff]  }
 0x148   : > { %v749_v18 = vpop.f32.mrf.mxu0 }
 0x14a   : > { %v9506_v19 = vpop.f32.mrf.mxu0 }
 0x14b   : > { %v10613_v20 = vpack.c.bf16 %v9506_v19, %v9505_v17  ;;  %v9690_v17 = vld [vmem:[#allocation4 + $0xf8] sm:$0xff]  }
 0x14c   : > { %v752_v22 = vpop.f32.mrf.mxu0  ;;  %8429 = vmatprep.subr.bf16.mxu0 %v9690_v17  ;;  %v9671_v19 = vld [vmem:[#allocation2 + $0xf4] ss:$8 sps:$4 sm:$0xff]  }
 0x14d   : > { %v10617_v23 = vpack.c.bf16 %v752_v22, %v749_v18  ;;  %8277 = vmatprep.subr.bf16.mxu1 %v10613_v20  ;;  %v9670_v18 = vld [vmem:[#allocation2 + $0xe0] ss:$8 sps:$4 sm:$0xff]   ;;  %v9673_v22 = vld [vmem:[#allocation2 + $0xf0] ss:$8 sps:$4 sm:$0xff]  }
 0x14e   : > { %8278 = vmatpush3.bf16.msra.mxu1 %v10615_v21 }
 0x14f   : > { %8279 = vmatprep.subr.bf16.mxu1 %v10617_v23 }
 0x152   : > { %8280 = vmatpush3.bf16.msra.mxu1 %v10622_v24 }
 0x153   : > { %8281 = vmatprep.subr.bf16.mxu1 %v10624_v25 }
 0x156   : > { %8282 = vmatpush3.bf16.msra.mxu1 %v10628_v26 }
 0x157   : > { %8283 = vmatprep.subr.bf16.mxu1 %v10630_v27 }
 0x15a   : > { %8284 = vmatpush3.bf16.msra.mxu1 %v10634_v28 }
 0x15b   : > { %8285 = vmatprep.subr.bf16.mxu1 %v10636_v29 }
 0x15e   : > { %8286 = vmatpush3.bf16.msra.mxu1 %v10611_v59 }
 0x15f   : > { %8287 = vmatprep.subr.bf16.mxu1 %v10640_v30 }
 0x162   : > { %8288 = vmatpush3.bf16.msra.mxu1 %v10644_v31 }
 0x163   : > { %8289 = vmatprep.subr.bf16.mxu1 %v10646_v32 }
 0x166   : > { %8290 = vmatpush3.bf16.msra.mxu1 %v10609_v54 }
 0x167   : > { %8291 = vmatprep.subr.bf16.mxu1 %v10650_v33 }
 0x16a   : > { %8292 = vmatpush3.bf16.msra.mxu1 %v10654_v35 }
 0x16d   : > { %1005 = vmatmul.mubr.bf16.vlgmr.msra.gmra.mxu1 %v9626_v34 }
 0x16e   : > { %1012 = vmatprep.mubr.bf16.mxu1 %v9629_v36 }
 0x175   : > { %1013 = vmatmul.mubr.bf16.gmra.mxu1 %v9631_v37 }
 0x176   : > { %1020 = vmatprep.mubr.bf16.mxu1 %v9632_v38 }
 0x17d   : > { %1021 = vmatmul.mubr.bf16.gmra.mxu1 %v9634_v39 }
 0x17e   : > { %1028 = vmatprep.mubr.bf16.mxu1 %v9635_v40 }
 0x185   : > { %1029 = vmatmul.mubr.bf16.gmra.mxu1 %v9637_v41 }
 0x186   : > { %1036 = vmatprep.mubr.bf16.mxu1 %v9638_v42 }
 0x18d   : > { %1037 = vmatmul.mubr.bf16.gmra.mxu1 %v9640_v43 }
 0x18e   : > { %1044 = vmatprep.mubr.bf16.mxu1 %v9641_v44 }
 0x195   : > { %1045 = vmatmul.mubr.bf16.gmra.mxu1 %v9643_v45 }
 0x196   : > { %1052 = vmatprep.mubr.bf16.mxu1 %v9644_v46 }
 0x19d   : > { %1053 = vmatmul.mubr.bf16.gmra.mxu1 %v9646_v47 }
 0x19e   : > { %1060 = vmatprep.mubr.bf16.mxu1 %v9647_v48 }
 0x1a5   : > { %1061 = vmatmul.mubr.bf16.gmra.mxu1 %v9649_v49 }
 0x1a6   : > { %1068 = vmatprep.mubr.bf16.mxu1 %v9650_v50 }
 0x1ad   : > { %1069 = vmatmul.mubr.bf16.gmra.mxu1 %v9652_v51 }
 0x1ae   : > { %1076 = vmatprep.mubr.bf16.mxu1 %v9653_v52 }
 0x1b5   : > { %1077 = vmatmul.mubr.bf16.gmra.mxu1 %v9655_v53 }
 0x1b6   : > { %1084 = vmatprep.mubr.bf16.mxu1 %v9656_v55 }
 0x1bd   : > { %1085 = vmatmul.mubr.bf16.gmra.mxu1 %v9658_v58 }
 0x1be   : > { %1092 = vmatprep.mubr.bf16.mxu1 %v9659_v60 }
 0x1c5   : > { %1093 = vmatmul.mubr.bf16.gmra.mxu1 %v9661_v1 }
 0x1c6   : > { %1100 = vmatprep.mubr.bf16.mxu1 %v9662_v2  ;;  %v9692_v2 = vld [vmem:[#allocation4 + $0xf0] sm:$0xff]  }
 0x1cd   : > { %1101 = vmatmul.mubr.bf16.gmra.mxu1 %v9664_v7  ;;  %v9694_v7 = vld [vmem:[#allocation4 + $0xe8] sm:$0xff]  }
 0x1ce   : > { %1108 = vmatprep.mubr.bf16.mxu1 %v9665_v8 }
 0x1d5   : > { %1109 = vmatmul.mubr.bf16.gmra.mxu1 %v9667_v13  ;;  %v9695_v13 = vld [vmem:[#allocation4 + $0xa8] sm:$0xff]  }
 0x1d6   : > { %1116 = vmatprep.mubr.bf16.mxu1 %v9668_v14 }
 0x1dd   : > { %1117 = vmatmul.mubr.bf16.gmra.mxu1 %v9670_v18  ;;  %v9697_v18 = vld [vmem:[#allocation4 + $0xa0] sm:$0xff]  }
 0x1de   : > { %1124 = vmatprep.mubr.bf16.mxu1 %v9671_v19 }
 0x1e5   : > { %1125 = vmatmul.mubr.bf16.gmra.mxu1 %v9673_v22 }
 0x22d   : > { %v8293_v34 = vpop.f32.mrf.mxu1 }
 0x22f   : > { %v8294_v36 = vpop.f32.mrf.mxu1 }
 0x230   : > { %v8295_v60 = vadd.f32 %v8294_v36, %v8293_v34  ;;  %v9698_v34 = vld [vmem:[#allocation4 + $0xd8] sm:$0xff]  }
 0x231   : > { %v8296_v37 = vpop.f32.mrf.mxu1 }
 0x233   : > { %v8297_v38 = vpop.f32.mrf.mxu1 }
 0x234   : > { %v8298_v55 = vadd.f32 %v8297_v38, %v8296_v37 }
 0x235   : > { %v8299_v39 = vpop.f32.mrf.mxu1 }
 0x236   : > { %v1133_v0 = vpack.c.bf16 %v8298_v55, %v8295_v60  ;;  %v9701_v55 = vld [vmem:[#allocation4 + $0x90] sm:$0xff]  }
 0x237   : > { %v8300_v40 = vpop.f32.mrf.mxu1 }
 0x238   : > { %v8301_v10 = vadd.f32 %v8300_v40, %v8299_v39 }
 0x239   : > { %v8302_v41 = vpop.f32.mrf.mxu1 }
 0x23b   : > { %v8303_v42 = vpop.f32.mrf.mxu1 }
 0x23c   : > { %v8304_v5 = vadd.f32 %v8303_v42, %v8302_v41  ;;  %v9699_v41 = vld [vmem:[#allocation4 + $0x98] sm:$0xff]  }
 0x23d   : > { %v8305_v43 = vpop.f32.mrf.mxu1 }
 0x23e   : > { %v1137_v14 = vpack.c.bf16 %v8304_v5, %v8301_v10 }
 0x23f   : > { %v8306_v44 = vpop.f32.mrf.mxu1 }
 0x240   : > { %v8307_v38 = vadd.f32 %v8306_v44, %v8305_v43 }
 0x241   : > { %v8308_v45 = vpop.f32.mrf.mxu1 }
 0x243   : > { %v8309_v46 = vpop.f32.mrf.mxu1 }
 0x244   : > { %v8310_v19 = vadd.f32 %v8309_v46, %v8308_v45 }
 0x245   : > { %v10657_v47 = vpop.f32.mrf.mxu1 }
 0x246   : > { %v1141_v42 = vpack.c.bf16 %v8310_v19, %v8307_v38 }
 0x247   : > { %v10659_v48 = vpop.f32.mrf.mxu1 }
 0x248   : > { %v8313_v43 = vadd.f32 %v10659_v48, %v10657_v47 }
 0x249   : > { %v8314_v49 = vpop.f32.mrf.mxu1 }
 0x24b   : > { %v8315_v50 = vpop.f32.mrf.mxu1 }
 0x24c   : > { %v8316_v45 = vadd.f32 %v8315_v50, %v8314_v49  ;;  %v9705_v49 = vld [vmem:[#allocation4 + $0x80] sm:$0xff]  }
 0x24d   : > { %v8317_v51 = vpop.f32.mrf.mxu1 }
 0x24f   : > { %v8318_v52 = vpop.f32.mrf.mxu1 }
 0x250   : > { %v8319_v57 = vadd.f32 %v8318_v52, %v8317_v51  ;;  %v9700_v52 = vld [vmem:[#allocation4 + $0xd0] sm:$0xff]  }
 0x251   : > { %v8320_v53 = vpop.f32.mrf.mxu1 }
 0x253   : > { %v8321_v56 = vpop.f32.mrf.mxu1 }
 0x254   : > { %v8322_v58 = vadd.f32 %v8321_v56, %v8320_v53  ;;  %v9702_v56 = vld [vmem:[#allocation4 + $0xc8] sm:$0xff]  }
 0x255   : > { %v8323_v61 = vpop.f32.mrf.mxu1 }
 0x256   : > { %v1134_v62 = vpack.c.bf16 %v8322_v58, %v8319_v57 }
 0x257   : > { %v8324_v1 = vpop.f32.mrf.mxu1 }
 0x258   : > { %1444 = vmatprep.mubr.bf16.mxu0 %v1134_v62  ;;  %v8325_v8 = vadd.f32 %v8324_v1, %v8323_v61  ;;  %v9703_v61 = vld [vmem:[#allocation4 + $0x88] sm:$0xff]   ;;  %v1145_v62 = vpack.c.bf16 %v8316_v45, %v8313_v43 }
 0x259   : > { %v8326_v3 = vpop.f32.mrf.mxu1  ;;  %1445 = vmatmul.mubr.bf16.vlgmr.msra.gmra.mxu0 %v1133_v0  ;;  %v9704_v0 = vld [vmem:[#allocation4 + $0xc0] sm:$0xff]  }
 0x25a   : > { %8430 = vmatpush3.bf16.msra.mxu0 %v9691_v63 }
 0x25b   : > { %v8327_v6 = vpop.f32.mrf.mxu1  ;;  %8431 = vmatprep.subr.bf16.mxu0 %v9692_v2 }
 0x25c   : > { %v8328_v9 = vadd.f32 %v8327_v6, %v8326_v3 }
 0x25d   : > { %v8329_v11 = vpop.f32.mrf.mxu1 }
 0x25e   : > { %v1138_v12 = vpack.c.bf16 %v8328_v9, %v8325_v8  ;;  %8432 = vmatpush3.bf16.msra.mxu0 %v9693_v4 }
 0x25f   : > { %v8330_v15 = vpop.f32.mrf.mxu1  ;;  %8433 = vmatprep.subr.bf16.mxu0 %v9694_v7 }
 0x260   : > { %1452 = vmatprep.mubr.bf16.mxu0 %v1138_v12  ;;  %v8331_v36 = vadd.f32 %v8330_v15, %v8329_v11 }
 0x261   : > { %v8332_v17 = vpop.f32.mrf.mxu1  ;;  %1453 = vmatmul.mubr.bf16.gmra.mxu0 %v1137_v14 }
 0x262   : > { %8434 = vmatpush3.bf16.msra.mxu0 %v9695_v13 }
 0x263   : > { %v8333_v22 = vpop.f32.mrf.mxu1  ;;  %8435 = vmatprep.subr.bf16.mxu0 %v9696_v16 }
 0x264   : > { %v8334_v37 = vadd.f32 %v8333_v22, %v8332_v17 }
 0x265   : > { %v8335_v39 = vpop.f32.mrf.mxu1 }
 0x266   : > { %v1142_v40 = vpack.c.bf16 %v8334_v37, %v8331_v36  ;;  %8436 = vmatpush3.bf16.msra.mxu0 %v9697_v18 }
 0x267   : > { %v8336_v51 = vpop.f32.mrf.mxu1  ;;  %8437 = vmatprep.subr.bf16.mxu0 %v9698_v34 }
 0x268   : > { %1460 = vmatprep.mubr.bf16.mxu0 %v1142_v40  ;;  %v8337_v57 = vadd.f32 %v8336_v51, %v8335_v39 }
 0x269   : > { %v8338_v53 = vpop.f32.mrf.mxu1  ;;  %1461 = vmatmul.mubr.bf16.gmra.mxu0 %v1141_v42 }
 0x26a   : > { %8438 = vmatpush3.bf16.msra.mxu0 %v9699_v41 }
 0x26b   : > { %v8339_v46 = vpop.f32.mrf.mxu1  ;;  %8439 = vmatprep.subr.bf16.mxu0 %v9700_v52 }
 0x26c   : > { %v8340_v58 = vadd.f32 %v8339_v46, %v8338_v53 }
 0x26d   : > { %v8341_v44 = vpop.f32.mrf.mxu1 }
 0x26e   : > { %v1146_v60 = vpack.c.bf16 %v8340_v58, %v8337_v57  ;;  %8440 = vmatpush3.bf16.msra.mxu0 %v9701_v55 }
 0x26f   : > { %v8342_v63 = vpop.f32.mrf.mxu1  ;;  %8441 = vmatprep.subr.bf16.mxu0 %v9702_v56 }
 0x270   : > { %1468 = vmatprep.mubr.bf16.mxu0 %v1146_v60  ;;  %v8343_v19 = vadd.f32 %v8342_v63, %v8341_v44 }
 0x271   : > { %v8344_v1 = vpop.f32.mrf.mxu1  ;;  %1469 = vmatmul.mubr.bf16.gmra.mxu0 %v1145_v62 }
 0x272   : > { %8442 = vmatpush3.bf16.msra.mxu0 %v9703_v61 }
 0x273   : > { %v8345_v50 = vpop.f32.mrf.mxu1  ;;  %8443 = vmatprep.subr.bf16.mxu0 %v9704_v0 }
 0x274   : > { %v8346_v15 = vadd.f32 %v8345_v50, %v8344_v1 }
 0x275   : > { %v8347_v2 = vpop.f32.mrf.mxu1 }
 0x276   : > { %8444 = vmatpush3.bf16.msra.mxu0 %v9705_v49  ;;  %v1135_v36 = vpack.c.bf16 %v8346_v15, %v8343_v19  ;;  %v9720_v15 = vld [vmem:[#allocation2 + $0x140] ss:$8 sps:$4 sm:$0xff]  }
 0x277   : > { %8469 = vmatprep.subr.bf16.mxu0 %v10613_v20  ;;  %v8348_v47 = vpop.f32.mrf.mxu1  ;;  %v9726_v19 = vld [vmem:[#allocation2 + $0x160] ss:$8 sps:$4 sm:$0xff]  }
 0x278   : > { %v8349_v51 = vadd.f32 %v8348_v47, %v8347_v2 }
 0x279   : > { %v8350_v48 = vpop.f32.mrf.mxu1 }
 0x27b   : > { %v8351_v3 = vpop.f32.mrf.mxu1 }
 0x27c   : > { %v8352_v39 = vadd.f32 %v8351_v3, %v8350_v48  ;;  %v9708_v3 = vld [vmem:[#allocation2 + $0x104] ss:$8 sps:$4 sm:$0xff]  }
 0x27d   : > { %v8353_v4 = vpop.f32.mrf.mxu1 }
 0x27e   : > { %v1139_v55 = vpack.c.bf16 %v8352_v39, %v8349_v51  ;;  %v9732_v39 = vld [vmem:[#allocation2 + $0x180] ss:$8 sps:$4 sm:$0xff]   ;;  %v9735_v51 = vld [vmem:[#allocation2 + $0x190] ss:$8 sps:$4 sm:$0xff]  }
 0x27f   : > { %v8354_v5 = vpop.f32.mrf.mxu1 }
 0x280   : > { %v8355_v44 = vadd.f32 %v8354_v5, %v8353_v4  ;;  %v9706_v5 = vld [vmem:[#allocation2 + $0x100] ss:$8 sps:$4 sm:$0xff]  }
 0x281   : > { %v8356_v6 = vpop.f32.mrf.mxu1 }
 0x283   : > { %v8357_v7 = vpop.f32.mrf.mxu1 }
 0x284   : > { %v8358_v56 = vadd.f32 %v8357_v7, %v8356_v6  ;;  %v9709_v6 = vld [vmem:[#allocation2 + $0x114] ss:$8 sps:$4 sm:$0xff]  }
 0x285   : > { %v8359_v8 = vpop.f32.mrf.mxu1  ;;  %v9754_v7 = vld [vmem:[#allocation4 + $0x178] sm:$0xff]  }
 0x286   : > { %v1143_v62 = vpack.c.bf16 %v8358_v56, %v8355_v44  ;;  %8581 = vmatprep.subr.bf16.mxu1 %v9754_v7  ;;  %v9741_v56 = vld [vmem:[#allocation2 + $0x1b0] ss:$8 sps:$4 sm:$0xff]   ;;  %v9742_v44 = vld [vmem:[#allocation2 + $0x1c0] ss:$8 sps:$4 sm:$0xff]  }
 0x287   : > { %v8360_v9 = vpop.f32.mrf.mxu1 }
 0x288   : > { %v8361_v47 = vadd.f32 %v8360_v9, %v8359_v8  ;;  %v9755_v8 = vld [vmem:[#allocation4 + $0x138] sm:$0xff]  }
 0x289   : > { %v8362_v10 = vpop.f32.mrf.mxu1  ;;  %v9711_v9 = vld [vmem:[#allocation2 + $0x110] ss:$8 sps:$4 sm:$0xff]   ;;  %8582 = vmatpush3.bf16.msra.mxu1 %v9755_v8 }
 0x28a   : > { %v9770_v8 = vld [vmem:[#allocation4 + $0x1f8] sm:$0xff]  }
 0x28b   : > { %v8363_v11 = vpop.f32.mrf.mxu1 }
 0x28c   : > { %v8364_v1 = vadd.f32 %v8363_v11, %v8362_v10  ;;  %v9712_v10 = vld [vmem:[#allocation2 + $0x124] ss:$8 sps:$4 sm:$0xff]   ;;  %v9714_v11 = vld [vmem:[#allocation2 + $0x120] ss:$8 sps:$4 sm:$0xff]  }
 0x28d   : > { %v8365_v12 = vpop.f32.mrf.mxu1 }
 0x28e   : > { %v1147_v4 = vpack.c.bf16 %v8364_v1, %v8361_v47  ;;  %v9766_v1 = vld [vmem:[#allocation4 + $0x148] sm:$0xff]   ;;  %v9745_v47 = vld [vmem:[#allocation2 + $0x1d0] ss:$8 sps:$4 sm:$0xff]  }
 0x28f   : > { %v8366_v13 = vpop.f32.mrf.mxu1 }
 0x290   : > { %v8367_v17 = vadd.f32 %v8366_v13, %v8365_v12  ;;  %v9715_v12 = vld [vmem:[#allocation2 + $0x134] ss:$8 sps:$4 sm:$0xff]   ;;  %v9717_v13 = vld [vmem:[#allocation2 + $0x130] ss:$8 sps:$4 sm:$0xff]  }
 0x291   : > { %v8368_v14 = vpop.f32.mrf.mxu1 }
 0x293   : > { %v8369_v16 = vpop.f32.mrf.mxu1 }
 0x294   : > { %v8370_v18 = vadd.f32 %v8369_v16, %v8368_v14  ;;  %v9718_v14 = vld [vmem:[#allocation2 + $0x144] ss:$8 sps:$4 sm:$0xff]   ;;  %v9721_v16 = vld [vmem:[#allocation2 + $0x154] ss:$8 sps:$4 sm:$0xff]  }
 0x295   : > { %v8371_v22 = vpop.f32.mrf.mxu1 }
 0x296   : > { %v1136_v34 = vpack.c.bf16 %v8370_v18, %v8367_v17  ;;  %v9723_v17 = vld [vmem:[#allocation2 + $0x150] ss:$8 sps:$4 sm:$0xff]   ;;  %v9724_v18 = vld [vmem:[#allocation2 + $0x164] ss:$8 sps:$4 sm:$0xff]  }
 0x297   : > { %v8372_v37 = vpop.f32.mrf.mxu1 }
 0x298   : > { %1509 = vmatprep.mubr.bf16.mxu0 %v1136_v34  ;;  %v8373_v41 = vadd.f32 %v8372_v37, %v8371_v22  ;;  %v9727_v22 = vld [vmem:[#allocation2 + $0x174] ss:$8 sps:$4 sm:$0xff]   ;;  %v9729_v37 = vld [vmem:[#allocation2 + $0x170] ss:$8 sps:$4 sm:$0xff]  }
 0x299   : > { %v8374_v38 = vpop.f32.mrf.mxu1  ;;  %1510 = vmatmul.mubr.bf16.vlgmr.msra.gmra.mxu0 %v1135_v36  ;;  %v9756_v34 = vld [vmem:[#allocation4 + $0x170] sm:$0xff]  }
 0x29a   : > { %8470 = vmatpush3.bf16.msra.mxu0 %v10615_v21  ;;  %v9757_v36 = vld [vmem:[#allocation4 + $0x130] sm:$0xff]   ;;  %8583 = vmatprep.subr.bf16.mxu1 %v9756_v34 }
 0x29b   : > { %8471 = vmatprep.subr.bf16.mxu0 %v10617_v23  ;;  %v8375_v40 = vpop.f32.mrf.mxu1  ;;  %8584 = vmatpush3.bf16.msra.mxu1 %v9757_v36 }
 0x29c   : > { %v8376_v42 = vadd.f32 %v8375_v40, %v8374_v38  ;;  %v9730_v38 = vld [vmem:[#allocation2 + $0x184] ss:$8 sps:$4 sm:$0xff]   ;;  %v9733_v40 = vld [vmem:[#allocation2 + $0x194] ss:$8 sps:$4 sm:$0xff]  }
 0x29d   : > { %v8377_v52 = vpop.f32.mrf.mxu1 }
 0x29e   : > { %v1140_v53 = vpack.c.bf16 %v8376_v42, %v8373_v41  ;;  %8472 = vmatpush3.bf16.msra.mxu0 %v10622_v24  ;;  %v9758_v41 = vld [vmem:[#allocation4 + $0x168] sm:$0xff]  }
 0x29f   : > { %8473 = vmatprep.subr.bf16.mxu0 %v10624_v25  ;;  %v8378_v45 = vpop.f32.mrf.mxu1  ;;  %v9759_v42 = vld [vmem:[#allocation4 + $0x128] sm:$0xff]   ;;  %8585 = vmatprep.subr.bf16.mxu1 %v9758_v41 }
 0x2a0   : > { %1517 = vmatprep.mubr.bf16.mxu0 %v1140_v53  ;;  %v8379_v58 = vadd.f32 %v8378_v45, %v8377_v52  ;;  %8586 = vmatpush3.bf16.msra.mxu1 %v9759_v42  ;;  %v9736_v52 = vld [vmem:[#allocation2 + $0x1a4] ss:$8 sps:$4 sm:$0xff]   ;;  %v9738_v53 = vld [vmem:[#allocation2 + $0x1a0] ss:$8 sps:$4 sm:$0xff]  }
 0x2a1   : > { %v8380_v46 = vpop.f32.mrf.mxu1  ;;  %1518 = vmatmul.mubr.bf16.gmra.mxu0 %v1139_v55  ;;  %v9760_v55 = vld [vmem:[#allocation4 + $0x160] sm:$0xff]  }
 0x2a2   : > { %8474 = vmatpush3.bf16.msra.mxu0 %v10628_v26  ;;  %v9761_v45 = vld [vmem:[#allocation4 + $0x120] sm:$0xff]   ;;  %8587 = vmatprep.subr.bf16.mxu1 %v9760_v55 }
 0x2a3   : > { %8475 = vmatprep.subr.bf16.mxu0 %v10630_v27  ;;  %v8381_v57 = vpop.f32.mrf.mxu1 }
 0x2a4   : > { %v8382_v43 = vadd.f32 %v8381_v57, %v8380_v46  ;;  %v9739_v46 = vld [vmem:[#allocation2 + $0x1b4] ss:$8 sps:$4 sm:$0xff]   ;;  %8588 = vmatpush3.bf16.msra.mxu1 %v9761_v45  ;;  %v9744_v57 = vld [vmem:[#allocation2 + $0x1c4] ss:$8 sps:$4 sm:$0xff]  }
 0x2a5   : > { %v8383_v60 = vpop.f32.mrf.mxu1 }
 0x2a6   : > { %v1144_v61 = vpack.c.bf16 %v8382_v43, %v8379_v58  ;;  %8476 = vmatpush3.bf16.msra.mxu0 %v10634_v28  ;;  %v9762_v58 = vld [vmem:[#allocation4 + $0x158] sm:$0xff]  }
 0x2a7   : > { %8477 = vmatprep.subr.bf16.mxu0 %v10636_v29  ;;  %v8384_v63 = vpop.f32.mrf.mxu1  ;;  %v9763_v43 = vld [vmem:[#allocation4 + $0x118] sm:$0xff]   ;;  %8589 = vmatprep.subr.bf16.mxu1 %v9762_v58 }
 0x2a8   : > { %1525 = vmatprep.mubr.bf16.mxu0 %v1144_v61  ;;  %v8385_v50 = vadd.f32 %v8384_v63, %v8383_v60  ;;  %v9747_v60 = vld [vmem:[#allocation2 + $0x1d4] ss:$8 sps:$4 sm:$0xff]   ;;  %8590 = vmatpush3.bf16.msra.mxu1 %v9763_v43 }
 0x2a9   : > { %v8386_v0 = vpop.f32.mrf.mxu1  ;;  %1526 = vmatmul.mubr.bf16.gmra.mxu0 %v1143_v62  ;;  %v9764_v61 = vld [vmem:[#allocation4 + $0x150] sm:$0xff]  }
 0x2aa   : > { %8478 = vmatpush3.bf16.msra.mxu0 %v10611_v59  ;;  %v9765_v62 = vld [vmem:[#allocation4 + $0x110] sm:$0xff]   ;;  %8591 = vmatprep.subr.bf16.mxu1 %v9764_v61 }
 0x2ab   : > { %8479 = vmatprep.subr.bf16.mxu0 %v10640_v30  ;;  %v8387_v49 = vpop.f32.mrf.mxu1 }
 0x2ac   : > { %v8388_v2 = vadd.f32 %v8387_v49, %v8386_v0  ;;  %8592 = vmatpush3.bf16.msra.mxu1 %v9765_v62 }
 0x2ad   : > { %8593 = vmatprep.subr.bf16.mxu1 %v9766_v1 }
 0x2ae   : > { %v1148_v48 = vpack.c.bf16 %v8388_v2, %v8385_v50  ;;  %8480 = vmatpush3.bf16.msra.mxu0 %v10644_v31  ;;  %v9767_v50 = vld [vmem:[#allocation4 + $0x108] sm:$0xff]  }
 0x2af   : > { %8481 = vmatprep.subr.bf16.mxu0 %v10646_v32 }
 0x2b0   : > { %1533 = vmatprep.mubr.bf16.mxu0 %v1148_v48  ;;  %v9750_v48 = vld [vmem:[#allocation2 + $0x1e4] ss:$8 sps:$4 sm:$0xff]   ;;  %8594 = vmatpush3.bf16.msra.mxu1 %v9767_v50 }
 0x2b1   : > { %1534 = vmatmul.mubr.bf16.gmra.mxu0 %v1147_v4  ;;  %v9768_v4 = vld [vmem:[#allocation4 + $0x140] sm:$0xff]  }
 0x2b2   : > { %8482 = vmatpush3.bf16.msra.mxu0 %v10609_v54  ;;  %1767 = vmatprep.mubr.bf16.mxu0 %v9708_v3 }
 0x2b3   : > { %8483 = vmatprep.subr.bf16.mxu0 %v10650_v33  ;;  %8595 = vmatprep.subr.bf16.mxu1 %v9768_v4 }
 0x2b6   : > { %8484 = vmatpush3.bf16.msra.mxu0 %v10654_v35 }
 0x2b9   : > { %1768 = vmatmul.mubr.bf16.vlgmr.msra.gmra.mxu0 %v9706_v5  ;;  %v9769_v5 = vld [vmem:[#allocation4 + $0x100] sm:$0xff]  }
 0x2ba   : > { %1775 = vmatprep.mubr.bf16.mxu0 %v9709_v6  ;;  %8596 = vmatpush3.bf16.msra.mxu1 %v9769_v5 }
 0x2bb   : > { %8621 = vmatprep.subr.bf16.mxu1 %v9770_v8 }
 0x2c1   : > { %1776 = vmatmul.mubr.bf16.gmra.mxu0 %v9711_v9 }
 0x2c2   : > { %1783 = vmatprep.mubr.bf16.mxu0 %v9712_v10 }
 0x2c9   : > { %1784 = vmatmul.mubr.bf16.gmra.mxu0 %v9714_v11  ;;  %v9748_v11 = vld [vmem:[#allocation2 + $0x1e0] ss:$8 sps:$4 sm:$0xff]  }
 0x2ca   : > { %1791 = vmatprep.mubr.bf16.mxu0 %v9715_v12  ;;  %v9753_v12 = vld [vmem:[#allocation2 + $0x1f4] ss:$8 sps:$4 sm:$0xff]  }
 0x2d1   : > { %1792 = vmatmul.mubr.bf16.gmra.mxu0 %v9717_v13 }
 0x2d2   : > { %1799 = vmatprep.mubr.bf16.mxu0 %v9718_v14 }
 0x2d9   : > { %1800 = vmatmul.mubr.bf16.gmra.mxu0 %v9720_v15 }
 0x2da   : > { %1807 = vmatprep.mubr.bf16.mxu0 %v9721_v16 }
 0x2e1   : > { %1808 = vmatmul.mubr.bf16.gmra.mxu0 %v9723_v17 }
 0x2e2   : > { %1815 = vmatprep.mubr.bf16.mxu0 %v9724_v18  ;;  %v9751_v18 = vld [vmem:[#allocation2 + $0x1f0] ss:$8 sps:$4 sm:$0xff]  }
 0x2e9   : > { %1816 = vmatmul.mubr.bf16.gmra.mxu0 %v9726_v19 }
 0x2ea   : > { %1823 = vmatprep.mubr.bf16.mxu0 %v9727_v22 }
 0x2f1   : > { %1824 = vmatmul.mubr.bf16.gmra.mxu0 %v9729_v37 }
 0x2f2   : > { %1831 = vmatprep.mubr.bf16.mxu0 %v9730_v38 }
 0x2f9   : > { %1832 = vmatmul.mubr.bf16.gmra.mxu0 %v9732_v39  ;;  %v7691_v39 = vld [vmem:[%s11091_s4] ss:$0 sm:$0xff] }
 0x2fa   : > { %1839 = vmatprep.mubr.bf16.mxu0 %v9733_v40 }
 0x301   : > { %1840 = vmatmul.mubr.bf16.gmra.mxu0 %v9735_v51 }
 0x302   : > { %1847 = vmatprep.mubr.bf16.mxu0 %v9736_v52 }
 0x309   : > { %1848 = vmatmul.mubr.bf16.gmra.mxu0 %v9738_v53 }
 0x30a   : > { %1855 = vmatprep.mubr.bf16.mxu0 %v9739_v46 }
 0x311   : > { %1856 = vmatmul.mubr.bf16.gmra.mxu0 %v9741_v56 }
 0x312   : > { %1863 = vmatprep.mubr.bf16.mxu0 %v9744_v57 }
 0x319   : > { %v8405_v63 = vpop.f32.mrf.mxu0  ;;  %1864 = vmatmul.mubr.bf16.gmra.mxu0 %v9742_v44 }
 0x31a   : > { %1871 = vmatprep.mubr.bf16.mxu0 %v9747_v60 }
 0x31b   : > { %v8406_v0 = vpop.f32.mrf.mxu0 }
 0x31c   : > { %v8407_v49 = vadd.f32 %v8406_v0, %v8405_v63 }
 0x31d   : > { %v8408_v2 = vpop.f32.mrf.mxu0 }
 0x31e   : > { %v1447_v42 = vadd.f32 %v8407_v49, %v7691_v39 }
 0x31f   : > { %v8409_v3 = vpop.f32.mrf.mxu0 }
 0x320   : > { %v8410_v51 = vadd.f32 %v8409_v3, %v8408_v2 }
 0x321   : > { %v8411_v6 = vpop.f32.mrf.mxu0  ;;  %1872 = vmatmul.mubr.bf16.gmra.mxu0 %v9745_v47 }
 0x322   : > { %1879 = vmatprep.mubr.bf16.mxu0 %v9750_v48  ;;  %v1450_v46 = vadd.f32 %v8410_v51, %v7691_v39 }
 0x323   : > { %v8412_v7 = vpop.f32.mrf.mxu0 }
 0x324   : > { %v8413_v9 = vadd.f32 %v8412_v7, %v8411_v6 }
 0x325   : > { %v8414_v10 = vpop.f32.mrf.mxu0 }
 0x326   : > { %v1455_v44 = vadd.f32 %v8413_v9, %v7691_v39 }
 0x327   : > { %v8415_v13 = vpop.f32.mrf.mxu0 }
 0x328   : > { %v8416_v60 = vadd.f32 %v8415_v13, %v8414_v10 }
 0x329   : > { %v8417_v14 = vpop.f32.mrf.mxu0  ;;  %1880 = vmatmul.mubr.bf16.gmra.mxu0 %v9748_v11 }
 0x32a   : > { %1887 = vmatprep.mubr.bf16.mxu0 %v9753_v12  ;;  %v1458_v1 = vadd.f32 %v8416_v60, %v7691_v39 }
 0x32b   : > { %v8418_v15 = vpop.f32.mrf.mxu0 }
 0x32c   : > { %v8419_v16 = vadd.f32 %v8418_v15, %v8417_v14 }
 0x32d   : > { %v8420_v17 = vpop.f32.mrf.mxu0 }
 0x32e   : > { %v1463_v48 = vadd.f32 %v8419_v16, %v7691_v39 }
 0x32f   : > { %v8421_v19 = vpop.f32.mrf.mxu0 }
 0x330   : > { %v8422_v3 = vadd.f32 %v8421_v19, %v8420_v17 }
 0x331   : > { %v8423_v22 = vpop.f32.mrf.mxu0  ;;  %1888 = vmatmul.mubr.bf16.gmra.mxu0 %v9751_v18 }
 0x332   : > { %v1466_v8 = vadd.f32 %v8422_v3, %v7691_v39 }
 0x333   : > { %v8424_v34 = vpop.f32.mrf.mxu0 }
 0x334   : > { %v8425_v36 = vadd.f32 %v8424_v34, %v8423_v22 }
 0x335   : > { %v8426_v37 = vpop.f32.mrf.mxu0 }
 0x336   : > { %v1471_v13 = vadd.f32 %v8425_v36, %v7691_v39 }
 0x337   : > { %v8427_v38 = vpop.f32.mrf.mxu0 }
 0x338   : > { %v8428_v14 = vadd.f32 %v8427_v38, %v8426_v37 }
 0x33a   : > { %v1474_v16 = vadd.f32 %v8428_v14, %v7691_v39  ;;  %v9774_v14 = vld [vmem:[#allocation4 + $0x1e8] sm:$0xff]  }
 0x359   : > { %v8445_v40 = vpop.f32.mrf.mxu0 }
 0x35b   : > { %v8446_v41 = vpop.f32.mrf.mxu0 }
 0x35c   : > { %v8447_v52 = vadd.f32 %v8446_v41, %v8445_v40 }
 0x35d   : > { %v8448_v53 = vpop.f32.mrf.mxu0 }
 0x35e   : > { %v10682_v55 = vadd.f32 %v8447_v52, %v1447_v42 }
 0x35f   : > { %v8449_v45 = vpop.f32.mrf.mxu0 }
 0x360   : > { %v8450_v56 = vadd.f32 %v8449_v45, %v8448_v53 }
 0x361   : > { %v8451_v57 = vpop.f32.mrf.mxu0 }
 0x362   : > { %v10684_v58 = vadd.f32 %v8450_v56, %v1450_v46 }
 0x363   : > { %v8452_v43 = vpop.f32.mrf.mxu0 }
 0x364   : > { %v8453_v61 = vadd.f32 %v8452_v43, %v8451_v57 }
 0x365   : > { %v8454_v62 = vpop.f32.mrf.mxu0 }
 0x366   : > { %v10686_v63 = vadd.f32 %v8453_v61, %v1455_v44 }
 0x367   : > { %v8455_v0 = vpop.f32.mrf.mxu0 }
 0x368   : > { %v8456_v49 = vadd.f32 %v8455_v0, %v8454_v62 }
 0x369   : > { %v8457_v50 = vpop.f32.mrf.mxu0 }
 0x36a   : > { %v10688_v2 = vadd.f32 %v8456_v49, %v1458_v1 }
 0x36b   : > { %v8458_v47 = vpop.f32.mrf.mxu0 }
 0x36c   : > { %v8459_v4 = vadd.f32 %v8458_v47, %v8457_v50 }
 0x36d   : > { %v8460_v5 = vpop.f32.mrf.mxu0 }
 0x36e   : > { %v10690_v6 = vadd.f32 %v8459_v4, %v1463_v48  ;;  %v9771_v4 = vld [vmem:[#allocation4 + $0x1b8] sm:$0xff]  }
 0x36f   : > { %v8461_v7 = vpop.f32.mrf.mxu0 }
 0x370   : > { %v8462_v9 = vadd.f32 %v8461_v7, %v8460_v5 }
 0x371   : > { %v8463_v10 = vpop.f32.mrf.mxu0 }
 0x372   : > { %v10692_v11 = vadd.f32 %v8462_v9, %v1466_v8  ;;  %v9772_v8 = vld [vmem:[#allocation4 + $0x1f0] sm:$0xff]  }
 0x373   : > { %v8464_v12 = vpop.f32.mrf.mxu0 }
 0x374   : > { %v8465_v15 = vadd.f32 %v8464_v12, %v8463_v10  ;;  %v9773_v10 = vld [vmem:[#allocation4 + $0x1b0] sm:$0xff]  }
 0x375   : > { %v8466_v18 = vpop.f32.mrf.mxu0 }
 0x376   : > { %v10694_v22 = vadd.f32 %v8465_v15, %v1471_v13 }
 0x377   : > { %v8467_v34 = vpop.f32.mrf.mxu0 }
 0x378   : > { %v8468_v17 = vadd.f32 %v8467_v34, %v8466_v18 }
 0x379   : > { %v8485_v19 = vpop.f32.mrf.mxu0 }
 0x37a   : > { %v10696_v40 = vadd.f32 %v8468_v17, %v1474_v16 }
 0x37b   : > { %v8486_v41 = vpop.f32.mrf.mxu0 }
 0x37c   : > { %v8487_v47 = vadd.f32 %v8486_v41, %v8485_v19  ;;  %v9775_v19 = vld [vmem:[#allocation4 + $0x1a8] sm:$0xff]  }
 0x37d   : > { %v8488_v42 = vpop.f32.mrf.mxu0 }
 0x37f   : > { %v8489_v51 = vpop.f32.mrf.mxu0 }
 0x380   : > { %v8490_v0 = vadd.f32 %v8489_v51, %v8488_v42  ;;  %v9776_v51 = vld [vmem:[#allocation4 + $0x1e0] sm:$0xff]  }
 0x381   : > { %v8491_v52 = vpop.f32.mrf.mxu0 }
 0x382   : > { %v1896_v5 = vpack.c.bf16 %v8490_v0, %v8487_v47 }
 0x383   : > { %v8492_v53 = vpop.f32.mrf.mxu0 }
 0x384   : > { %v8493_v34 = vadd.f32 %v8492_v53, %v8491_v52 }
 0x385   : > { %v8494_v45 = vpop.f32.mrf.mxu0 }
 0x387   : > { %v8495_v46 = vpop.f32.mrf.mxu0 }
 0x388   : > { %v8496_v12 = vadd.f32 %v8495_v46, %v8494_v45 }
 0x389   : > { %v8497_v56 = vpop.f32.mrf.mxu0 }
 0x38a   : > { %v1900_v41 = vpack.c.bf16 %v8496_v12, %v8493_v34  ;;  %v9783_v12 = vld [vmem:[#allocation4 + $0x188] sm:$0xff]  }
 0x38b   : > { %v8498_v36 = vpop.f32.mrf.mxu0 }
 0x38c   : > { %v8499_v52 = vadd.f32 %v8498_v36, %v8497_v56 }
 0x38d   : > { %v8500_v37 = vpop.f32.mrf.mxu0 }
 0x38f   : > { %v8501_v38 = vpop.f32.mrf.mxu0 }
 0x390   : > { %v8502_v45 = vadd.f32 %v8501_v38, %v8500_v37 }
 0x391   : > { %v10698_v57 = vpop.f32.mrf.mxu0 }
 0x392   : > { %v1904_v47 = vpack.c.bf16 %v8502_v45, %v8499_v52 }
 0x393   : > { %v10700_v43 = vpop.f32.mrf.mxu0 }
 0x394   : > { %v8505_v56 = vadd.f32 %v10700_v43, %v10698_v57 }
 0x395   : > { %v8506_v39 = vpop.f32.mrf.mxu0 }
 0x397   : > { %v8507_v44 = vpop.f32.mrf.mxu0 }
 0x398   : > { %v8508_v37 = vadd.f32 %v8507_v44, %v8506_v39  ;;  %v9785_v39 = vld [vmem:[#allocation4 + $0x180] sm:$0xff]  }
 0x399   : > { %v8509_v60 = vpop.f32.mrf.mxu0 }
 0x39b   : > { %v8510_v61 = vpop.f32.mrf.mxu0 }
 0x39c   : > { %v8511_v49 = vadd.f32 %v8510_v61, %v8509_v60  ;;  %v9777_v61 = vld [vmem:[#allocation4 + $0x1a0] sm:$0xff]  }
 0x39d   : > { %v8512_v62 = vpop.f32.mrf.mxu0 }
 0x39f   : > { %v8513_v1 = vpop.f32.mrf.mxu0 }
 0x3a0   : > { %v8514_v50 = vadd.f32 %v8513_v1, %v8512_v62  ;;  %v9778_v62 = vld [vmem:[#allocation4 + $0x1d8] sm:$0xff]  }
 0x3a1   : > { %v8515_v48 = vpop.f32.mrf.mxu0 }
 0x3a2   : > { %v1897_v3 = vpack.c.bf16 %v8514_v50, %v8511_v49  ;;  %v9779_v50 = vld [vmem:[#allocation4 + $0x198] sm:$0xff]  }
 0x3a3   : > { %v8516_v7 = vpop.f32.mrf.mxu0 }
 0x3a4   : > { %2201 = vmatprep.mubr.bf16.mxu1 %v1897_v3  ;;  %v8517_v15 = vadd.f32 %v8516_v7, %v8515_v48  ;;  %v9780_v3 = vld [vmem:[#allocation4 + $0x1d0] sm:$0xff]   ;;  %v9782_v7 = vld [vmem:[#allocation4 + $0x1c8] sm:$0xff]  }
 0x3a5   : > { %v8518_v9 = vpop.f32.mrf.mxu0  ;;  %2202 = vmatmul.mubr.bf16.vlgmr.msra.gmra.mxu1 %v1896_v5  ;;  %v9781_v5 = vld [vmem:[#allocation4 + $0x190] sm:$0xff]  }
 0x3a6   : > { %8622 = vmatpush3.bf16.msra.mxu1 %v9771_v4 }
 0x3a7   : > { %v8519_v13 = vpop.f32.mrf.mxu0  ;;  %8623 = vmatprep.subr.bf16.mxu1 %v9772_v8 }
 0x3a8   : > { %v8520_v18 = vadd.f32 %v8519_v13, %v8518_v9  ;;  %v1908_v13 = vpack.c.bf16 %v8508_v37, %v8505_v56 }
 0x3a9   : > { %v8521_v16 = vpop.f32.mrf.mxu0 }
 0x3aa   : > { %v1901_v17 = vpack.c.bf16 %v8520_v18, %v8517_v15  ;;  %8624 = vmatpush3.bf16.msra.mxu1 %v9773_v10  ;;  %v9784_v15 = vld [vmem:[#allocation4 + $0x1c0] sm:$0xff]  }
 0x3ab   : > { %v8522_v42 = vpop.f32.mrf.mxu0  ;;  %8625 = vmatprep.subr.bf16.mxu1 %v9774_v14 }
 0x3ac   : > { %2209 = vmatprep.mubr.bf16.mxu1 %v1901_v17  ;;  %v8523_v0 = vadd.f32 %v8522_v42, %v8521_v16 }
 0x3ad   : > { %v8524_v60 = vpop.f32.mrf.mxu0  ;;  %2210 = vmatmul.mubr.bf16.gmra.mxu1 %v1900_v41 }
 0x3ae   : > { %8626 = vmatpush3.bf16.msra.mxu1 %v9775_v19 }
 0x3af   : > { %v8525_v46 = vpop.f32.mrf.mxu0  ;;  %8627 = vmatprep.subr.bf16.mxu1 %v9776_v51 }
 0x3b0   : > { %v8526_v1 = vadd.f32 %v8525_v46, %v8524_v60 }
 0x3b1   : > { %v8527_v53 = vpop.f32.mrf.mxu0 }
 0x3b2   : > { %v1905_v49 = vpack.c.bf16 %v8526_v1, %v8523_v0  ;;  %8628 = vmatpush3.bf16.msra.mxu1 %v9777_v61 }
 0x3b3   : > { %v8528_v48 = vpop.f32.mrf.mxu0  ;;  %8629 = vmatprep.subr.bf16.mxu1 %v9778_v62 }
 0x3b4   : > { %2217 = vmatprep.mubr.bf16.mxu1 %v1905_v49  ;;  %v8529_v8 = vadd.f32 %v8528_v48, %v8527_v53 }
 0x3b5   : > { %v8530_v4 = vpop.f32.mrf.mxu0  ;;  %2218 = vmatmul.mubr.bf16.gmra.mxu1 %v1904_v47 }
 0x3b6   : > { %8630 = vmatpush3.bf16.msra.mxu1 %v9779_v50 }
 0x3b7   : > { %v8531_v38 = vpop.f32.mrf.mxu0  ;;  %8631 = vmatprep.subr.bf16.mxu1 %v9780_v3 }
 0x3b8   : > { %v8532_v9 = vadd.f32 %v8531_v38, %v8530_v4 }
 0x3b9   : > { %v8533_v36 = vpop.f32.mrf.mxu0 }
 0x3ba   : > { %v1909_v10 = vpack.c.bf16 %v8532_v9, %v8529_v8  ;;  %8632 = vmatpush3.bf16.msra.mxu1 %v9781_v5 }
 0x3bb   : > { %v8534_v14 = vpop.f32.mrf.mxu0  ;;  %8633 = vmatprep.subr.bf16.mxu1 %v9782_v7 }
 0x3bc   : > { %2225 = vmatprep.mubr.bf16.mxu1 %v1909_v10  ;;  %v8535_v50 = vadd.f32 %v8534_v14, %v8533_v36 }
 0x3bd   : > { %v8536_v18 = vpop.f32.mrf.mxu0  ;;  %2226 = vmatmul.mubr.bf16.gmra.mxu1 %v1908_v13 }
 0x3be   : > { %8634 = vmatpush3.bf16.msra.mxu1 %v9783_v12 }
 0x3bf   : > { %v8537_v44 = vpop.f32.mrf.mxu0  ;;  %8635 = vmatprep.subr.bf16.mxu1 %v9784_v15 }
 0x3c0   : > { %v8538_v1 = vadd.f32 %v8537_v44, %v8536_v18 }
 0x3c1   : > { %v8539_v34 = vpop.f32.mrf.mxu0 }
 0x3c2   : > { %8636 = vmatpush3.bf16.msra.mxu1 %v9785_v39  ;;  %v1898_v3 = vpack.c.bf16 %v8538_v1, %v8535_v50  ;;  %v9788_v1 = vld [vmem:[#allocation2 + $0x204] ss:$8 sps:$4 sm:$0xff]   ;;  %v9794_v50 = vld [vmem:[#allocation2 + $0x220] ss:$8 sps:$4 sm:$0xff]  }
 0x3c3   : > { %8661 = vmatprep.subr.bf16.mxu1 %v10613_v20  ;;  %v8540_v57 = vpop.f32.mrf.mxu0 }
 0x3c4   : > { %v8541_v9 = vadd.f32 %v8540_v57, %v8539_v34 }
 0x3c5   : > { %v8542_v43 = vpop.f32.mrf.mxu0 }
 0x3c7   : > { %v8543_v16 = vpop.f32.mrf.mxu0 }
 0x3c8   : > { %v8544_v37 = vadd.f32 %v8543_v16, %v8542_v43 }
 0x3c9   : > { %v8545_v17 = vpop.f32.mrf.mxu0 }
 0x3ca   : > { %v1902_v36 = vpack.c.bf16 %v8544_v37, %v8541_v9  ;;  %v9801_v37 = vld [vmem:[#allocation2 + $0x250] ss:$8 sps:$4 sm:$0xff]  }
 0x3cb   : > { %v8546_v19 = vpop.f32.mrf.mxu0  ;;  %v9836_v9 = vld [vmem:[#allocation4 + $0x270] sm:$0xff]  }
 0x3cc   : > { %v8547_v44 = vadd.f32 %v8546_v19, %v8545_v17 }
 0x3cd   : > { %v8548_v41 = vpop.f32.mrf.mxu0 }
 0x3cf   : > { %v8549_v42 = vpop.f32.mrf.mxu0 }
 0x3d0   : > { %v8550_v14 = vadd.f32 %v8549_v42, %v8548_v41 }
 0x3d1   : > { %v8551_v51 = vpop.f32.mrf.mxu0 }
 0x3d2   : > { %v1906_v43 = vpack.c.bf16 %v8550_v14, %v8547_v44  ;;  %v9838_v14 = vld [vmem:[#allocation4 + $0x268] sm:$0xff]  }
 0x3d3   : > { %v8552_v60 = vpop.f32.mrf.mxu0  ;;  %v9816_v44 = vld [vmem:[#allocation2 + $0x2a0] ss:$8 sps:$4 sm:$0xff]  }
 0x3d4   : > { %v8553_v17 = vadd.f32 %v8552_v60, %v8551_v51  ;;  %v9835_v51 = vld [vmem:[#allocation4 + $0x238] sm:$0xff]  }
 0x3d5   : > { %v8554_v61 = vpop.f32.mrf.mxu0  ;;  %v9791_v60 = vld [vmem:[#allocation2 + $0x210] ss:$8 sps:$4 sm:$0xff]  }
 0x3d7   : > { %v8555_v45 = vpop.f32.mrf.mxu0 }
 0x3d8   : > { %v8556_v41 = vadd.f32 %v8555_v45, %v8554_v61  ;;  %v9786_v61 = vld [vmem:[#allocation2 + $0x200] ss:$8 sps:$4 sm:$0xff]   ;;  %v9789_v45 = vld [vmem:[#allocation2 + $0x214] ss:$8 sps:$4 sm:$0xff]  }
 0x3d9   : > { %v8557_v46 = vpop.f32.mrf.mxu0 }
 0x3db   : > { %v8558_v62 = vpop.f32.mrf.mxu0 }
 0x3dc   : > { %v8559_v53 = vadd.f32 %v8558_v62, %v8557_v46 }
 0x3dd   : > { %v8560_v0 = vpop.f32.mrf.mxu0 }
 0x3df   : > { %v8561_v52 = vpop.f32.mrf.mxu0 }
 0x3e0   : > { %v8562_v49 = vadd.f32 %v8561_v52, %v8560_v0  ;;  %v1910_v52 = vpack.c.bf16 %v8556_v41, %v8553_v17  ;;  %v9842_v41 = vld [vmem:[#allocation4 + $0x258] sm:$0xff]   ;;  %v9844_v17 = vld [vmem:[#allocation4 + $0x250] sm:$0xff]  }
 0x3e1   : > { %v8563_v47 = vpop.f32.mrf.mxu0 }
 0x3e2   : > { %v1899_v48 = vpack.c.bf16 %v8562_v49, %v8559_v53  ;;  %v9834_v53 = vld [vmem:[#allocation4 + $0x278] sm:$0xff]   ;;  %v9792_v49 = vld [vmem:[#allocation2 + $0x224] ss:$8 sps:$4 sm:$0xff]  }
 0x3e3   : > { %v8564_v4 = vpop.f32.mrf.mxu0  ;;  %8773 = vmatprep.subr.bf16.mxu0 %v9834_v53  ;;  %v9847_v53 = vld [vmem:[#allocation4 + $0x208] sm:$0xff]  }
 0x3e4   : > { %2266 = vmatprep.mubr.bf16.mxu1 %v1899_v48  ;;  %v8565_v7 = vadd.f32 %v8564_v4, %v8563_v47  ;;  %8774 = vmatpush3.bf16.msra.mxu0 %v9835_v51  ;;  %v9795_v47 = vld [vmem:[#allocation2 + $0x234] ss:$8 sps:$4 sm:$0xff]   ;;  %v9797_v48 = vld [vmem:[#allocation2 + $0x230] ss:$8 sps:$4 sm:$0xff]   ;;  %v9798_v4 = vld [vmem:[#allocation2 + $0x240] ss:$8 sps:$4 sm:$0xff]  }
 0x3e5   : > { %v8566_v5 = vpop.f32.mrf.mxu0  ;;  %2267 = vmatmul.mubr.bf16.vlgmr.msra.gmra.mxu1 %v1898_v3  ;;  %v9800_v3 = vld [vmem:[#allocation2 + $0x244] ss:$8 sps:$4 sm:$0xff]   ;;  %8775 = vmatprep.subr.bf16.mxu0 %v9836_v9 }
 0x3e6   : > { %8662 = vmatpush3.bf16.msra.mxu1 %v10615_v21 }
 0x3e7   : > { %8663 = vmatprep.subr.bf16.mxu1 %v10617_v23  ;;  %v8567_v38 = vpop.f32.mrf.mxu0 }
 0x3e8   : > { %v8568_v8 = vadd.f32 %v8567_v38, %v8566_v5  ;;  %v9803_v5 = vld [vmem:[#allocation2 + $0x254] ss:$8 sps:$4 sm:$0xff]   ;;  %v9806_v38 = vld [vmem:[#allocation2 + $0x264] ss:$8 sps:$4 sm:$0xff]  }
 0x3e9   : > { %v8569_v56 = vpop.f32.mrf.mxu0 }
 0x3ea   : > { %v1903_v10 = vpack.c.bf16 %v8568_v8, %v8565_v7  ;;  %8664 = vmatpush3.bf16.msra.mxu1 %v10622_v24  ;;  %v9804_v7 = vld [vmem:[#allocation2 + $0x260] ss:$8 sps:$4 sm:$0xff]   ;;  %v9809_v8 = vld [vmem:[#allocation2 + $0x274] ss:$8 sps:$4 sm:$0xff]  }
 0x3eb   : > { %8665 = vmatprep.subr.bf16.mxu1 %v10624_v25  ;;  %v8570_v12 = vpop.f32.mrf.mxu0 }
 0x3ec   : > { %2274 = vmatprep.mubr.bf16.mxu1 %v1903_v10  ;;  %v8571_v18 = vadd.f32 %v8570_v12, %v8569_v56  ;;  %v9837_v56 = vld [vmem:[#allocation4 + $0x230] sm:$0xff]   ;;  %v9810_v12 = vld [vmem:[#allocation2 + $0x280] ss:$8 sps:$4 sm:$0xff]  }
 0x3ed   : > { %v8572_v13 = vpop.f32.mrf.mxu0  ;;  %2275 = vmatmul.mubr.bf16.gmra.mxu1 %v1902_v36  ;;  %8776 = vmatpush3.bf16.msra.mxu0 %v9837_v56  ;;  %v9807_v10 = vld [vmem:[#allocation2 + $0x270] ss:$8 sps:$4 sm:$0xff]   ;;  %v9812_v36 = vld [vmem:[#allocation2 + $0x284] ss:$8 sps:$4 sm:$0xff]  }
 0x3ee   : > { %8666 = vmatpush3.bf16.msra.mxu1 %v10628_v26  ;;  %8777 = vmatprep.subr.bf16.mxu0 %v9838_v14 }
 0x3ef   : > { %8667 = vmatprep.subr.bf16.mxu1 %v10630_v27  ;;  %v8573_v15 = vpop.f32.mrf.mxu0 }
 0x3f0   : > { %v8574_v39 = vadd.f32 %v8573_v15, %v8572_v13  ;;  %v9815_v13 = vld [vmem:[#allocation2 + $0x294] ss:$8 sps:$4 sm:$0xff]   ;;  %v9839_v15 = vld [vmem:[#allocation4 + $0x228] sm:$0xff]  }
 0x3f1   : > { %v8575_v34 = vpop.f32.mrf.mxu0  ;;  %8778 = vmatpush3.bf16.msra.mxu0 %v9839_v15 }
 0x3f2   : > { %v1907_v57 = vpack.c.bf16 %v8574_v39, %v8571_v18  ;;  %8668 = vmatpush3.bf16.msra.mxu1 %v10634_v28  ;;  %v9813_v18 = vld [vmem:[#allocation2 + $0x290] ss:$8 sps:$4 sm:$0xff]   ;;  %v9818_v39 = vld [vmem:[#allocation2 + $0x2a4] ss:$8 sps:$4 sm:$0xff]  }
 0x3f3   : > { %8669 = vmatprep.subr.bf16.mxu1 %v10636_v29  ;;  %v8576_v16 = vpop.f32.mrf.mxu0 }
 0x3f4   : > { %2282 = vmatprep.mubr.bf16.mxu1 %v1907_v57  ;;  %v8577_v62 = vadd.f32 %v8576_v16, %v8575_v34  ;;  %v9840_v34 = vld [vmem:[#allocation4 + $0x260] sm:$0xff]   ;;  %v9819_v16 = vld [vmem:[#allocation2 + $0x2b0] ss:$8 sps:$4 sm:$0xff]  }
 0x3f5   : > { %v8578_v46 = vpop.f32.mrf.mxu0  ;;  %2283 = vmatmul.mubr.bf16.gmra.mxu1 %v1906_v43  ;;  %v9841_v57 = vld [vmem:[#allocation4 + $0x220] sm:$0xff]   ;;  %v9821_v43 = vld [vmem:[#allocation2 + $0x2b4] ss:$8 sps:$4 sm:$0xff]   ;;  %8779 = vmatprep.subr.bf16.mxu0 %v9840_v34 }
 0x3f6   : > { %8670 = vmatpush3.bf16.msra.mxu1 %v10611_v59  ;;  %8780 = vmatpush3.bf16.msra.mxu0 %v9841_v57 }
 0x3f7   : > { %8671 = vmatprep.subr.bf16.mxu1 %v10640_v30  ;;  %v8579_v42 = vpop.f32.mrf.mxu0  ;;  %8781 = vmatprep.subr.bf16.mxu0 %v9842_v41 }
 0x3f8   : > { %v8580_v0 = vadd.f32 %v8579_v42, %v8578_v46  ;;  %v9824_v46 = vld [vmem:[#allocation2 + $0x2c4] ss:$8 sps:$4 sm:$0xff]   ;;  %v9843_v42 = vld [vmem:[#allocation4 + $0x218] sm:$0xff]  }
 0x3fa   : > { %v1911_v19 = vpack.c.bf16 %v8580_v0, %v8577_v62  ;;  %8672 = vmatpush3.bf16.msra.mxu1 %v10644_v31  ;;  %v9822_v62 = vld [vmem:[#allocation2 + $0x2c0] ss:$8 sps:$4 sm:$0xff]   ;;  %v9827_v0 = vld [vmem:[#allocation2 + $0x2d4] ss:$8 sps:$4 sm:$0xff]   ;;  %8782 = vmatpush3.bf16.msra.mxu0 %v9843_v42 }
 0x3fb   : > { %8673 = vmatprep.subr.bf16.mxu1 %v10646_v32  ;;  %8783 = vmatprep.subr.bf16.mxu0 %v9844_v17 }
 0x3fc   : > { %2290 = vmatprep.mubr.bf16.mxu1 %v1911_v19  ;;  %v9845_v19 = vld [vmem:[#allocation4 + $0x210] sm:$0xff]  }
 0x3fd   : > { %2291 = vmatmul.mubr.bf16.gmra.mxu1 %v1910_v52 }
 0x3fe   : > { %8674 = vmatpush3.bf16.msra.mxu1 %v10609_v54  ;;  %2532 = vmatprep.mubr.bf16.mxu1 %v9788_v1 }
 0x3ff   : > { %8675 = vmatprep.subr.bf16.mxu1 %v10650_v33  ;;  %8784 = vmatpush3.bf16.msra.mxu0 %v9845_v19 }
 0x402   : > { %8676 = vmatpush3.bf16.msra.mxu1 %v10654_v35 }
 0x405   : > { %2533 = vmatmul.mubr.bf16.vlgmr.msra.gmra.mxu1 %v9786_v61  ;;  %v9846_v61 = vld [vmem:[#allocation4 + $0x248] sm:$0xff]  }
 0x406   : > { %2540 = vmatprep.mubr.bf16.mxu1 %v9789_v45  ;;  %8785 = vmatprep.subr.bf16.mxu0 %v9846_v61 }
 0x407   : > { %8786 = vmatpush3.bf16.msra.mxu0 %v9847_v53 }
 0x40d   : > { %2541 = vmatmul.mubr.bf16.gmra.mxu1 %v9791_v60  ;;  %v9825_v60 = vld [vmem:[#allocation2 + $0x2d0] ss:$8 sps:$4 sm:$0xff]  }
 0x40e   : > { %2548 = vmatprep.mubr.bf16.mxu1 %v9792_v49  ;;  %v9830_v49 = vld [vmem:[#allocation2 + $0x2e4] ss:$8 sps:$4 sm:$0xff]  }
 0x415   : > { %2549 = vmatmul.mubr.bf16.gmra.mxu1 %v9794_v50 }
 0x416   : > { %2556 = vmatprep.mubr.bf16.mxu1 %v9795_v47  ;;  %v9848_v47 = vld [vmem:[#allocation4 + $0x240] sm:$0xff]  }
 0x417   : > { %8787 = vmatprep.subr.bf16.mxu0 %v9848_v47 }
 0x41d   : > { %2557 = vmatmul.mubr.bf16.gmra.mxu1 %v9797_v48  ;;  %v9849_v48 = vld [vmem:[#allocation4 + $0x200] sm:$0xff]  }
 0x41e   : > { %2564 = vmatprep.mubr.bf16.mxu1 %v9800_v3  ;;  %8788 = vmatpush3.bf16.msra.mxu0 %v9849_v48 }
 0x425   : > { %2565 = vmatmul.mubr.bf16.gmra.mxu1 %v9798_v4 }
 0x426   : > { %2572 = vmatprep.mubr.bf16.mxu1 %v9803_v5  ;;  %v9850_v5 = vld [vmem:[#allocation4 + $0x2f8] sm:$0xff]  }
 0x427   : > { %8813 = vmatprep.subr.bf16.mxu0 %v9850_v5 }
 0x42d   : > { %2573 = vmatmul.mubr.bf16.gmra.mxu1 %v9801_v37 }
 0x42e   : > { %2580 = vmatprep.mubr.bf16.mxu1 %v9806_v38 }
 0x435   : > { %2581 = vmatmul.mubr.bf16.gmra.mxu1 %v9804_v7  ;;  %v9828_v7 = vld [vmem:[#allocation2 + $0x2e0] ss:$8 sps:$4 sm:$0xff]  }
 0x436   : > { %2588 = vmatprep.mubr.bf16.mxu1 %v9809_v8  ;;  %v9833_v8 = vld [vmem:[#allocation2 + $0x2f4] ss:$8 sps:$4 sm:$0xff]  }
 0x43d   : > { %2589 = vmatmul.mubr.bf16.gmra.mxu1 %v9807_v10 }
 0x43e   : > { %2596 = vmatprep.mubr.bf16.mxu1 %v9812_v36 }
 0x445   : > { %2597 = vmatmul.mubr.bf16.gmra.mxu1 %v9810_v12 }
 0x446   : > { %2604 = vmatprep.mubr.bf16.mxu1 %v9815_v13  ;;  %v9831_v13 = vld [vmem:[#allocation2 + $0x2f0] ss:$8 sps:$4 sm:$0xff]  }
 0x44d   : > { %2605 = vmatmul.mubr.bf16.gmra.mxu1 %v9813_v18 }
 0x44e   : > { %2612 = vmatprep.mubr.bf16.mxu1 %v9818_v39 }
 0x455   : > { %2613 = vmatmul.mubr.bf16.gmra.mxu1 %v9816_v44 }
 0x456   : > { %2620 = vmatprep.mubr.bf16.mxu1 %v9821_v43 }
 0x45d   : > { %2621 = vmatmul.mubr.bf16.gmra.mxu1 %v9819_v16 }
 0x45e   : > { %2628 = vmatprep.mubr.bf16.mxu1 %v9824_v46 }
 0x465   : > { %v8597_v1 = vpop.f32.mrf.mxu1  ;;  %2629 = vmatmul.mubr.bf16.gmra.mxu1 %v9822_v62 }
 0x466   : > { %2636 = vmatprep.mubr.bf16.mxu1 %v9827_v0 }
 0x467   : > { %v8598_v52 = vpop.f32.mrf.mxu1 }
 0x468   : > { %v8599_v45 = vadd.f32 %v8598_v52, %v8597_v1 }
 0x469   : > { %v8600_v51 = vpop.f32.mrf.mxu1 }
 0x46b   : > { %v8601_v50 = vpop.f32.mrf.mxu1 }
 0x46c   : > { %v8602_v62 = vadd.f32 %v8601_v50, %v8600_v51 }
 0x46d   : > { %v8603_v3 = vpop.f32.mrf.mxu1  ;;  %2637 = vmatmul.mubr.bf16.gmra.mxu1 %v9825_v60 }
 0x46e   : > { %2644 = vmatprep.mubr.bf16.mxu1 %v9830_v49 }
 0x46f   : > { %v8604_v4 = vpop.f32.mrf.mxu1 }
 0x470   : > { %v8605_v37 = vadd.f32 %v8604_v4, %v8603_v3 }
 0x471   : > { %v8606_v38 = vpop.f32.mrf.mxu1 }
 0x473   : > { %v8607_v9 = vpop.f32.mrf.mxu1 }
 0x474   : > { %v8608_v48 = vadd.f32 %v8607_v9, %v8606_v38 }
 0x475   : > { %v8609_v56 = vpop.f32.mrf.mxu1  ;;  %2645 = vmatmul.mubr.bf16.gmra.mxu1 %v9828_v7 }
 0x476   : > { %2652 = vmatprep.mubr.bf16.mxu1 %v9833_v8 }
 0x477   : > { %v8610_v10 = vpop.f32.mrf.mxu1 }
 0x478   : > { %v8611_v36 = vadd.f32 %v8610_v10, %v8609_v56 }
 0x479   : > { %v8612_v12 = vpop.f32.mrf.mxu1 }
 0x47b   : > { %v8613_v14 = vpop.f32.mrf.mxu1 }
 0x47c   : > { %v8614_v56 = vadd.f32 %v8613_v14, %v8612_v12 }
 0x47d   : > { %v8615_v15 = vpop.f32.mrf.mxu1  ;;  %2653 = vmatmul.mubr.bf16.gmra.mxu1 %v9831_v13 }
 0x47f   : > { %v8616_v18 = vpop.f32.mrf.mxu1 }
 0x480   : > { %v8617_v39 = vadd.f32 %v8616_v18, %v8615_v15 }
 0x481   : > { %v8618_v44 = vpop.f32.mrf.mxu1 }
 0x483   : > { %v8619_v34 = vpop.f32.mrf.mxu1 }
 0x4a5   : > { %v8637_v57 = vpop.f32.mrf.mxu1 }
 0x4a7   : > { %v8638_v43 = vpop.f32.mrf.mxu1 }
 0x4a8   : > { %v8639_v16 = vadd.f32 %v8638_v43, %v8637_v57  ;;  %v8620_v43 = vadd.f32 %v8619_v34, %v8618_v44 }
 0x4a9   : > { %v8640_v46 = vpop.f32.mrf.mxu1 }
 0x4aa   : > { %v2269_v41 = vadd.f32 %v8639_v16, %v8599_v45 }
 0x4ab   : > { %v8641_v42 = vpop.f32.mrf.mxu1 }
 0x4ac   : > { %v10721_v0 = vadd.f32 %v2269_v41, %v10682_v55  ;;  %v8642_v17 = vadd.f32 %v8641_v42, %v8640_v46 }
 0x4ad   : > { %v8643_v19 = vpop.f32.mrf.mxu1 }
 0x4ae   : > { %v2272_v1 = vadd.f32 %v8642_v17, %v8602_v62 }
 0x4af   : > { %v8644_v52 = vpop.f32.mrf.mxu1 }
 0x4b0   : > { %v10724_v61 = vadd.f32 %v2272_v1, %v10684_v58  ;;  %v8645_v53 = vadd.f32 %v8644_v52, %v8643_v19 }
 0x4b1   : > { %v8646_v60 = vpop.f32.mrf.mxu1 }
 0x4b2   : > { %v2277_v49 = vadd.f32 %v8645_v53, %v8605_v37 }
 0x4b3   : > { %v8647_v47 = vpop.f32.mrf.mxu1 }
 0x4b4   : > { %v10727_v3 = vadd.f32 %v2277_v49, %v10686_v63  ;;  %v8648_v45 = vadd.f32 %v8647_v47, %v8646_v60 }
 0x4b5   : > { %v8649_v51 = vpop.f32.mrf.mxu1 }
 0x4b6   : > { %v2280_v50 = vadd.f32 %v8648_v45, %v8608_v48 }
 0x4b7   : > { %v8650_v55 = vpop.f32.mrf.mxu1 }
 0x4b8   : > { %v10730_v4 = vadd.f32 %v2280_v50, %v10688_v2  ;;  %v8651_v5 = vadd.f32 %v8650_v55, %v8649_v51 }
 0x4b9   : > { %v8652_v7 = vpop.f32.mrf.mxu1 }
 0x4ba   : > { %v2285_v8 = vadd.f32 %v8651_v5, %v8611_v36 }
 0x4bb   : > { %v8653_v58 = vpop.f32.mrf.mxu1 }
 0x4bc   : > { %v10733_v10 = vadd.f32 %v2285_v8, %v10690_v6  ;;  %v8654_v37 = vadd.f32 %v8653_v58, %v8652_v7  ;;  %v9851_v8 = vld [vmem:[#allocation4 + $0x2b8] sm:$0xff]  }
 0x4bd   : > { %v8655_v38 = vpop.f32.mrf.mxu1 }
 0x4be   : > { %v2288_v9 = vadd.f32 %v8654_v37, %v8614_v56  ;;  %v9852_v37 = vld [vmem:[#allocation4 + $0x2f0] sm:$0xff]  }
 0x4bf   : > { %v8656_v63 = vpop.f32.mrf.mxu1 }
 0x4c0   : > { %v10736_v13 = vadd.f32 %v2288_v9, %v10692_v11  ;;  %v8657_v15 = vadd.f32 %v8656_v63, %v8655_v38  ;;  %v9853_v9 = vld [vmem:[#allocation4 + $0x2b0] sm:$0xff]  }
 0x4c1   : > { %v8658_v18 = vpop.f32.mrf.mxu1 }
 0x4c2   : > { %v2293_v57 = vadd.f32 %v8657_v15, %v8617_v39 }
 0x4c3   : > { %v8659_v2 = vpop.f32.mrf.mxu1 }
 0x4c4   : > { %v10739_v16 = vadd.f32 %v2293_v57, %v10694_v22  ;;  %v8660_v36 = vadd.f32 %v8659_v2, %v8658_v18  ;;  %v9854_v18 = vld [vmem:[#allocation4 + $0x2e8] sm:$0xff]  }
 0x4c5   : > { %v8677_v12 = vpop.f32.mrf.mxu1 }
 0x4c6   : > { %v2296_v14 = vadd.f32 %v8660_v36, %v8620_v43 }
 0x4c7   : > { %v8678_v6 = vpop.f32.mrf.mxu1 }
 0x4c8   : > { %v10742_v46 = vadd.f32 %v2296_v14, %v10696_v40  ;;  %v8679_v55 = vadd.f32 %v8678_v6, %v8677_v12  ;;  %v9855_v14 = vld [vmem:[#allocation4 + $0x2a8] sm:$0xff]  }
 0x4c9   : > { %v8680_v41 = vpop.f32.mrf.mxu1 }
 0x4cb   : > { %v8681_v42 = vpop.f32.mrf.mxu1 }
 0x4cc   : > { %v8682_v48 = vadd.f32 %v8681_v42, %v8680_v41  ;;  %v9856_v42 = vld [vmem:[#allocation4 + $0x2e0] sm:$0xff]  }
 0x4cd   : > { %v8683_v62 = vpop.f32.mrf.mxu1 }
 0x4ce   : > { %v2661_v58 = vpack.c.bf16 %v8682_v48, %v8679_v55 }
 0x4cf   : > { %v8684_v11 = vpop.f32.mrf.mxu1 }
 0x4d0   : > { %v8685_v43 = vadd.f32 %v8684_v11, %v8683_v62 }
 0x4d1   : > { %v8686_v17 = vpop.f32.mrf.mxu1 }
 0x4d3   : > { %v8687_v19 = vpop.f32.mrf.mxu1 }
 0x4d4   : > { %v8688_v63 = vadd.f32 %v8687_v19, %v8686_v17 }
 0x4d5   : > { %v8689_v1 = vpop.f32.mrf.mxu1 }
 0x4d6   : > { %v2665_v6 = vpack.c.bf16 %v8688_v63, %v8685_v43  ;;  %v9863_v63 = vld [vmem:[#allocation4 + $0x288] sm:$0xff]  }
 0x4d7   : > { %v8690_v39 = vpop.f32.mrf.mxu1 }
 0x4d8   : > { %v8691_v62 = vadd.f32 %v8690_v39, %v8689_v1 }
 0x4d9   : > { %v8692_v52 = vpop.f32.mrf.mxu1 }
 0x4db   : > { %v8693_v44 = vpop.f32.mrf.mxu1 }
 0x4dc   : > { %v8694_v17 = vadd.f32 %v8693_v44, %v8692_v52 }
 0x4dd   : > { %v10744_v34 = vpop.f32.mrf.mxu1 }
 0x4de   : > { %v2669_v55 = vpack.c.bf16 %v8694_v17, %v8691_v62 }
 0x4df   : > { %v10746_v22 = vpop.f32.mrf.mxu1 }
 0x4e0   : > { %v8697_v1 = vadd.f32 %v10746_v22, %v10744_v34 }
 0x4e1   : > { %v8698_v53 = vpop.f32.mrf.mxu1 }
 0x4e3   : > { %v8699_v60 = vpop.f32.mrf.mxu1 }
 0x4e4   : > { %v8700_v52 = vadd.f32 %v8699_v60, %v8698_v53  ;;  %v9865_v53 = vld [vmem:[#allocation4 + $0x280] sm:$0xff]  }
 0x4e5   : > { %v8701_v49 = vpop.f32.mrf.mxu1 }
 0x4e7   : > { %v8702_v47 = vpop.f32.mrf.mxu1 }
 0x4e8   : > { %v8703_v51 = vadd.f32 %v8702_v47, %v8701_v49  ;;  %v9857_v47 = vld [vmem:[#allocation4 + $0x2a0] sm:$0xff]  }
 0x4e9   : > { %v8704_v40 = vpop.f32.mrf.mxu1 }
 0x4eb   : > { %v8705_v45 = vpop.f32.mrf.mxu1 }
 0x4ec   : > { %v8706_v50 = vadd.f32 %v8705_v45, %v8704_v40  ;;  %v9858_v40 = vld [vmem:[#allocation4 + $0x2d8] sm:$0xff]  }
 0x4ed   : > { %v8707_v5 = vpop.f32.mrf.mxu1 }
 0x4ee   : > { %v2662_v7 = vpack.c.bf16 %v8706_v50, %v8703_v51  ;;  %v9859_v50 = vld [vmem:[#allocation4 + $0x298] sm:$0xff]  }
 0x4ef   : > { %v8708_v56 = vpop.f32.mrf.mxu1 }
 0x4f0   : > { %2966 = vmatprep.mubr.bf16.mxu0 %v2662_v7  ;;  %v8709_v57 = vadd.f32 %v8708_v56, %v8707_v5  ;;  %v9860_v7 = vld [vmem:[#allocation4 + $0x2d0] sm:$0xff]   ;;  %v9862_v56 = vld [vmem:[#allocation4 + $0x2c8] sm:$0xff]  }
 0x4f1   : > { %v8710_v38 = vpop.f32.mrf.mxu1  ;;  %2967 = vmatmul.mubr.bf16.vlgmr.msra.gmra.mxu0 %v2661_v58  ;;  %v9861_v58 = vld [vmem:[#allocation4 + $0x290] sm:$0xff]  }
 0x4f2   : > { %8814 = vmatpush3.bf16.msra.mxu0 %v9851_v8 }
 0x4f3   : > { %v8711_v15 = vpop.f32.mrf.mxu1  ;;  %8815 = vmatprep.subr.bf16.mxu0 %v9852_v37 }
 0x4f4   : > { %v8712_v2 = vadd.f32 %v8711_v15, %v8710_v38  ;;  %v2673_v15 = vpack.c.bf16 %v8700_v52, %v8697_v1 }
 0x4f5   : > { %v8713_v36 = vpop.f32.mrf.mxu1 }
 0x4f6   : > { %v2666_v12 = vpack.c.bf16 %v8712_v2, %v8709_v57  ;;  %8816 = vmatpush3.bf16.msra.mxu0 %v9853_v9  ;;  %v9864_v57 = vld [vmem:[#allocation4 + $0x2c0] sm:$0xff]  }
 0x4f7   : > { %v8714_v41 = vpop.f32.mrf.mxu1  ;;  %8817 = vmatprep.subr.bf16.mxu0 %v9854_v18 }
 0x4f8   : > { %2974 = vmatprep.mubr.bf16.mxu0 %v2666_v12  ;;  %v8715_v48 = vadd.f32 %v8714_v41, %v8713_v36 }
 0x4f9   : > { %v8716_v49 = vpop.f32.mrf.mxu1  ;;  %2975 = vmatmul.mubr.bf16.gmra.mxu0 %v2665_v6 }
 0x4fa   : > { %8818 = vmatpush3.bf16.msra.mxu0 %v9855_v14 }
 0x4fb   : > { %v8717_v19 = vpop.f32.mrf.mxu1  ;;  %8819 = vmatprep.subr.bf16.mxu0 %v9856_v42 }
 0x4fc   : > { %v8718_v45 = vadd.f32 %v8717_v19, %v8716_v49 }
 0x4fd   : > { %v8719_v11 = vpop.f32.mrf.mxu1 }
 0x4fe   : > { %v2670_v51 = vpack.c.bf16 %v8718_v45, %v8715_v48  ;;  %8820 = vmatpush3.bf16.msra.mxu0 %v9857_v47 }
 0x4ff   : > { %v8720_v5 = vpop.f32.mrf.mxu1  ;;  %8821 = vmatprep.subr.bf16.mxu0 %v9858_v40 }
 0x500   : > { %2982 = vmatprep.mubr.bf16.mxu0 %v2670_v51  ;;  %v8721_v37 = vadd.f32 %v8720_v5, %v8719_v11 }
 0x501   : > { %v8722_v8 = vpop.f32.mrf.mxu1  ;;  %2983 = vmatmul.mubr.bf16.gmra.mxu0 %v2669_v55 }
 0x502   : > { %8822 = vmatpush3.bf16.msra.mxu0 %v9859_v50 }
 0x503   : > { %v8723_v44 = vpop.f32.mrf.mxu1  ;;  %8823 = vmatprep.subr.bf16.mxu0 %v9860_v7 }
 0x504   : > { %v8724_v38 = vadd.f32 %v8723_v44, %v8722_v8 }
 0x505   : > { %v8725_v39 = vpop.f32.mrf.mxu1 }
 0x506   : > { %v2674_v9 = vpack.c.bf16 %v8724_v38, %v8721_v37  ;;  %8824 = vmatpush3.bf16.msra.mxu0 %v9861_v58 }
 0x507   : > { %v8726_v18 = vpop.f32.mrf.mxu1  ;;  %8825 = vmatprep.subr.bf16.mxu0 %v9862_v56 }
 0x508   : > { %2990 = vmatprep.mubr.bf16.mxu0 %v2674_v9  ;;  %v8727_v50 = vadd.f32 %v8726_v18, %v8725_v39 }
 0x509   : > { %v8728_v2 = vpop.f32.mrf.mxu1  ;;  %2991 = vmatmul.mubr.bf16.gmra.mxu0 %v2673_v15 }
 0x50a   : > { %8826 = vmatpush3.bf16.msra.mxu0 %v9863_v63 }
 0x50b   : > { %v8729_v60 = vpop.f32.mrf.mxu1  ;;  %8827 = vmatprep.subr.bf16.mxu0 %v9864_v57 }
 0x50c   : > { %v8730_v45 = vadd.f32 %v8729_v60, %v8728_v2 }
 0x50d   : > { %v8731_v43 = vpop.f32.mrf.mxu1 }
 0x50e   : > { %8828 = vmatpush3.bf16.msra.mxu0 %v9865_v53  ;;  %v2663_v5 = vpack.c.bf16 %v8730_v45, %v8727_v50  ;;  %v9887_v45 = vld [vmem:[#allocation2 + $0x370] ss:$8 sps:$4 sm:$0xff]   ;;  %v9918_v50 = vld [vmem:[#allocation4 + $0x368] sm:$0xff]  }
 0x50f   : > { %8853 = vmatprep.subr.bf16.mxu0 %v10613_v20  ;;  %v8732_v34 = vpop.f32.mrf.mxu1 }
 0x510   : > { %v8733_v37 = vadd.f32 %v8732_v34, %v8731_v43 }
 0x511   : > { %v8734_v22 = vpop.f32.mrf.mxu1 }
 0x513   : > { %v8735_v36 = vpop.f32.mrf.mxu1 }
 0x514   : > { %v8736_v58 = vadd.f32 %v8735_v36, %v8734_v22 }
 0x515   : > { %v8737_v12 = vpop.f32.mrf.mxu1 }
 0x516   : > { %v2667_v39 = vpack.c.bf16 %v8736_v58, %v8733_v37  ;;  %v9921_v58 = vld [vmem:[#allocation4 + $0x320] sm:$0xff]   ;;  %v9922_v37 = vld [vmem:[#allocation4 + $0x358] sm:$0xff]  }
 0x517   : > { %v8738_v14 = vpop.f32.mrf.mxu1 }
 0x518   : > { %v8739_v57 = vadd.f32 %v8738_v14, %v8737_v12  ;;  %v9915_v14 = vld [vmem:[#allocation4 + $0x338] sm:$0xff]  }
 0x519   : > { %v8740_v6 = vpop.f32.mrf.mxu1 }
 0x51b   : > { %v8741_v41 = vpop.f32.mrf.mxu1 }
 0x51d   : > { %v8743_v42 = vpop.f32.mrf.mxu1 }
 0x51f   : > { %v8744_v49 = vpop.f32.mrf.mxu1 }
 0x520   : > { %v8745_v22 = vadd.f32 %v8744_v49, %v8743_v42  ;;  %v9883_v42 = vld [vmem:[#allocation2 + $0x354] ss:$8 sps:$4 sm:$0xff]   ;;  %v9881_v49 = vld [vmem:[#allocation2 + $0x350] ss:$8 sps:$4 sm:$0xff]  }
 0x521   : > { %v8746_v47 = vpop.f32.mrf.mxu1 }
 0x523   : > { %v8747_v17 = vpop.f32.mrf.mxu1 }
 0x525   : > { %v8749_v19 = vpop.f32.mrf.mxu1 }
 0x527   : > { %v8750_v40 = vpop.f32.mrf.mxu1 }
 0x528   : > { %v8751_v11 = vadd.f32 %v8750_v40, %v8749_v19  ;;  %v9889_v19 = vld [vmem:[#allocation2 + $0x374] ss:$8 sps:$4 sm:$0xff]  }
 0x529   : > { %v8752_v48 = vpop.f32.mrf.mxu1  ;;  %v9916_v40 = vld [vmem:[#allocation4 + $0x370] sm:$0xff]  }
 0x52b   : > { %v8753_v62 = vpop.f32.mrf.mxu1 }
 0x52c   : > { %v8754_v51 = vadd.f32 %v8753_v62, %v8752_v48  ;;  %v9917_v48 = vld [vmem:[#allocation4 + $0x330] sm:$0xff]   ;;  %v9892_v62 = vld [vmem:[#allocation2 + $0x384] ss:$8 sps:$4 sm:$0xff]  }
 0x52d   : > { %v8755_v20 = vpop.f32.mrf.mxu1 }
 0x52e   : > { %v2664_v55 = vpack.c.bf16 %v8754_v51, %v8751_v11  ;;  %v9890_v11 = vld [vmem:[#allocation2 + $0x380] ss:$8 sps:$4 sm:$0xff]   ;;  %v9895_v51 = vld [vmem:[#allocation2 + $0x394] ss:$8 sps:$4 sm:$0xff]  }
 0x52f   : > { %v8756_v7 = vpop.f32.mrf.mxu1 }
 0x530   : > { %3031 = vmatprep.mubr.bf16.mxu0 %v2664_v55  ;;  %v8757_v44 = vadd.f32 %v8756_v7, %v8755_v20  ;;  %v9919_v20 = vld [vmem:[#allocation4 + $0x328] sm:$0xff]   ;;  %v9893_v55 = vld [vmem:[#allocation2 + $0x390] ss:$8 sps:$4 sm:$0xff]  }
 0x531   : > { %v8758_v8 = vpop.f32.mrf.mxu1  ;;  %3032 = vmatmul.mubr.bf16.vlgmr.msra.gmra.mxu0 %v2663_v5  ;;  %v9898_v5 = vld [vmem:[#allocation2 + $0x3a4] ss:$8 sps:$4 sm:$0xff]   ;;  %v9896_v7 = vld [vmem:[#allocation2 + $0x3a0] ss:$8 sps:$4 sm:$0xff]  }
 0x532   : > { %8854 = vmatpush3.bf16.msra.mxu0 %v10615_v21  ;;  %v8742_v21 = vadd.f32 %v8741_v41, %v8740_v6  ;;  %v9874_v6 = vld [vmem:[#allocation2 + $0x324] ss:$8 sps:$4 sm:$0xff]   ;;  %v9877_v41 = vld [vmem:[#allocation2 + $0x334] ss:$8 sps:$4 sm:$0xff]  }
 0x533   : > { %8855 = vmatprep.subr.bf16.mxu0 %v10617_v23  ;;  %v8759_v52 = vpop.f32.mrf.mxu1 }
 0x534   : > { %v8760_v56 = vadd.f32 %v8759_v52, %v8758_v8  ;;  %v9920_v8 = vld [vmem:[#allocation4 + $0x360] sm:$0xff]   ;;  %v9901_v52 = vld [vmem:[#allocation2 + $0x3b4] ss:$8 sps:$4 sm:$0xff]  }
 0x535   : > { %v8761_v38 = vpop.f32.mrf.mxu1 }
 0x536   : > { %v2668_v1 = vpack.c.bf16 %v8760_v56, %v8757_v44  ;;  %8856 = vmatpush3.bf16.msra.mxu0 %v10622_v24  ;;  %v2671_v24 = vpack.c.bf16 %v8742_v21, %v8739_v57  ;;  %v9899_v44 = vld [vmem:[#allocation2 + $0x3b0] ss:$8 sps:$4 sm:$0xff]   ;;  %v9904_v56 = vld [vmem:[#allocation2 + $0x3c4] ss:$8 sps:$4 sm:$0xff]  }
 0x537   : > { %8857 = vmatprep.subr.bf16.mxu0 %v10624_v25  ;;  %v8762_v9 = vpop.f32.mrf.mxu1  ;;  %v9925_v21 = vld [vmem:[#allocation4 + $0x310] sm:$0xff]  }
 0x538   : > { %3039 = vmatprep.mubr.bf16.mxu0 %v2668_v1  ;;  %v8763_v15 = vadd.f32 %v8762_v9, %v8761_v38  ;;  %v9902_v38 = vld [vmem:[#allocation2 + $0x3c0] ss:$8 sps:$4 sm:$0xff]   ;;  %v9923_v1 = vld [vmem:[#allocation4 + $0x318] sm:$0xff]   ;;  %v9924_v9 = vld [vmem:[#allocation4 + $0x350] sm:$0xff]  }
 0x539   : > { %v8764_v63 = vpop.f32.mrf.mxu1  ;;  %3040 = vmatmul.mubr.bf16.gmra.mxu0 %v2667_v39  ;;  %v9907_v39 = vld [vmem:[#allocation2 + $0x3d4] ss:$8 sps:$4 sm:$0xff]  }
 0x53a   : > { %8858 = vmatpush3.bf16.msra.mxu0 %v10628_v26  ;;  %v8748_v26 = vadd.f32 %v8747_v17, %v8746_v47  ;;  %v9886_v47 = vld [vmem:[#allocation2 + $0x364] ss:$8 sps:$4 sm:$0xff]   ;;  %v9884_v17 = vld [vmem:[#allocation2 + $0x360] ss:$8 sps:$4 sm:$0xff]  }
 0x53b   : > { %8859 = vmatprep.subr.bf16.mxu0 %v10630_v27  ;;  %v8765_v23 = vpop.f32.mrf.mxu1 }
 0x53c   : > { %v8766_v18 = vadd.f32 %v8765_v23, %v8764_v63  ;;  %v2675_v12 = vpack.c.bf16 %v8748_v26, %v8745_v22 }
 0x53d   : > { %v8767_v2 = vpop.f32.mrf.mxu1 }
 0x53e   : > { %v2672_v53 = vpack.c.bf16 %v8766_v18, %v8763_v15  ;;  %8860 = vmatpush3.bf16.msra.mxu0 %v10634_v28  ;;  %v9868_v28 = vld [vmem:[#allocation2 + $0x304] ss:$8 sps:$4 sm:$0xff]  }
 0x53f   : > { %8861 = vmatprep.subr.bf16.mxu0 %v10636_v29  ;;  %v8768_v25 = vpop.f32.mrf.mxu1  ;;  %v9871_v29 = vld [vmem:[#allocation2 + $0x314] ss:$8 sps:$4 sm:$0xff]   ;;  %v9926_v18 = vld [vmem:[#allocation4 + $0x348] sm:$0xff]  }
 0x540   : > { %3047 = vmatprep.mubr.bf16.mxu0 %v2672_v53  ;;  %v8769_v43 = vadd.f32 %v8768_v25, %v8767_v2  ;;  %v9905_v2 = vld [vmem:[#allocation2 + $0x3d0] ss:$8 sps:$4 sm:$0xff]   ;;  %v9927_v53 = vld [vmem:[#allocation4 + $0x308] sm:$0xff]  }
 0x541   : > { %v8770_v60 = vpop.f32.mrf.mxu1  ;;  %3048 = vmatmul.mubr.bf16.gmra.mxu0 %v2671_v24  ;;  %v9910_v24 = vld [vmem:[#allocation2 + $0x3e4] ss:$8 sps:$4 sm:$0xff]  }
 0x542   : > { %8862 = vmatpush3.bf16.msra.mxu0 %v10611_v59  ;;  %v9866_v59 = vld [vmem:[#allocation2 + $0x300] ss:$8 sps:$4 sm:$0xff]  }
 0x543   : > { %8863 = vmatprep.subr.bf16.mxu0 %v10640_v30  ;;  %v8771_v27 = vpop.f32.mrf.mxu1  ;;  %v9914_v30 = vld [vmem:[#allocation4 + $0x378] sm:$0xff]  }
 0x544   : > { %v8772_v34 = vadd.f32 %v8771_v27, %v8770_v60  ;;  %8965 = vmatprep.subr.bf16.mxu1 %v9914_v30  ;;  %v9928_v60 = vld [vmem:[#allocation4 + $0x340] sm:$0xff]  }
 0x545   : > { %8966 = vmatpush3.bf16.msra.mxu1 %v9915_v14  ;;  %v9929_v27 = vld [vmem:[#allocation4 + $0x300] sm:$0xff]  }
 0x546   : > { %v2676_v36 = vpack.c.bf16 %v8772_v34, %v8769_v43  ;;  %8864 = vmatpush3.bf16.msra.mxu0 %v10644_v31  ;;  %v9869_v31 = vld [vmem:[#allocation2 + $0x310] ss:$8 sps:$4 sm:$0xff]   ;;  %8967 = vmatprep.subr.bf16.mxu1 %v9916_v40 }
 0x547   : > { %8865 = vmatprep.subr.bf16.mxu0 %v10646_v32  ;;  %v9872_v32 = vld [vmem:[#allocation2 + $0x320] ss:$8 sps:$4 sm:$0xff]  }
 0x548   : > { %3055 = vmatprep.mubr.bf16.mxu0 %v2676_v36  ;;  %v9908_v36 = vld [vmem:[#allocation2 + $0x3e0] ss:$8 sps:$4 sm:$0xff]  }
 0x549   : > { %3056 = vmatmul.mubr.bf16.gmra.mxu0 %v2675_v12  ;;  %8968 = vmatpush3.bf16.msra.mxu1 %v9917_v48 }
 0x54a   : > { %8866 = vmatpush3.bf16.msra.mxu0 %v10609_v54  ;;  %3297 = vmatprep.mubr.bf16.mxu0 %v9868_v28  ;;  %v9875_v54 = vld [vmem:[#allocation2 + $0x330] ss:$8 sps:$4 sm:$0xff]   ;;  %v9913_v28 = vld [vmem:[#allocation2 + $0x3f4] ss:$8 sps:$4 sm:$0xff]  }
 0x54b   : > { %8867 = vmatprep.subr.bf16.mxu0 %v10650_v33  ;;  %v9880_v33 = vld [vmem:[#allocation2 + $0x344] ss:$8 sps:$4 sm:$0xff]   ;;  %8969 = vmatprep.subr.bf16.mxu1 %v9918_v50 }
 0x54d   : > { %8970 = vmatpush3.bf16.msra.mxu1 %v9919_v20 }
 0x54e   : > { %8868 = vmatpush3.bf16.msra.mxu0 %v10654_v35  ;;  %v9878_v35 = vld [vmem:[#allocation2 + $0x340] ss:$8 sps:$4 sm:$0xff]   ;;  %8971 = vmatprep.subr.bf16.mxu1 %v9920_v8 }
 0x551   : > { %3298 = vmatmul.mubr.bf16.vlgmr.msra.gmra.mxu0 %v9866_v59  ;;  %8972 = vmatpush3.bf16.msra.mxu1 %v9921_v58 }
 0x552   : > { %3305 = vmatprep.mubr.bf16.mxu0 %v9871_v29  ;;  %8973 = vmatprep.subr.bf16.mxu1 %v9922_v37 }
 0x555   : > { %8974 = vmatpush3.bf16.msra.mxu1 %v9923_v1 }
 0x556   : > { %8975 = vmatprep.subr.bf16.mxu1 %v9924_v9 }
 0x559   : > { %3306 = vmatmul.mubr.bf16.gmra.mxu0 %v9869_v31  ;;  %8976 = vmatpush3.bf16.msra.mxu1 %v9925_v21  ;;  %v9911_v31 = vld [vmem:[#allocation2 + $0x3f0] ss:$8 sps:$4 sm:$0xff]  }
 0x55a   : > { %3313 = vmatprep.mubr.bf16.mxu0 %v9874_v6  ;;  %8977 = vmatprep.subr.bf16.mxu1 %v9926_v18 }
 0x55d   : > { %8978 = vmatpush3.bf16.msra.mxu1 %v9927_v53 }
 0x55e   : > { %8979 = vmatprep.subr.bf16.mxu1 %v9928_v60 }
 0x561   : > { %3314 = vmatmul.mubr.bf16.gmra.mxu0 %v9872_v32  ;;  %8980 = vmatpush3.bf16.msra.mxu1 %v9929_v27 }
 0x562   : > { %3321 = vmatprep.mubr.bf16.mxu0 %v9877_v41 }
 0x569   : > { %3322 = vmatmul.mubr.bf16.gmra.mxu0 %v9875_v54 }
 0x56a   : > { %3329 = vmatprep.mubr.bf16.mxu0 %v9880_v33  ;;  %v9930_v33 = vld [vmem:[#allocation4 + $0x3f8] sm:$0xff]  }
 0x56b   : > { %9005 = vmatprep.subr.bf16.mxu1 %v9930_v33 }
 0x571   : > { %3330 = vmatmul.mubr.bf16.gmra.mxu0 %v9878_v35 }
 0x572   : > { %3337 = vmatprep.mubr.bf16.mxu0 %v9883_v42 }
 0x579   : > { %3338 = vmatmul.mubr.bf16.gmra.mxu0 %v9881_v49 }
 0x57a   : > { %3345 = vmatprep.mubr.bf16.mxu0 %v9886_v47 }
 0x581   : > { %3346 = vmatmul.mubr.bf16.gmra.mxu0 %v9884_v17 }
 0x582   : > { %3353 = vmatprep.mubr.bf16.mxu0 %v9889_v19 }
 0x589   : > { %3354 = vmatmul.mubr.bf16.gmra.mxu0 %v9887_v45 }
 0x58a   : > { %3361 = vmatprep.mubr.bf16.mxu0 %v9892_v62 }
 0x591   : > { %3362 = vmatmul.mubr.bf16.gmra.mxu0 %v9890_v11 }
 0x592   : > { %3369 = vmatprep.mubr.bf16.mxu0 %v9895_v51 }
 0x599   : > { %3370 = vmatmul.mubr.bf16.gmra.mxu0 %v9893_v55 }
 0x59a   : > { %3377 = vmatprep.mubr.bf16.mxu0 %v9898_v5 }
 0x5a1   : > { %3378 = vmatmul.mubr.bf16.gmra.mxu0 %v9896_v7 }
 0x5a2   : > { %3385 = vmatprep.mubr.bf16.mxu0 %v9901_v52 }
 0x5a9   : > { %3386 = vmatmul.mubr.bf16.gmra.mxu0 %v9899_v44 }
 0x5aa   : > { %3393 = vmatprep.mubr.bf16.mxu0 %v9904_v56 }
 0x5b1   : > { %v8789_v63 = vpop.f32.mrf.mxu0  ;;  %3394 = vmatmul.mubr.bf16.gmra.mxu0 %v9902_v38 }
 0x5b2   : > { %3401 = vmatprep.mubr.bf16.mxu0 %v9907_v39 }
 0x5b3   : > { %v8790_v23 = vpop.f32.mrf.mxu0 }
 0x5b4   : > { %v8791_v15 = vadd.f32 %v8790_v23, %v8789_v63 }
 0x5b5   : > { %v8792_v57 = vpop.f32.mrf.mxu0 }
 0x5b7   : > { %v8793_v25 = vpop.f32.mrf.mxu0 }
 0x5b8   : > { %v8794_v45 = vadd.f32 %v8793_v25, %v8792_v57 }
 0x5b9   : > { %v8795_v26 = vpop.f32.mrf.mxu0  ;;  %3402 = vmatmul.mubr.bf16.gmra.mxu0 %v9905_v2 }
 0x5ba   : > { %3409 = vmatprep.mubr.bf16.mxu0 %v9910_v24 }
 0x5bb   : > { %v8796_v43 = vpop.f32.mrf.mxu0 }
 0x5bc   : > { %v8797_v34 = vadd.f32 %v8796_v43, %v8795_v26 }
 0x5bd   : > { %v8798_v22 = vpop.f32.mrf.mxu0 }
 0x5bf   : > { %v8799_v12 = vpop.f32.mrf.mxu0 }
 0x5c0   : > { %v8800_v52 = vadd.f32 %v8799_v12, %v8798_v22 }
 0x5c1   : > { %v8801_v59 = vpop.f32.mrf.mxu0  ;;  %3410 = vmatmul.mubr.bf16.gmra.mxu0 %v9908_v36 }
 0x5c2   : > { %3417 = vmatprep.mubr.bf16.mxu0 %v9913_v28 }
 0x5c3   : > { %v8802_v29 = vpop.f32.mrf.mxu0 }
 0x5c4   : > { %v8803_v30 = vadd.f32 %v8802_v29, %v8801_v59 }
 0x5c5   : > { %v8804_v14 = vpop.f32.mrf.mxu0 }
 0x5c7   : > { %v8805_v6 = vpop.f32.mrf.mxu0 }
 0x5c8   : > { %v8806_v21 = vadd.f32 %v8805_v6, %v8804_v14 }
 0x5c9   : > { %v8807_v32 = vpop.f32.mrf.mxu0  ;;  %3418 = vmatmul.mubr.bf16.gmra.mxu0 %v9911_v31 }
 0x5cb   : > { %v8808_v41 = vpop.f32.mrf.mxu0 }
 0x5cc   : > { %v8809_v54 = vadd.f32 %v8808_v41, %v8807_v32 }
 0x5cd   : > { %v8810_v35 = vpop.f32.mrf.mxu0 }
 0x5cf   : > { %v8811_v42 = vpop.f32.mrf.mxu0 }
 0x5d0   : > { %v8812_v60 = vadd.f32 %v8811_v42, %v8810_v35 }
 0x5f1   : > { %v8829_v49 = vpop.f32.mrf.mxu0 }
 0x5f3   : > { %v8830_v47 = vpop.f32.mrf.mxu0 }
 0x5f4   : > { %v8831_v17 = vadd.f32 %v8830_v47, %v8829_v49 }
 0x5f5   : > { %v8832_v19 = vpop.f32.mrf.mxu0 }
 0x5f6   : > { %v3034_v40 = vadd.f32 %v8831_v17, %v8791_v15 }
 0x5f7   : > { %v8833_v48 = vpop.f32.mrf.mxu0 }
 0x5f8   : > { %v10767_v62 = vadd.f32 %v3034_v40, %v10721_v0  ;;  %v8834_v11 = vadd.f32 %v8833_v48, %v8832_v19 }
 0x5f9   : > { %v8835_v51 = vpop.f32.mrf.mxu0 }
 0x5fa   : > { %v3037_v50 = vadd.f32 %v8834_v11, %v8794_v45  ;;  %v9931_v45 = vld [vmem:[#allocation4 + $0x3b8] sm:$0xff]  }
 0x5fb   : > { %v8836_v20 = vpop.f32.mrf.mxu0 }
 0x5fc   : > { %v10770_v55 = vadd.f32 %v3037_v50, %v10724_v61  ;;  %v8837_v5 = vadd.f32 %v8836_v20, %v8835_v51  ;;  %v9932_v50 = vld [vmem:[#allocation4 + $0x3f0] sm:$0xff]  }
 0x5fd   : > { %v8838_v7 = vpop.f32.mrf.mxu0 }
 0x5fe   : > { %v3042_v8 = vadd.f32 %v8837_v5, %v8797_v34  ;;  %v9933_v5 = vld [vmem:[#allocation4 + $0x3b0] sm:$0xff]  }
 0x5ff   : > { %v8839_v58 = vpop.f32.mrf.mxu0 }
 0x600   : > { %v10773_v44 = vadd.f32 %v3042_v8, %v10727_v3  ;;  %v8840_v56 = vadd.f32 %v8839_v58, %v8838_v7  ;;  %v9934_v58 = vld [vmem:[#allocation4 + $0x3e8] sm:$0xff]  }
 0x601   : > { %v8841_v37 = vpop.f32.mrf.mxu0 }
 0x602   : > { %v3045_v38 = vadd.f32 %v8840_v56, %v8800_v52 }
 0x603   : > { %v8842_v0 = vpop.f32.mrf.mxu0 }
 0x604   : > { %v10776_v1 = vadd.f32 %v3045_v38, %v10730_v4  ;;  %v8843_v39 = vadd.f32 %v8842_v0, %v8841_v37 }
 0x605   : > { %v8844_v9 = vpop.f32.mrf.mxu0 }
 0x606   : > { %v3050_v63 = vadd.f32 %v8843_v39, %v8803_v30  ;;  %v9935_v39 = vld [vmem:[#allocation4 + $0x3a8] sm:$0xff]  }
 0x607   : > { %v8845_v61 = vpop.f32.mrf.mxu0 }
 0x608   : > { %v10779_v23 = vadd.f32 %v3050_v63, %v10733_v10  ;;  %v8846_v15 = vadd.f32 %v8845_v61, %v8844_v9  ;;  %v9936_v61 = vld [vmem:[#allocation4 + $0x3e0] sm:$0xff]  }
 0x609   : > { %v8847_v18 = vpop.f32.mrf.mxu0 }
 0x60a   : > { %v3053_v57 = vadd.f32 %v8846_v15, %v8806_v21  ;;  %v9937_v15 = vld [vmem:[#allocation4 + $0x3a0] sm:$0xff]  }
 0x60b   : > { %v8848_v3 = vpop.f32.mrf.mxu0 }
 0x60c   : > { %v10782_v2 = vadd.f32 %v3053_v57, %v10736_v13  ;;  %v8849_v53 = vadd.f32 %v8848_v3, %v8847_v18  ;;  %v9938_v3 = vld [vmem:[#allocation4 + $0x3d8] sm:$0xff]  }
 0x60d   : > { %v8850_v24 = vpop.f32.mrf.mxu0 }
 0x60e   : > { %v3058_v25 = vadd.f32 %v8849_v53, %v8809_v54 }
 0x60f   : > { %v8851_v4 = vpop.f32.mrf.mxu0 }
 0x610   : > { %v10785_v26 = vadd.f32 %v3058_v25, %v10739_v16  ;;  %v8852_v27 = vadd.f32 %v8851_v4, %v8850_v24 }
 0x611   : > { %v8869_v43 = vpop.f32.mrf.mxu0 }
 0x612   : > { %v3061_v34 = vadd.f32 %v8852_v27, %v8812_v60  ;;  %v9939_v27 = vld [vmem:[#allocation4 + $0x398] sm:$0xff]  }
 0x613   : > { %v8870_v10 = vpop.f32.mrf.mxu0 }
 0x614   : > { %v10788_v22 = vadd.f32 %v3061_v34, %v10742_v46  ;;  %v8871_v19 = vadd.f32 %v8870_v10, %v8869_v43  ;;  %v9940_v10 = vld [vmem:[#allocation4 + $0x3d0] sm:$0xff]  }
 0x615   : > { %v8872_v36 = vpop.f32.mrf.mxu0 }
 0x617   : > { %v8873_v28 = vpop.f32.mrf.mxu0 }
 0x618   : > { %v8874_v42 = vadd.f32 %v8873_v28, %v8872_v36  ;;  %v9941_v28 = vld [vmem:[#allocation4 + $0x390] sm:$0xff]  }
 0x619   : > { %v8875_v12 = vpop.f32.mrf.mxu0 }
 0x61a   : > { %v3426_v11 = vpack.c.bf16 %v8874_v42, %v8871_v19  ;;  %v9944_v42 = vld [vmem:[#allocation4 + $0x3c0] sm:$0xff]  }
 0x61b   : > { %v8876_v13 = vpop.f32.mrf.mxu0 }
 0x61c   : > { %v8877_v37 = vadd.f32 %v8876_v13, %v8875_v12 }
 0x61d   : > { %v8878_v59 = vpop.f32.mrf.mxu0 }
 0x61f   : > { %v8879_v29 = vpop.f32.mrf.mxu0 }
 0x620   : > { %v8880_v7 = vadd.f32 %v8879_v29, %v8878_v59  ;;  %v9942_v59 = vld [vmem:[#allocation4 + $0x3c8] sm:$0xff]  }
 0x621   : > { %v8881_v30 = vpop.f32.mrf.mxu0 }
 0x622   : > { %v3430_v9 = vpack.c.bf16 %v8880_v7, %v8877_v37 }
 0x623   : > { %v8882_v14 = vpop.f32.mrf.mxu0 }
 0x624   : > { %v8883_v25 = vadd.f32 %v8882_v14, %v8881_v30 }
 0x625   : > { %v8884_v31 = vpop.f32.mrf.mxu0 }
 0x627   : > { %v8885_v6 = vpop.f32.mrf.mxu0 }
 0x628   : > { %v8886_v18 = vadd.f32 %v8885_v6, %v8884_v31 }
 0x629   : > { %v10790_v32 = vpop.f32.mrf.mxu0 }
 0x62a   : > { %v3434_v43 = vpack.c.bf16 %v8886_v18, %v8883_v25 }
 0x62b   : > { %v10792_v16 = vpop.f32.mrf.mxu0 }
 0x62c   : > { %v8889_v30 = vadd.f32 %v10792_v16, %v10790_v32 }
 0x62d   : > { %v8890_v41 = vpop.f32.mrf.mxu0 }
 0x62f   : > { %v8891_v54 = vpop.f32.mrf.mxu0 }
 0x630   : > { %v8892_v12 = vadd.f32 %v8891_v54, %v8890_v41  ;;  %v9945_v41 = vld [vmem:[#allocation4 + $0x380] sm:$0xff]  }
 0x631   : > { %v8893_v33 = vpop.f32.mrf.mxu0 }
 0x633   : > { %v8894_v35 = vpop.f32.mrf.mxu0 }
 0x634   : > { %v8895_v47 = vadd.f32 %v8894_v35, %v8893_v33  ;;  %v9943_v33 = vld [vmem:[#allocation4 + $0x388] sm:$0xff]   ;;  %v3438_v35 = vpack.c.bf16 %v8892_v12, %v8889_v30 }
 0x635   : > { %v8896_v46 = vpop.f32.mrf.mxu0 }
 0x637   : > { %v8897_v49 = vpop.f32.mrf.mxu0 }
 0x638   : > { %v8898_v17 = vadd.f32 %v8897_v49, %v8896_v46 }
 0x639   : > { %v8899_v40 = vpop.f32.mrf.mxu0 }
 0x63a   : > { %v3427_v48 = vpack.c.bf16 %v8898_v17, %v8895_v47 }
 0x63b   : > { %v8900_v51 = vpop.f32.mrf.mxu0 }
 0x63c   : > { %3731 = vmatprep.mubr.bf16.mxu1 %v3427_v48  ;;  %v8901_v52 = vadd.f32 %v8900_v51, %v8899_v40 }
 0x63d   : > { %v8902_v20 = vpop.f32.mrf.mxu0  ;;  %3732 = vmatmul.mubr.bf16.vlgmr.msra.gmra.mxu1 %v3426_v11 }
 0x63e   : > { %9006 = vmatpush3.bf16.msra.mxu1 %v9931_v45 }
 0x63f   : > { %v8903_v8 = vpop.f32.mrf.mxu0  ;;  %9007 = vmatprep.subr.bf16.mxu1 %v9932_v50 }
 0x640   : > { %v8904_v56 = vadd.f32 %v8903_v8, %v8902_v20 }
 0x641   : > { %v8905_v38 = vpop.f32.mrf.mxu0 }
 0x642   : > { %v3431_v0 = vpack.c.bf16 %v8904_v56, %v8901_v52  ;;  %9008 = vmatpush3.bf16.msra.mxu1 %v9933_v5 }
 0x643   : > { %v8906_v63 = vpop.f32.mrf.mxu0  ;;  %9009 = vmatprep.subr.bf16.mxu1 %v9934_v58 }
 0x644   : > { %3739 = vmatprep.mubr.bf16.mxu1 %v3431_v0  ;;  %v8907_v53 = vadd.f32 %v8906_v63, %v8905_v38 }
 0x645   : > { %v8908_v21 = vpop.f32.mrf.mxu0  ;;  %3740 = vmatmul.mubr.bf16.gmra.mxu1 %v3430_v9 }
 0x646   : > { %9010 = vmatpush3.bf16.msra.mxu1 %v9935_v39 }
 0x647   : > { %v8909_v57 = vpop.f32.mrf.mxu0  ;;  %9011 = vmatprep.subr.bf16.mxu1 %v9936_v61 }
 0x648   : > { %v8910_v24 = vadd.f32 %v8909_v57, %v8908_v21 }
 0x649   : > { %v8911_v4 = vpop.f32.mrf.mxu0 }
 0x64a   : > { %v3435_v60 = vpack.c.bf16 %v8910_v24, %v8907_v53  ;;  %9012 = vmatpush3.bf16.msra.mxu1 %v9937_v15 }
 0x64b   : > { %v8912_v34 = vpop.f32.mrf.mxu0  ;;  %9013 = vmatprep.subr.bf16.mxu1 %v9938_v3 }
 0x64c   : > { %3747 = vmatprep.mubr.bf16.mxu1 %v3435_v60  ;;  %v8913_v29 = vadd.f32 %v8912_v34, %v8911_v4 }
 0x64d   : > { %v8914_v36 = vpop.f32.mrf.mxu0  ;;  %3748 = vmatmul.mubr.bf16.gmra.mxu1 %v3434_v43 }
 0x64e   : > { %9014 = vmatpush3.bf16.msra.mxu1 %v9939_v27 }
 0x64f   : > { %v8915_v13 = vpop.f32.mrf.mxu0  ;;  %9015 = vmatprep.subr.bf16.mxu1 %v9940_v10 }
 0x650   : > { %v8916_v31 = vadd.f32 %v8915_v13, %v8914_v36 }
 0x651   : > { %v8917_v14 = vpop.f32.mrf.mxu0 }
 0x652   : > { %v3439_v6 = vpack.c.bf16 %v8916_v31, %v8913_v29  ;;  %9016 = vmatpush3.bf16.msra.mxu1 %v9941_v28 }
 0x653   : > { %v8918_v46 = vpop.f32.mrf.mxu0  ;;  %9017 = vmatprep.subr.bf16.mxu1 %v9942_v59 }
 0x654   : > { %3755 = vmatprep.mubr.bf16.mxu1 %v3439_v6  ;;  %v8919_v38 = vadd.f32 %v8918_v46, %v8917_v14 }
 0x655   : > { %v8920_v49 = vpop.f32.mrf.mxu0  ;;  %3756 = vmatmul.mubr.bf16.gmra.mxu1 %v3438_v35 }
 0x656   : > { %9018 = vmatpush3.bf16.msra.mxu1 %v9943_v33 }
 0x657   : > { %v8921_v54 = vpop.f32.mrf.mxu0  ;;  %9019 = vmatprep.subr.bf16.mxu1 %v9944_v42  ;;  %v9946_v42 = vld [vmem:[%s11092_s5] sm:$0xff]  }
 0x658   : > { %v8922_v58 = vadd.f32 %v8921_v54, %v8920_v49 }
 0x659   : > { %v8923_v47 = vpop.f32.mrf.mxu0 }
 0x65a   : > { %9020 = vmatpush3.bf16.msra.mxu1 %v9945_v41  ;;  %v3428_v9 = vpack.c.bf16 %v8922_v58, %v8919_v38  ;;  %v9965_v58 = vld [vmem:[#allocation6 + $0x30] sm:$0xff]   ;;  %v9968_v38 = vld [vmem:[#allocation6 + $0x60] sm:$0xff]  }
 0x65b   : > { %v8924_v17 = vpop.f32.mrf.mxu0 }
 0x65c   : > { %v8925_v3 = vadd.f32 %v8924_v17, %v8923_v47 }
 0x65d   : > { %v8926_v19 = vpop.f32.mrf.mxu0 }
 0x65f   : > { %v8927_v32 = vpop.f32.mrf.mxu0 }
 0x660   : > { %v8928_v21 = vadd.f32 %v8927_v32, %v8926_v19 }
 0x661   : > { %v8929_v16 = vpop.f32.mrf.mxu0 }
 0x662   : > { %v3432_v25 = vpack.c.bf16 %v8928_v21, %v8925_v3  ;;  %v9976_v21 = vld [vmem:[#allocation6 + $0x50] sm:$0xff]   ;;  %v9982_v3 = vld [vmem:[#allocation6 + $0x48] sm:$0xff]  }
 0x663   : > { %v8930_v40 = vpop.f32.mrf.mxu0 }
 0x664   : > { %v8931_v36 = vadd.f32 %v8930_v40, %v8929_v16 }
 0x665   : > { %v8932_v48 = vpop.f32.mrf.mxu0 }
 0x667   : > { %v8933_v45 = vpop.f32.mrf.mxu0 }
 0x668   : > { %v8934_v27 = vadd.f32 %v8933_v45, %v8932_v48 }
 0x669   : > { %v8935_v11 = vpop.f32.mrf.mxu0 }
 0x66a   : > { %v3436_v13 = vpack.c.bf16 %v8934_v27, %v8931_v36 }
 0x66b   : > { %v8936_v51 = vpop.f32.mrf.mxu0 }
 0x66c   : > { %v8937_v33 = vadd.f32 %v8936_v51, %v8935_v11 }
 0x66d   : > { %v8938_v50 = vpop.f32.mrf.mxu0 }
 0x66f   : > { %v8939_v20 = vpop.f32.mrf.mxu0 }
 0x670   : > { %v8940_v31 = vadd.f32 %v8939_v20, %v8938_v50  ;;  %v9960_v50 = vld [vmem:[#allocation6 + $0x78] sm:$0xff]  }
 0x671   : > { %v8941_v5 = vpop.f32.mrf.mxu0  ;;  %v9961_v20 = vld [vmem:[#allocation6 + $0x38] sm:$0xff]   ;;  %9065 = vmatprep.subr.bf16.mxu0 %v9960_v50 }
 0x672   : > { %v3440_v46 = vpack.c.bf16 %v8940_v31, %v8937_v33  ;;  %9066 = vmatpush3.bf16.msra.mxu0 %v9961_v20 }
 0x673   : > { %v8942_v7 = vpop.f32.mrf.mxu0 }
 0x674   : > { %v8943_v56 = vadd.f32 %v8942_v7, %v8941_v5 }
 0x675   : > { %v8944_v8 = vpop.f32.mrf.mxu0 }
 0x677   : > { %v8945_v52 = vpop.f32.mrf.mxu0 }
 0x678   : > { %v8946_v37 = vadd.f32 %v8945_v52, %v8944_v8  ;;  %v9964_v8 = vld [vmem:[#allocation6 + $0x70] sm:$0xff]   ;;  %v9966_v52 = vld [vmem:[#allocation6 + $0x68] sm:$0xff]  }
 0x679   : > { %v8947_v0 = vpop.f32.mrf.mxu0  ;;  %9067 = vmatprep.subr.bf16.mxu0 %v9964_v8 }
 0x67a   : > { %v3429_v39 = vpack.c.bf16 %v8946_v37, %v8943_v56  ;;  %9068 = vmatpush3.bf16.msra.mxu0 %v9965_v58  ;;  %v9967_v56 = vld [vmem:[#allocation6 + $0x28] sm:$0xff]  }
 0x67b   : > { %v8948_v63 = vpop.f32.mrf.mxu0  ;;  %9069 = vmatprep.subr.bf16.mxu0 %v9966_v52 }
 0x67c   : > { %3796 = vmatprep.mubr.bf16.mxu1 %v3429_v39  ;;  %v8949_v18 = vadd.f32 %v8948_v63, %v8947_v0  ;;  %v9969_v0 = vld [vmem:[#allocation6 + $0x20] sm:$0xff]   ;;  %v9971_v63 = vld [vmem:[#allocation6 + $0x18] sm:$0xff]  }
 0x67d   : > { %v8950_v61 = vpop.f32.mrf.mxu0  ;;  %3797 = vmatmul.mubr.bf16.vlgmr.msra.gmra.mxu1 %v3428_v9  ;;  %v9970_v9 = vld [vmem:[#allocation6 + $0x58] sm:$0xff]  }
 0x67e   : > { %9070 = vmatpush3.bf16.msra.mxu0 %v9967_v56 }
 0x67f   : > { %v8951_v15 = vpop.f32.mrf.mxu0  ;;  %9071 = vmatprep.subr.bf16.mxu0 %v9968_v38 }
 0x680   : > { %v8952_v57 = vadd.f32 %v8951_v15, %v8950_v61 }
 0x681   : > { %v8953_v53 = vpop.f32.mrf.mxu0 }
 0x682   : > { %v3433_v24 = vpack.c.bf16 %v8952_v57, %v8949_v18  ;;  %9072 = vmatpush3.bf16.msra.mxu0 %v9969_v0  ;;  %v9977_v18 = vld [vmem:[#allocation6 + $0x10] sm:$0xff]  }
 0x683   : > { %v8954_v4 = vpop.f32.mrf.mxu0  ;;  %9073 = vmatprep.subr.bf16.mxu0 %v9970_v9 }
 0x684   : > { %3804 = vmatprep.mubr.bf16.mxu1 %v3433_v24  ;;  %v8955_v34 = vadd.f32 %v8954_v4, %v8953_v53 }
 0x685   : > { %v8956_v60 = vpop.f32.mrf.mxu0  ;;  %3805 = vmatmul.mubr.bf16.gmra.mxu1 %v3432_v25 }
 0x686   : > { %9074 = vmatpush3.bf16.msra.mxu0 %v9971_v63 }
 0x687   : > { %v8957_v43 = vpop.f32.mrf.mxu0  ;;  %9075 = vmatprep.subr.bf16.mxu0 %v9976_v21 }
 0x688   : > { %v8958_v10 = vadd.f32 %v8957_v43, %v8956_v60 }
 0x689   : > { %v8959_v28 = vpop.f32.mrf.mxu0 }
 0x68a   : > { %v3437_v12 = vpack.c.bf16 %v8958_v10, %v8955_v34  ;;  %9076 = vmatpush3.bf16.msra.mxu0 %v9977_v18 }
 0x68b   : > { %v8960_v59 = vpop.f32.mrf.mxu0  ;;  %9077 = vmatprep.subr.bf16.mxu0 %v9982_v3 }
 0x68c   : > { %3812 = vmatprep.mubr.bf16.mxu1 %v3437_v12  ;;  %v8961_v14 = vadd.f32 %v8960_v59, %v8959_v28 }
 0x68d   : > { %v8962_v29 = vpop.f32.mrf.mxu0  ;;  %3813 = vmatmul.mubr.bf16.gmra.mxu1 %v3436_v13 }
 0x68f   : > { %v8963_v30 = vpop.f32.mrf.mxu0 }
 0x690   : > { %v8964_v6 = vadd.f32 %v8963_v30, %v8962_v29 }
 0x692   : > { %v3441_v35 = vpack.c.bf16 %v8964_v6, %v8961_v14 }
 0x694   : > { %3820 = vmatprep.mubr.bf16.mxu1 %v3441_v35 }
 0x695   : > { %3821 = vmatmul.mubr.bf16.gmra.mxu1 %v3440_v46 }
 0x696   : > { %9515 = vmatprep.mubr.msk.bf16.mxu1 %vm3977_vm2, %v9946_v42 }
 0x6fd   : > { %v8981_v49 = vpop.f32.mrf.mxu1 }
 0x6ff   : > { %v8982_v41 = vpop.f32.mrf.mxu1 }
 0x700   : > { %v8983_v54 = vadd.f32 %v8982_v41, %v8981_v49 }
 0x701   : > { %v8984_v47 = vpop.f32.mrf.mxu1 }
 0x703   : > { %v8985_v17 = vpop.f32.mrf.mxu1 }
 0x704   : > { %v8986_v19 = vadd.f32 %v8985_v17, %v8984_v47 }
 0x705   : > { %v8987_v32 = vpop.f32.mrf.mxu1 }
 0x707   : > { %v8988_v16 = vpop.f32.mrf.mxu1 }
 0x708   : > { %v8989_v36 = vadd.f32 %v8988_v16, %v8987_v32 }
 0x709   : > { %v8990_v40 = vpop.f32.mrf.mxu1 }
 0x70b   : > { %v8991_v48 = vpop.f32.mrf.mxu1 }
 0x70c   : > { %v8992_v30 = vadd.f32 %v8991_v48, %v8990_v40 }
 0x70d   : > { %v10800_v45 = vpop.f32.mrf.mxu1 }
 0x70f   : > { %v10802_v11 = vpop.f32.mrf.mxu1 }
 0x711   : > { %v10804_v51 = vpop.f32.mrf.mxu1 }
 0x713   : > { %v10806_v5 = vpop.f32.mrf.mxu1 }
 0x715   : > { %v10808_v7 = vpop.f32.mrf.mxu1 }
 0x717   : > { %v10810_v37 = vpop.f32.mrf.mxu1 }
 0x719   : > { %v10812_v39 = vpop.f32.mrf.mxu1 }
 0x71b   : > { %v10814_v61 = vpop.f32.mrf.mxu1 }
 0x73d   : > { %v9021_v15 = vpop.f32.mrf.mxu1 }
 0x73f   : > { %v9022_v57 = vpop.f32.mrf.mxu1 }
 0x740   : > { %v9023_v53 = vadd.f32 %v9022_v57, %v9021_v15 }
 0x741   : > { %v9024_v24 = vpop.f32.mrf.mxu1 }
 0x742   : > { %v3799_v25 = vadd.f32 %v9023_v53, %v8983_v54 }
 0x743   : > { %v9025_v4 = vpop.f32.mrf.mxu1 }
 0x744   : > { %v3829_v60 = vadd.f32 %v3799_v25, %v10767_v62  ;;  %v9026_v27 = vadd.f32 %v9025_v4, %v9024_v24 }
 0x745   : > { %v9027_v43 = vpop.f32.mrf.mxu1 }
 0x746   : > { %v3802_v34 = vadd.f32 %v9026_v27, %v8986_v19  ;;  %v3845_v28 = vmul.f32 0.01, %v3829_v60  ;;  %vm3837_vm3 = vcmp.gt.f32.partialorder %v3829_v60, 0.0  ;;  %v9975_v27 = vld [vmem:[#allocation6 + $0xb0] sm:$0xff]  }
 0x747   : > { %v9028_v10 = vpop.f32.mrf.mxu1 }
 0x748   : > { %v3830_v12 = vadd.f32 %v3802_v34, %v10770_v55  ;;  %v9029_v13 = vadd.f32 %v9028_v10, %v9027_v43  ;;  %v3853_v62 = vsel %vm3837_vm3, %v3829_v60, %v3845_v28  ;;  %v8995_v55 = vadd.f32 %v10802_v11, %v10800_v45  ;;  %v9974_v60 = vld [vmem:[#allocation6 + $0xf0] sm:$0xff]   ;;  %v9978_v43 = vld [vmem:[#allocation6 + $0xe8] sm:$0xff]   ;;  %v9949_v34 = vld [vmem:[%s11092_s5 + $0x18] sm:$0xff]  }
 0x749   : > { %v9030_v59 = vpop.f32.mrf.mxu1  ;;  %v9950_v10 = vld [vmem:[%s11092_s5 + $0x20] sm:$0xff]  }
 0x74a   : > { %v3846_v29 = vmul.f32 0.01, %v3830_v12  ;;  %v3807_v31 = vadd.f32 %v9029_v13, %v8989_v36  ;;  %vm3838_vm4 = vcmp.gt.f32.partialorder %v3830_v12, 0.0  ;;  %v9979_v36 = vld [vmem:[#allocation6 + $0xa8] sm:$0xff]   ;;  %v9980_v28 = vld [vmem:[#allocation6 + $0xe0] sm:$0xff]  }
 0x74b   : > { %v9031_v14 = vpop.f32.mrf.mxu1  ;;  %v9951_v13 = vld [vmem:[%s11092_s5 + $0x28] sm:$0xff]  }
 0x74c   : > { %v3831_v6 = vadd.f32 %v3807_v31, %v10773_v44  ;;  %v9032_v33 = vadd.f32 %v9031_v14, %v9030_v59  ;;  %v3854_v35 = vsel %vm3838_vm4, %v3830_v12, %v3846_v29  ;;  %v8998_v44 = vadd.f32 %v10806_v5, %v10804_v51  ;;  %v9981_v12 = vld [vmem:[#allocation6 + $0xa0] sm:$0xff]   ;;  %v9952_v59 = vld [vmem:[%s11092_s5 + $0x30] sm:$0xff]   ;;  %v9953_v29 = vld [vmem:[%s11092_s5 + $0x38] sm:$0xff]  }
 0x74d   : > { %v9033_v46 = vpop.f32.mrf.mxu1  ;;  %v3861_v42 = vpack.c.bf16 %v3854_v35, %v3853_v62  ;;  %v9954_v31 = vld [vmem:[%s11092_s5 + $0x40] sm:$0xff]   ;;  %v9956_v14 = vld [vmem:[%s11092_s5 + $0x50] sm:$0xff]   ;;  %v9959_v62 = vld [vmem:[%s11092_s5 + $0x68] sm:$0xff]  }
 0x74e   : > { %v3810_v49 = vadd.f32 %v9032_v33, %v8992_v30  ;;  %v3847_v54 = vmul.f32 0.01, %v3831_v6  ;;  %vm3839_vm5 = vcmp.gt.f32.partialorder %v3831_v6, 0.0  ;;  %v9955_v30 = vld [vmem:[%s11092_s5 + $0x48] sm:$0xff]   ;;  %v9958_v33 = vld [vmem:[%s11092_s5 + $0x60] sm:$0xff]   ;;  %v9962_v35 = vld [vmem:[%s11092_s5 + $0x70] sm:$0xff]  }
 0x74f   : > { %v9034_v41 = vpop.f32.mrf.mxu1 }
 0x750   : > { %v3832_v47 = vadd.f32 %v3810_v49, %v10776_v1  ;;  %v9035_v17 = vadd.f32 %v9034_v41, %v9033_v46  ;;  %v3855_v20 = vsel %vm3839_vm5, %v3831_v6, %v3847_v54  ;;  %v9001_v1 = vadd.f32 %v10810_v37, %v10808_v7  ;;  %v9957_v6 = vld [vmem:[%s11092_s5 + $0x58] sm:$0xff]   ;;  %v9983_v49 = vld [vmem:[#allocation6 + $0x8] sm:$0xff]   ;;  %v9987_v54 = vld [vmem:[#allocation6 + $0xd0] sm:$0xff]  }
 0x751   : > { %v9036_v19 = vpop.f32.mrf.mxu1  ;;  %v9963_v46 = vld [vmem:[%s11092_s5 + $0x78] sm:$0xff]   ;;  %9078 = vmatpush3.bf16.msra.mxu0 %v9983_v49 }
 0x752   : > { %v3848_v32 = vmul.f32 0.01, %v3832_v47  ;;  %v3815_v16 = vadd.f32 %v9035_v17, %v8995_v55  ;;  %vm3840_vm6 = vcmp.gt.f32.partialorder %v3832_v47, 0.0  ;;  %v9985_v41 = vld [vmem:[#allocation6 + $0x98] sm:$0xff]   ;;  %v9986_v55 = vld [vmem:[#allocation6 + $0x40] sm:$0xff]   ;;  %v9989_v17 = vld [vmem:[#allocation6 + $0x90] sm:$0xff]  }
 0x753   : > { %v9037_v40 = vpop.f32.mrf.mxu1  ;;  %9079 = vmatprep.subr.bf16.mxu0 %v9986_v55  ;;  %v10025_v55 = vld [vmem:[#allocation6 + $0x238] sm:$0xff]  }
 0x754   : > { %v3833_v48 = vadd.f32 %v3815_v16, %v10779_v23  ;;  %v9038_v50 = vadd.f32 %v9037_v40, %v9036_v19  ;;  %v3856_v8 = vsel %vm3840_vm6, %v3832_v47, %v3848_v32  ;;  %v9004_v23 = vadd.f32 %v10814_v61, %v10812_v39  ;;  %v9947_v39 = vld [vmem:[%s11092_s5 + $0x8] sm:$0xff]   ;;  %v9973_v61 = vld [vmem:[#allocation6 + $0xb8] sm:$0xff]   ;;  %v9988_v47 = vld [vmem:[#allocation6] sm:$0xff]  }
 0x755   : > { %v9039_v58 = vpop.f32.mrf.mxu1  ;;  %v3862_v45 = vpack.c.bf16 %v3856_v8, %v3855_v20  ;;  %9080 = vmatpush3.bf16.msra.mxu0 %v9988_v47  ;;  %v9990_v19 = vld [vmem:[#allocation6 + $0xc8] sm:$0xff]   ;;  %v9991_v32 = vld [vmem:[#allocation6 + $0x178] sm:$0xff]   ;;  %v9996_v40 = vld [vmem:[#allocation6 + $0x80] sm:$0xff]  }
 0x756   : > { %v3818_v11 = vadd.f32 %v9038_v50, %v8998_v44  ;;  %v3849_v56 = vmul.f32 0.01, %v3833_v48  ;;  %vm3841_vm7 = vcmp.gt.f32.partialorder %v3833_v48, 0.0  ;;  %v9992_v16 = vld [vmem:[#allocation6 + $0x88] sm:$0xff]   ;;  %9109 = vmatprep.subr.bf16.mxu0 %v9991_v32  ;;  %v9994_v44 = vld [vmem:[#allocation6 + $0xc0] sm:$0xff]  }
 0x757   : > { %v9040_v52 = vpop.f32.mrf.mxu1 }
 0x758   : > { %v3834_v38 = vadd.f32 %v3818_v11, %v10782_v2  ;;  %v9041_v0 = vadd.f32 %v9040_v52, %v9039_v58  ;;  %v3857_v18 = vsel %vm3841_vm7, %v3833_v48, %v3849_v56  ;;  %v9999_v48 = vld [vmem:[#allocation6 + $0x1f8] sm:$0xff]  }
 0x759   : > { %v9042_v9 = vpop.f32.mrf.mxu1  ;;  %v9993_v11 = vld [vmem:[#allocation6 + $0x138] sm:$0xff]  }
 0x75a   : > { %v3850_v51 = vmul.f32 0.01, %v3834_v38  ;;  %v3823_v5 = vadd.f32 %v9041_v0, %v9001_v1  ;;  %vm3842_vm8 = vcmp.gt.f32.partialorder %v3834_v38, 0.0  ;;  %v9995_v1 = vld [vmem:[#allocation6 + $0x170] sm:$0xff]  }
 0x75b   : > { %v9043_v63 = vpop.f32.mrf.mxu1  ;;  %v9997_v0 = vld [vmem:[#allocation6 + $0x130] sm:$0xff]  }
 0x75c   : > { %v3835_v21 = vadd.f32 %v3823_v5, %v10785_v26  ;;  %v9044_v15 = vadd.f32 %v9043_v63, %v9042_v9  ;;  %v3858_v57 = vsel %vm3842_vm8, %v3834_v38, %v3850_v51  ;;  %v9972_v26 = vld [vmem:[#allocation6 + $0xf8] sm:$0xff]   ;;  %v9998_v9 = vld [vmem:[#allocation6 + $0x168] sm:$0xff]  }
 0x75d   : > { %v3863_v3 = vpack.c.bf16 %v3858_v57, %v3857_v18  ;;  %v10000_v63 = vld [vmem:[#allocation6 + $0x128] sm:$0xff]   ;;  %v10002_v18 = vld [vmem:[#allocation6 + $0x160] sm:$0xff]   ;;  %v10003_v57 = vld [vmem:[#allocation6 + $0x1f0] sm:$0xff]  }
 0x75e   : > { %v3826_v7 = vadd.f32 %v9044_v15, %v9004_v23  ;;  %v3851_v37 = vmul.f32 0.01, %v3835_v21  ;;  %vm3843_vm9 = vcmp.gt.f32.partialorder %v3835_v21, 0.0 }
 0x760   : > { %v3836_v2 = vadd.f32 %v3826_v7, %v10788_v22  ;;  %v3859_v24 = vsel %vm3843_vm9, %v3835_v21, %v3851_v37  ;;  %v9948_v22 = vld [vmem:[%s11092_s5 + $0x10] sm:$0xff]   ;;  %v10001_v21 = vld [vmem:[#allocation6 + $0x1b8] sm:$0xff]   ;;  %v10004_v7 = vld [vmem:[#allocation6 + $0x120] sm:$0xff]  }
 0x761   : > { %v10005_v37 = vld [vmem:[#allocation6 + $0x1b0] sm:$0xff]  }
 0x762   : > { %v3852_v53 = vmul.f32 0.01, %v3836_v2  ;;  %vm3844_vm10 = vcmp.gt.f32.partialorder %v3836_v2, 0.0 }
 0x764   : > { %v3860_v25 = vsel %vm3844_vm10, %v3836_v2, %v3852_v53  ;;  %v10006_v53 = vld [vmem:[#allocation6 + $0x158] sm:$0xff]  }
 0x765   : > { %v3864_v4 = vpack.c.bf16 %v3860_v25, %v3859_v24  ;;  %v10007_v24 = vld [vmem:[#allocation6 + $0x1e8] sm:$0xff]  }
 0x767   : > { %9507 = vmatprep.subr.bf16.mxu1 %v3864_v4 }
 0x768   : > { %9508 = vmatpush3.bf16.msra.mxu1 %v3864_v4 }
 0x769   : > { %9509 = vmatprep.subr.bf16.mxu1 %v3863_v3 }
 0x76c   : > { %9510 = vmatpush3.bf16.msra.mxu1 %v3863_v3 }
 0x76d   : > { %9511 = vmatprep.subr.bf16.mxu1 %v3862_v45 }
 0x770   : > { %9512 = vmatpush3.bf16.msra.mxu1 %v3862_v45 }
 0x771   : > { %9513 = vmatprep.subr.bf16.mxu1 %v3861_v42 }
 0x774   : > { %9514 = vmatpush3.bf16.msra.mxu1 %v3861_v42  ;;  %v9984_v42 = vld [vmem:[#allocation6 + $0xd8] sm:$0xff]  }
 0x775   : > { %9087 = vmatprep.subr.bf16.mxu1 %v9972_v26  ;;  %v10008_v26 = vld [vmem:[#allocation6 + $0x118] sm:$0xff]  }
 0x777   : > { %9516 = vmatmul.mubr.msk.bf16.vlgmr.msra.gmra.mxu1 %vm3977_vm2, %v9947_v39  ;;  %v10009_v39 = vld [vmem:[#allocation6 + $0x1a8] sm:$0xff]  }
 0x778   : > { %9519 = vmatprep.mubr.msk.bf16.mxu1 %vm3977_vm2, %v9948_v22  ;;  %9088 = vmatpush3.bf16.msra.mxu1 %v9973_v61  ;;  %v10010_v61 = vld [vmem:[#allocation6 + $0x150] sm:$0xff]  }
 0x779   : > { %9089 = vmatprep.subr.bf16.mxu1 %v9974_v60  ;;  %v10011_v60 = vld [vmem:[#allocation6 + $0x1e0] sm:$0xff]  }
 0x77c   : > { %9090 = vmatpush3.bf16.msra.mxu1 %v9975_v27 }
 0x77d   : > { %9091 = vmatprep.subr.bf16.mxu1 %v9978_v43  ;;  %v10012_v43 = vld [vmem:[#allocation6 + $0x110] sm:$0xff]  }
 0x77f   : > { %9520 = vmatmul.mubr.msk.bf16.gmra.mxu1 %vm3977_vm2, %v9949_v34  ;;  %v10013_v34 = vld [vmem:[#allocation6 + $0x1a0] sm:$0xff]  }
 0x780   : > { %9523 = vmatprep.mubr.msk.bf16.mxu1 %vm3977_vm2, %v9950_v10  ;;  %9092 = vmatpush3.bf16.msra.mxu1 %v9979_v36  ;;  %v10014_v36 = vld [vmem:[#allocation6 + $0x148] sm:$0xff]  }
 0x781   : > { %9093 = vmatprep.subr.bf16.mxu1 %v9980_v28  ;;  %v10015_v28 = vld [vmem:[#allocation6 + $0x1d8] sm:$0xff]  }
 0x784   : > { %9094 = vmatpush3.bf16.msra.mxu1 %v9981_v12 }
 0x785   : > { %9095 = vmatprep.subr.bf16.mxu1 %v9984_v42  ;;  %v10023_v42 = vld [vmem:[#allocation6 + $0x278] sm:$0xff]  }
 0x787   : > { %9524 = vmatmul.mubr.msk.bf16.gmra.mxu1 %vm3977_vm2, %v9951_v13 }
 0x788   : > { %9527 = vmatprep.mubr.msk.bf16.mxu1 %vm3977_vm2, %v9952_v59  ;;  %9096 = vmatpush3.bf16.msra.mxu1 %v9985_v41  ;;  %v10016_v59 = vld [vmem:[#allocation6 + $0x108] sm:$0xff]  }
 0x789   : > { %9097 = vmatprep.subr.bf16.mxu1 %v9987_v54  ;;  %v10024_v41 = vld [vmem:[#allocation6 + $0x188] sm:$0xff]  }
 0x78c   : > { %9098 = vmatpush3.bf16.msra.mxu1 %v9989_v17  ;;  %v10026_v17 = vld [vmem:[#allocation6 + $0x1c0] sm:$0xff]  }
 0x78d   : > { %9099 = vmatprep.subr.bf16.mxu1 %v9990_v19  ;;  %v10027_v19 = vld [vmem:[#allocation6 + $0x270] sm:$0xff]  }
 0x78f   : > { %9528 = vmatmul.mubr.msk.bf16.gmra.mxu1 %vm3977_vm2, %v9953_v29  ;;  %v10017_v29 = vld [vmem:[#allocation6 + $0x198] sm:$0xff]  }
 0x790   : > { %9531 = vmatprep.mubr.msk.bf16.mxu1 %vm3977_vm2, %v9954_v31  ;;  %9100 = vmatpush3.bf16.msra.mxu1 %v9992_v16 }
 0x791   : > { %9101 = vmatprep.subr.bf16.mxu1 %v9994_v44  ;;  %v10028_v44 = vld [vmem:[#allocation6 + $0x180] sm:$0xff]  }
 0x794   : > { %9102 = vmatpush3.bf16.msra.mxu1 %v9996_v40  ;;  %v10029_v40 = vld [vmem:[#allocation6 + $0x230] sm:$0xff]  }
 0x795   : > { %9131 = vmatprep.subr.bf16.mxu1 %v9999_v48  ;;  %v10030_v48 = vld [vmem:[#allocation6 + $0x268] sm:$0xff]  }
 0x797   : > { %9532 = vmatmul.mubr.msk.bf16.gmra.mxu1 %vm3977_vm2, %v9955_v30  ;;  %v10018_v30 = vld [vmem:[#allocation6 + $0x140] sm:$0xff]  }
 0x798   : > { %9535 = vmatprep.mubr.msk.bf16.mxu1 %vm3977_vm2, %v9956_v14  ;;  %v10019_v14 = vld [vmem:[#allocation6 + $0x1d0] sm:$0xff]  }
 0x79f   : > { %9536 = vmatmul.mubr.msk.bf16.gmra.mxu1 %vm3977_vm2, %v9957_v6 }
 0x7a0   : > { %9539 = vmatprep.mubr.msk.bf16.mxu1 %vm3977_vm2, %v9958_v33  ;;  %v10020_v33 = vld [vmem:[#allocation6 + $0x100] sm:$0xff]  }
 0x7a7   : > { %9540 = vmatmul.mubr.msk.bf16.gmra.mxu1 %vm3977_vm2, %v9959_v62  ;;  %v10021_v62 = vld [vmem:[#allocation6 + $0x190] sm:$0xff]  }
 0x7a8   : > { %9543 = vmatprep.mubr.msk.bf16.mxu1 %vm3977_vm2, %v9962_v35 }
 0x7af   : > { %9544 = vmatmul.mubr.msk.bf16.gmra.mxu1 %vm3977_vm2, %v9963_v46  ;;  %v10022_v46 = vld [vmem:[#allocation6 + $0x1c8] sm:$0xff]  }
 0x837   : > { %v9517_v50 = vpop.f32.mrf.mxu1 }
 0x839   : > { %v4060_v20 = vpop.f32.mrf.mxu1 }
 0x83b   : > { %v9518_v8 = vpop.f32.mrf.mxu1 }
 0x83c   : > { %v4188_v58 = vpack.c.bf16 %v9518_v8, %v9517_v50  ;;  %v10031_v50 = vld [vmem:[#allocation6 + $0x2f8] sm:$0xff]   ;;  %v10032_v8 = vld [vmem:[#allocation6 + $0x228] sm:$0xff]  }
 0x83d   : > { %v4063_v45 = vpop.f32.mrf.mxu1 }
 0x83e   : > { %v4187_v52 = vpack.c.bf16 %v4063_v45, %v4060_v20  ;;  %5266 = vmatprep.mubr.bf16.mxu0 %v4188_v58  ;;  %v10033_v58 = vld [vmem:[#allocation6 + $0x2b8] sm:$0xff]  }
 0x83f   : > { %v9521_v56 = vpop.f32.mrf.mxu1 }
 0x840   : > { %5267 = vmatmul.mubr.bf16.vlgmr.msra.gmra.mxu0 %v4187_v52  ;;  %v10035_v52 = vld [vmem:[#allocation6 + $0x2f0] sm:$0xff]  }
 0x841   : > { %9110 = vmatpush3.bf16.msra.mxu0 %v9993_v11  ;;  %v4076_v38 = vpop.f32.mrf.mxu1  ;;  %v10034_v11 = vld [vmem:[#allocation6 + $0x260] sm:$0xff]  }
 0x842   : > { %9111 = vmatprep.subr.bf16.mxu0 %v9995_v1 }
 0x843   : > { %v9522_v51 = vpop.f32.mrf.mxu1 }
 0x844   : > { %v4190_v5 = vpack.c.bf16 %v9522_v51, %v9521_v56  ;;  %v10039_v51 = vld [vmem:[#allocation6 + $0x2e8] sm:$0xff]  }
 0x845   : > { %9112 = vmatpush3.bf16.msra.mxu0 %v9997_v0  ;;  %v4079_v23 = vpop.f32.mrf.mxu1  ;;  %v10037_v0 = vld [vmem:[#allocation6 + $0x2b0] sm:$0xff]  }
 0x846   : > { %v4189_v15 = vpack.c.bf16 %v4079_v23, %v4076_v38  ;;  %5307 = vmatprep.mubr.bf16.mxu1 %v4190_v5  ;;  %9113 = vmatprep.subr.bf16.mxu0 %v9998_v9  ;;  %v10036_v38 = vld [vmem:[#allocation6 + $0x220] sm:$0xff]   ;;  %v10038_v9 = vld [vmem:[#allocation6 + $0x258] sm:$0xff]  }
 0x847   : > { %v9525_v3 = vpop.f32.mrf.mxu1  ;;  %v10040_v23 = vld [vmem:[#allocation6 + $0x218] sm:$0xff]  }
 0x848   : > { %5308 = vmatmul.mubr.bf16.vlgmr.msra.gmra.mxu1 %v4189_v15  ;;  %v10043_v15 = vld [vmem:[#allocation6 + $0x2e0] sm:$0xff]  }
 0x849   : > { %9114 = vmatpush3.bf16.msra.mxu0 %v10000_v63  ;;  %9132 = vmatpush3.bf16.msra.mxu1 %v10001_v21  ;;  %v4092_v2 = vpop.f32.mrf.mxu1  ;;  %v10041_v63 = vld [vmem:[#allocation6 + $0x2a8] sm:$0xff]   ;;  %v10042_v21 = vld [vmem:[#allocation6 + $0x250] sm:$0xff]  }
 0x84a   : > { %9115 = vmatprep.subr.bf16.mxu0 %v10002_v18  ;;  %9133 = vmatprep.subr.bf16.mxu1 %v10003_v57  ;;  %v10044_v57 = vld [vmem:[#allocation6 + $0x210] sm:$0xff]  }
 0x84b   : > { %v9526_v25 = vpop.f32.mrf.mxu1 }
 0x84c   : > { %v4192_v4 = vpack.c.bf16 %v9526_v25, %v9525_v3  ;;  %v10045_v3 = vld [vmem:[#allocation6 + $0x2a0] sm:$0xff]  }
 0x84d   : > { %9116 = vmatpush3.bf16.msra.mxu0 %v10004_v7  ;;  %9134 = vmatpush3.bf16.msra.mxu1 %v10005_v37  ;;  %v4095_v22 = vpop.f32.mrf.mxu1  ;;  %v10046_v7 = vld [vmem:[#allocation6 + $0x248] sm:$0xff]   ;;  %v10047_v37 = vld [vmem:[#allocation6 + $0x2d8] sm:$0xff]   ;;  %v10050_v25 = vld [vmem:[#allocation6 + $0x240] sm:$0xff]  }
 0x84e   : > { %9117 = vmatprep.subr.bf16.mxu0 %v10006_v53  ;;  %9135 = vmatprep.subr.bf16.mxu1 %v10007_v24  ;;  %v4191_v47 = vpack.c.bf16 %v4095_v22, %v4092_v2  ;;  %v10048_v53 = vld [vmem:[#allocation6 + $0x208] sm:$0xff]   ;;  %v10049_v24 = vld [vmem:[#allocation6 + $0x298] sm:$0xff]   ;;  %v10053_v22 = vld [vmem:[#allocation6 + $0x290] sm:$0xff]  }
 0x84f   : > { %v9529_v27 = vpop.f32.mrf.mxu1  ;;  %5348 = vmatprep.mubr.bf16.mxu0 %v4192_v4  ;;  %v10051_v4 = vld [vmem:[#allocation6 + $0x2d0] sm:$0xff]  }
 0x851   : > { %9118 = vmatpush3.bf16.msra.mxu0 %v10008_v26  ;;  %9136 = vmatpush3.bf16.msra.mxu1 %v10009_v39  ;;  %v4108_v10 = vpop.f32.mrf.mxu1  ;;  %v10052_v39 = vld [vmem:[#allocation6 + $0x200] sm:$0xff]  }
 0x852   : > { %9119 = vmatprep.subr.bf16.mxu0 %v10010_v61  ;;  %9137 = vmatprep.subr.bf16.mxu1 %v10011_v60  ;;  %v10054_v61 = vld [vmem:[#allocation6 + $0x2c8] sm:$0xff]   ;;  %v10055_v60 = vld [vmem:[#allocation6 + $0x378] sm:$0xff]  }
 0x853   : > { %v9530_v12 = vpop.f32.mrf.mxu1 }
 0x854   : > { %v4194_v13 = vpack.c.bf16 %v9530_v12, %v9529_v27 }
 0x855   : > { %9120 = vmatpush3.bf16.msra.mxu0 %v10012_v43  ;;  %9138 = vmatpush3.bf16.msra.mxu1 %v10013_v34  ;;  %v4111_v31 = vpop.f32.mrf.mxu1  ;;  %v10056_v43 = vld [vmem:[#allocation6 + $0x288] sm:$0xff]   ;;  %v10057_v34 = vld [vmem:[#allocation6 + $0x338] sm:$0xff]  }
 0x856   : > { %9121 = vmatprep.subr.bf16.mxu0 %v10014_v36  ;;  %9139 = vmatprep.subr.bf16.mxu1 %v10015_v28  ;;  %v4193_v45 = vpack.c.bf16 %v4111_v31, %v4108_v10  ;;  %v10058_v36 = vld [vmem:[#allocation6 + $0x2c0] sm:$0xff]   ;;  %v10059_v28 = vld [vmem:[#allocation6 + $0x370] sm:$0xff]   ;;  %v10062_v31 = vld [vmem:[#allocation6 + $0x368] sm:$0xff]  }
 0x857   : > { %5389 = vmatprep.mubr.bf16.mxu1 %v4194_v13  ;;  %v9533_v6 = vpop.f32.mrf.mxu1 }
 0x859   : > { %9122 = vmatpush3.bf16.msra.mxu0 %v10016_v59  ;;  %9140 = vmatpush3.bf16.msra.mxu1 %v10017_v29  ;;  %v10892_v35 = vpop.f32.mrf.mxu1  ;;  %v10060_v59 = vld [vmem:[#allocation6 + $0x280] sm:$0xff]   ;;  %v10061_v29 = vld [vmem:[#allocation6 + $0x330] sm:$0xff]  }
 0x85a   : > { %9123 = vmatprep.subr.bf16.mxu0 %v10018_v30  ;;  %9141 = vmatprep.subr.bf16.mxu1 %v10019_v14  ;;  %v10063_v30 = vld [vmem:[#allocation6 + $0x3f8] sm:$0xff]  }
 0x85b   : > { %v9534_v49 = vpop.f32.mrf.mxu1 }
 0x85c   : > { %v4196_v32 = vpack.c.bf16 %v9534_v49, %v9533_v6  ;;  %v10064_v6 = vld [vmem:[#allocation6 + $0x328] sm:$0xff]  }
 0x85d   : > { %9124 = vmatpush3.bf16.msra.mxu0 %v10020_v33  ;;  %9142 = vmatpush3.bf16.msra.mxu1 %v10021_v62  ;;  %v10894_v54 = vpop.f32.mrf.mxu1  ;;  %v10065_v33 = vld [vmem:[#allocation6 + $0x3b8] sm:$0xff]  }
 0x85e   : > { %9143 = vmatprep.subr.bf16.mxu1 %v10022_v46  ;;  %9153 = vmatprep.subr.bf16.mxu0 %v10023_v42  ;;  %v4195_v10 = vpack.c.bf16 %v10894_v54, %v10892_v35  ;;  %v10066_v35 = vld [vmem:[#allocation6 + $0x360] sm:$0xff]   ;;  %v10067_v46 = vld [vmem:[#allocation6 + $0x3f0] sm:$0xff]   ;;  %v10070_v54 = vld [vmem:[#allocation6 + $0x358] sm:$0xff]  }
 0x85f   : > { %v9537_v16 = vpop.f32.mrf.mxu1 }
 0x860   : > { %5349 = vmatmul.mubr.bf16.vlgmr.msra.gmra.mxu0 %v4191_v47  ;;  %v10071_v47 = vld [vmem:[#allocation6 + $0x3e8] sm:$0xff]  }
 0x861   : > { %9144 = vmatpush3.bf16.msra.mxu1 %v10024_v41  ;;  %9154 = vmatpush3.bf16.msra.mxu0 %v10025_v55  ;;  %v10896_v20 = vpop.f32.mrf.mxu1  ;;  %v10068_v41 = vld [vmem:[#allocation6 + $0x320] sm:$0xff]   ;;  %v10069_v55 = vld [vmem:[#allocation6 + $0x3b0] sm:$0xff]  }
 0x862   : > { %9145 = vmatprep.subr.bf16.mxu1 %v10026_v17  ;;  %9155 = vmatprep.subr.bf16.mxu0 %v10027_v19  ;;  %v10072_v17 = vld [vmem:[#allocation6 + $0x318] sm:$0xff]   ;;  %v10073_v19 = vld [vmem:[#allocation6 + $0x3a8] sm:$0xff]  }
 0x863   : > { %5430 = vmatprep.mubr.bf16.mxu0 %v4196_v32  ;;  %v9538_v1 = vpop.f32.mrf.mxu1  ;;  %v10074_v32 = vld [vmem:[#allocation6 + $0x350] sm:$0xff]  }
 0x864   : > { %v4198_v56 = vpack.c.bf16 %v9538_v1, %v9537_v16  ;;  %v10075_v16 = vld [vmem:[#allocation6 + $0x3e0] sm:$0xff]   ;;  %v10086_v1 = vld [vmem:[#allocation6 + $0x3c8] sm:$0xff]  }
 0x865   : > { %9146 = vmatpush3.bf16.msra.mxu1 %v10028_v44  ;;  %9156 = vmatpush3.bf16.msra.mxu0 %v10029_v40  ;;  %v10898_v5 = vpop.f32.mrf.mxu1  ;;  %v10076_v44 = vld [vmem:[#allocation6 + $0x310] sm:$0xff]   ;;  %v10077_v40 = vld [vmem:[#allocation6 + $0x3a0] sm:$0xff]  }
 0x866   : > { %9157 = vmatprep.subr.bf16.mxu0 %v10030_v48  ;;  %9175 = vmatprep.subr.bf16.mxu1 %v10031_v50  ;;  %v4197_v62 = vpack.c.bf16 %v10898_v5, %v10896_v20  ;;  %v10078_v48 = vld [vmem:[#allocation6 + $0x348] sm:$0xff]   ;;  %v10079_v50 = vld [vmem:[#allocation6 + $0x3d8] sm:$0xff]  }
 0x867   : > { %v9541_v18 = vpop.f32.mrf.mxu1  ;;  %v10080_v20 = vld [vmem:[#allocation6 + $0x308] sm:$0xff]  }
 0x868   : > { %5390 = vmatmul.mubr.bf16.vlgmr.msra.gmra.mxu1 %v4193_v45  ;;  %v10083_v45 = vld [vmem:[#allocation6 + $0x3d0] sm:$0xff]  }
 0x869   : > { %9158 = vmatpush3.bf16.msra.mxu0 %v10032_v8  ;;  %9176 = vmatpush3.bf16.msra.mxu1 %v10033_v58  ;;  %v10900_v2 = vpop.f32.mrf.mxu1  ;;  %v10081_v8 = vld [vmem:[#allocation6 + $0x398] sm:$0xff]   ;;  %v10082_v58 = vld [vmem:[#allocation6 + $0x340] sm:$0xff]  }
 0x86a   : > { %9159 = vmatprep.subr.bf16.mxu0 %v10034_v11  ;;  %9177 = vmatprep.subr.bf16.mxu1 %v10035_v52  ;;  %v10084_v11 = vld [vmem:[#allocation6 + $0x300] sm:$0xff]   ;;  %v10085_v52 = vld [vmem:[#allocation6 + $0x390] sm:$0xff]  }
 0x86b   : > { %5471 = vmatprep.mubr.bf16.mxu1 %v4198_v56  ;;  %v9542_v26 = vpop.f32.mrf.mxu1  ;;  %v10087_v56 = vld [vmem:[#allocation6 + $0x388] sm:$0xff]  }
 0x86c   : > { %v4200_v13 = vpack.c.bf16 %v9542_v26, %v9541_v18  ;;  %v10104_v18 = vld [vmem:[#allocation7 + $0xb0] sm:$0xff]  }
 0x86d   : > { %9160 = vmatpush3.bf16.msra.mxu0 %v10036_v38  ;;  %9178 = vmatpush3.bf16.msra.mxu1 %v10037_v0  ;;  %v10902_v27 = vpop.f32.mrf.mxu1  ;;  %v10088_v0 = vld [vmem:[#allocation6 + $0x3c0] sm:$0xff]  }
 0x86e   : > { %9161 = vmatprep.subr.bf16.mxu0 %v10038_v9  ;;  %9179 = vmatprep.subr.bf16.mxu1 %v10039_v51  ;;  %v4199_v38 = vpack.c.bf16 %v10902_v27, %v10900_v2  ;;  %v10089_v9 = vld [vmem:[#allocation6 + $0x380] sm:$0xff]   ;;  %v10114_v2 = vld [vmem:[#allocation7 + $0xd8] sm:$0xff]  }
 0x86f   : > { %v9545_v12 = vpop.f32.mrf.mxu1 }
 0x871   : > { %9162 = vmatpush3.bf16.msra.mxu0 %v10040_v23  ;;  %9180 = vmatpush3.bf16.msra.mxu1 %v10041_v63  ;;  %v10906_v14 = vpop.f32.mrf.mxu1  ;;  %v10090_v23 = vld [vmem:[%s11095_s8] sm:$0xff]   ;;  %v10098_v63 = vld [vmem:[#allocation7 + $0xf8] sm:$0xff]  }
 0x872   : > { %9163 = vmatprep.subr.bf16.mxu0 %v10042_v21  ;;  %9181 = vmatprep.subr.bf16.mxu1 %v10043_v15  ;;  %v10100_v21 = vld [vmem:[#allocation7 + $0xb8] sm:$0xff]   ;;  %v10102_v15 = vld [vmem:[#allocation7 + $0xf0] sm:$0xff]  }
 0x873   : > { %v9546_v42 = vpop.f32.mrf.mxu1 }
 0x874   : > { %v4202_v49 = vpack.c.bf16 %v9546_v42, %v9545_v12 }
 0x875   : > { %9164 = vmatpush3.bf16.msra.mxu0 %v10044_v57  ;;  %9182 = vmatpush3.bf16.msra.mxu1 %v10045_v3  ;;  %v4175_v51 = vpop.f32.mrf.mxu1  ;;  %v10106_v57 = vld [vmem:[#allocation7 + $0xe8] sm:$0xff]  }
 0x876   : > { %9165 = vmatprep.subr.bf16.mxu0 %v10046_v7  ;;  %9183 = vmatprep.subr.bf16.mxu1 %v10047_v37  ;;  %v4201_v5 = vpack.c.bf16 %v4175_v51, %v10906_v14  ;;  %v10108_v3 = vld [vmem:[#allocation7 + $0xa8] sm:$0xff]   ;;  %v10110_v7 = vld [vmem:[#allocation7 + $0xe0] sm:$0xff]  }
 0x877   : > { %v10112_v37 = vld [vmem:[#allocation7 + $0xa0] sm:$0xff]  }
 0x879   : > { %9166 = vmatpush3.bf16.msra.mxu0 %v10048_v53  ;;  %9184 = vmatpush3.bf16.msra.mxu1 %v10049_v24  ;;  %v10116_v53 = vld [vmem:[#allocation7 + $0x98] sm:$0xff]   ;;  %v10118_v24 = vld [vmem:[#allocation7 + $0xd0] sm:$0xff]  }
 0x87a   : > { %9167 = vmatprep.subr.bf16.mxu0 %v10050_v25  ;;  %9185 = vmatprep.subr.bf16.mxu1 %v10051_v4  ;;  %v10120_v25 = vld [vmem:[#allocation7 + $0x90] sm:$0xff]  }
 0x87d   : > { %9168 = vmatpush3.bf16.msra.mxu0 %v10052_v39  ;;  %9186 = vmatpush3.bf16.msra.mxu1 %v10053_v22 }
 0x87e   : > { %9187 = vmatprep.subr.bf16.mxu1 %v10054_v61  ;;  %9197 = vmatprep.subr.bf16.mxu0 %v10055_v60 }
 0x880   : > { %5431 = vmatmul.mubr.bf16.vlgmr.msra.gmra.mxu0 %v4195_v10 }
 0x881   : > { %9188 = vmatpush3.bf16.msra.mxu1 %v10056_v43  ;;  %9198 = vmatpush3.bf16.msra.mxu0 %v10057_v34 }
 0x882   : > { %9189 = vmatprep.subr.bf16.mxu1 %v10058_v36  ;;  %9199 = vmatprep.subr.bf16.mxu0 %v10059_v28 }
 0x883   : > { %5512 = vmatprep.mubr.bf16.mxu0 %v4200_v13 }
 0x885   : > { %9190 = vmatpush3.bf16.msra.mxu1 %v10060_v59  ;;  %9200 = vmatpush3.bf16.msra.mxu0 %v10061_v29 }
 0x886   : > { %9201 = vmatprep.subr.bf16.mxu0 %v10062_v31  ;;  %9219 = vmatprep.subr.bf16.mxu1 %v10063_v30 }
 0x888   : > { %5472 = vmatmul.mubr.bf16.vlgmr.msra.gmra.mxu1 %v4197_v62  ;;  %v7948_v62 = vld [vmem:[%s11094_s7] ss:$0 sm:$0xff] }
 0x889   : > { %9202 = vmatpush3.bf16.msra.mxu0 %v10064_v6  ;;  %9220 = vmatpush3.bf16.msra.mxu1 %v10065_v33 }
 0x88a   : > { %9203 = vmatprep.subr.bf16.mxu0 %v10066_v35  ;;  %9221 = vmatprep.subr.bf16.mxu1 %v10067_v46 }
 0x88b   : > { %5553 = vmatprep.mubr.bf16.mxu1 %v4202_v49 }
 0x88d   : > { %9204 = vmatpush3.bf16.msra.mxu0 %v10068_v41  ;;  %9222 = vmatpush3.bf16.msra.mxu1 %v10069_v55 }
 0x88e   : > { %9205 = vmatprep.subr.bf16.mxu0 %v10070_v54  ;;  %9223 = vmatprep.subr.bf16.mxu1 %v10071_v47 }
 0x891   : > { %9206 = vmatpush3.bf16.msra.mxu0 %v10072_v17  ;;  %9224 = vmatpush3.bf16.msra.mxu1 %v10073_v19 }
 0x892   : > { %9207 = vmatprep.subr.bf16.mxu0 %v10074_v32  ;;  %9225 = vmatprep.subr.bf16.mxu1 %v10075_v16 }
 0x895   : > { %9208 = vmatpush3.bf16.msra.mxu0 %v10076_v44  ;;  %9226 = vmatpush3.bf16.msra.mxu1 %v10077_v40 }
 0x896   : > { %9209 = vmatprep.subr.bf16.mxu0 %v10078_v48  ;;  %9227 = vmatprep.subr.bf16.mxu1 %v10079_v50 }
 0x899   : > { %9210 = vmatpush3.bf16.msra.mxu0 %v10080_v20  ;;  %9228 = vmatpush3.bf16.msra.mxu1 %v10081_v8 }
 0x89a   : > { %9211 = vmatprep.subr.bf16.mxu0 %v10082_v58  ;;  %9229 = vmatprep.subr.bf16.mxu1 %v10083_v45 }
 0x89d   : > { %9212 = vmatpush3.bf16.msra.mxu0 %v10084_v11  ;;  %9230 = vmatpush3.bf16.msra.mxu1 %v10085_v52 }
 0x89e   : > { %9231 = vmatprep.subr.bf16.mxu1 %v10086_v1 }
 0x8a0   : > { %5513 = vmatmul.mubr.bf16.vlgmr.msra.gmra.mxu0 %v4199_v38 }
 0x8a1   : > { %9232 = vmatpush3.bf16.msra.mxu1 %v10087_v56  ;;  %9549 = vmatprep.mubr.msk.bf16.mxu0 %vm5625_vm11, %v10090_v23 }
 0x8a2   : > { %9233 = vmatprep.subr.bf16.mxu1 %v10088_v0 }
 0x8a5   : > { %9234 = vmatpush3.bf16.msra.mxu1 %v10089_v9 }
 0x8a6   : > { %9272 = vmatprep.subr.bf16.mxu1 %v10098_v63 }
 0x8a8   : > { %5554 = vmatmul.mubr.bf16.vlgmr.msra.gmra.mxu1 %v4201_v5 }
 0x8a9   : > { %9273 = vmatpush3.bf16.msra.mxu1 %v10100_v21 }
 0x8aa   : > { %9274 = vmatprep.subr.bf16.mxu1 %v10102_v15 }
 0x8ad   : > { %9275 = vmatpush3.bf16.msra.mxu1 %v10104_v18 }
 0x8ae   : > { %9276 = vmatprep.subr.bf16.mxu1 %v10106_v57 }
 0x8b1   : > { %9277 = vmatpush3.bf16.msra.mxu1 %v10108_v3 }
 0x8b2   : > { %9278 = vmatprep.subr.bf16.mxu1 %v10110_v7 }
 0x8b5   : > { %9279 = vmatpush3.bf16.msra.mxu1 %v10112_v37 }
 0x8b6   : > { %9280 = vmatprep.subr.bf16.mxu1 %v10114_v2 }
 0x8b9   : > { %9281 = vmatpush3.bf16.msra.mxu1 %v10116_v53 }
 0x8ba   : > { %9282 = vmatprep.subr.bf16.mxu1 %v10118_v24 }
 0x8bd   : > { %9283 = vmatpush3.bf16.msra.mxu1 %v10120_v25 }
 0x900   : > { %v9081_v4 = vpop.f32.mrf.mxu0 }
 0x902   : > { %v9082_v26 = vpop.f32.mrf.mxu0 }
 0x903   : > { %v9083_v33 = vadd.f32 %v9082_v26, %v9081_v4 }
 0x904   : > { %v9084_v39 = vpop.f32.mrf.mxu0 }
 0x905   : > { %v5269_v49 = vadd.f32 %v9083_v33, %v7948_v62  ;;  %v10096_v33 = vld [vmem:[%s11095_s8 + $0x30] sm:$0xff]  }
 0x906   : > { %v9085_v61 = vpop.f32.mrf.mxu0 }
 0x907   : > { %v9086_v41 = vadd.f32 %v9085_v61, %v9084_v39 }
 0x908   : > { %v9103_v22 = vpop.f32.mrf.mxu1 }
 0x909   : > { %v5272_v44 = vadd.f32 %v9086_v41, %v7948_v62  ;;  %v10117_v62 = vld [vmem:[#allocation7 + $0x18] sm:$0xff]   ;;  %v10124_v41 = vld [vmem:[#allocation7 + $0x88] sm:$0xff]  }
 0x90a   : > { %v9104_v60 = vpop.f32.mrf.mxu1 }
 0x90b   : > { %v9105_v35 = vadd.f32 %v9104_v60, %v9103_v22 }
 0x90c   : > { %v9106_v43 = vpop.f32.mrf.mxu1 }
 0x90d   : > { %v5310_v47 = vadd.f32 %v9105_v35, %v5269_v49  ;;  %v10119_v35 = vld [vmem:[#allocation7 + $0x50] sm:$0xff]   ;;  %v10122_v49 = vld [vmem:[#allocation7 + $0xc8] sm:$0xff]  }
 0x90e   : > { %v9107_v10 = vpop.f32.mrf.mxu1  ;;  %9284 = vmatprep.subr.bf16.mxu1 %v10122_v49  ;;  %v10165_v49 = vld [vmem:[#allocation7 + $0x238] sm:$0xff]  }
 0x90f   : > { %v9108_v17 = vadd.f32 %v9107_v10, %v9106_v43  ;;  %v10091_v43 = vld [vmem:[%s11095_s8 + $0x8] sm:$0xff]   ;;  %v10101_v10 = vld [vmem:[#allocation7 + $0x38] sm:$0xff]   ;;  %9285 = vmatpush3.bf16.msra.mxu1 %v10124_v41 }
 0x911   : > { %v5313_v8 = vadd.f32 %v9108_v17, %v5272_v44  ;;  %v10128_v17 = vld [vmem:[#allocation7 + $0x80] sm:$0xff]   ;;  %v10131_v44 = vld [vmem:[#allocation7 + $0x178] sm:$0xff]  }
 0x920   : > { %v9125_v27 = vpop.f32.mrf.mxu0 }
 0x922   : > { %v9126_v34 = vpop.f32.mrf.mxu0 }
 0x923   : > { %v9127_v55 = vadd.f32 %v9126_v34, %v9125_v27  ;;  %v10099_v27 = vld [vmem:[#allocation7 + $0x78] sm:$0xff]   ;;  %v10092_v34 = vld [vmem:[%s11095_s8 + $0x10] sm:$0xff]  }
 0x924   : > { %v9128_v36 = vpop.f32.mrf.mxu0 }
 0x925   : > { %v5351_v40 = vadd.f32 %v9127_v55, %v5310_v47  ;;  %v10123_v55 = vld [vmem:[#allocation7 + $0x48] sm:$0xff]   ;;  %v10126_v47 = vld [vmem:[#allocation7 + $0xc0] sm:$0xff]  }
 0x926   : > { %v9129_v12 = vpop.f32.mrf.mxu0  ;;  %9286 = vmatprep.subr.bf16.mxu1 %v10126_v47  ;;  %v10168_v47 = vld [vmem:[#allocation7 + $0x2b0] sm:$0xff]  }
 0x927   : > { %v9130_v48 = vadd.f32 %v9129_v12, %v9128_v36  ;;  %v10103_v36 = vld [vmem:[#allocation7 + $0x70] sm:$0xff]   ;;  %v10107_v12 = vld [vmem:[#allocation7 + $0x68] sm:$0xff]   ;;  %9287 = vmatpush3.bf16.msra.mxu1 %v10128_v17 }
 0x928   : > { %v9147_v28 = vpop.f32.mrf.mxu1  ;;  %v10170_v17 = vld [vmem:[#allocation7 + $0x2e8] sm:$0xff]  }
 0x929   : > { %v5354_v1 = vadd.f32 %v9130_v48, %v5313_v8  ;;  %v10132_v8 = vld [vmem:[#allocation7 + $0x1b8] sm:$0xff]  }
 0x92a   : > { %v9148_v13 = vpop.f32.mrf.mxu1 }
 0x92b   : > { %v9149_v19 = vadd.f32 %v9148_v13, %v9147_v28  ;;  %v10105_v28 = vld [vmem:[#allocation7 + $0x30] sm:$0xff]   ;;  %v10093_v13 = vld [vmem:[%s11095_s8 + $0x18] sm:$0xff]  }
 0x92c   : > { %v9150_v29 = vpop.f32.mrf.mxu1 }
 0x92d   : > { %v5392_v58 = vadd.f32 %v9149_v19, %v5351_v40  ;;  %v10127_v19 = vld [vmem:[#allocation7 + $0x40] sm:$0xff]  }
 0x92e   : > { %v9151_v30 = vpop.f32.mrf.mxu1 }
 0x92f   : > { %v9152_v45 = vadd.f32 %v9151_v30, %v9150_v29  ;;  %v10109_v29 = vld [vmem:[#allocation7 + $0x28] sm:$0xff]   ;;  %v10113_v30 = vld [vmem:[#allocation7 + $0x20] sm:$0xff]  }
 0x931   : > { %v5395_v5 = vadd.f32 %v9152_v45, %v5354_v1  ;;  %v10133_v1 = vld [vmem:[#allocation7 + $0x138] sm:$0xff]  }
 0x940   : > { %v9169_v59 = vpop.f32.mrf.mxu0 }
 0x942   : > { %v9170_v31 = vpop.f32.mrf.mxu0 }
 0x943   : > { %v9171_v50 = vadd.f32 %v9170_v31, %v9169_v59  ;;  %v10094_v59 = vld [vmem:[%s11095_s8 + $0x20] sm:$0xff]  }
 0x944   : > { %v9172_v14 = vpop.f32.mrf.mxu0  ;;  %v10111_v31 = vld [vmem:[#allocation7 + $0x60] sm:$0xff]  }
 0x945   : > { %v5433_v56 = vadd.f32 %v9171_v50, %v5392_v58 }
 0x946   : > { %v9173_v46 = vpop.f32.mrf.mxu0 }
 0x947   : > { %v9174_v38 = vadd.f32 %v9173_v46, %v9172_v14  ;;  %v10115_v14 = vld [vmem:[#allocation7 + $0x58] sm:$0xff]   ;;  %v10121_v46 = vld [vmem:[#allocation7 + $0x10] sm:$0xff]  }
 0x948   : > { %v9191_v6 = vpop.f32.mrf.mxu1 }
 0x949   : > { %v5436_v15 = vadd.f32 %v9174_v38, %v5395_v5  ;;  %v10135_v38 = vld [vmem:[#allocation7 + $0x170] sm:$0xff]  }
 0x94a   : > { %v9192_v42 = vpop.f32.mrf.mxu1 }
 0x94b   : > { %v9193_v11 = vadd.f32 %v9192_v42, %v9191_v6  ;;  %v10095_v6 = vld [vmem:[%s11095_s8 + $0x28] sm:$0xff]   ;;  %v10097_v42 = vld [vmem:[%s11095_s8 + $0x38] sm:$0xff]  }
 0x94c   : > { %v9194_v32 = vpop.f32.mrf.mxu1 }
 0x94d   : > { %v5474_v23 = vadd.f32 %v9193_v11, %v5433_v56  ;;  %v10134_v11 = vld [vmem:[#allocation7 + $0x1f0] sm:$0xff]  }
 0x94e   : > { %v9195_v52 = vpop.f32.mrf.mxu1 }
 0x94f   : > { %v9196_v63 = vadd.f32 %v9195_v52, %v9194_v32  ;;  %v10129_v32 = vld [vmem:[#allocation7] sm:$0xff]  }
 0x951   : > { %v5477_v37 = vadd.f32 %v9196_v63, %v5436_v15  ;;  %v10139_v63 = vld [vmem:[#allocation7 + $0x168] sm:$0xff]  }
 0x952   : > { %v10140_v15 = vld [vmem:[#allocation7 + $0x1a8] sm:$0xff]  }
 0x960   : > { %v9213_v54 = vpop.f32.mrf.mxu0 }
 0x962   : > { %v9214_v16 = vpop.f32.mrf.mxu0 }
 0x963   : > { %v9215_v0 = vadd.f32 %v9214_v16, %v9213_v54  ;;  %v10125_v54 = vld [vmem:[#allocation7 + $0x8] sm:$0xff]   ;;  %v10130_v16 = vld [vmem:[#allocation7 + $0x1f8] sm:$0xff]  }
 0x964   : > { %v9216_v20 = vpop.f32.mrf.mxu0  ;;  %9316 = vmatprep.subr.bf16.mxu1 %v10130_v16  ;;  %v10172_v16 = vld [vmem:[#allocation7 + $0x2a8] sm:$0xff]  }
 0x965   : > { %v5515_v18 = vadd.f32 %v9215_v0, %v5474_v23  ;;  %v10137_v23 = vld [vmem:[#allocation7 + $0x130] sm:$0xff]  }
 0x966   : > { %v9217_v9 = vpop.f32.mrf.mxu0 }
 0x967   : > { %v9218_v57 = vadd.f32 %v9217_v9, %v9216_v20  ;;  %v10136_v9 = vld [vmem:[#allocation7 + $0x1b0] sm:$0xff]  }
 0x968   : > { %v9235_v51 = vpop.f32.mrf.mxu1 }
 0x969   : > { %v5518_v24 = vadd.f32 %v9218_v57, %v5477_v37  ;;  %v10142_v57 = vld [vmem:[#allocation7 + $0x1e0] sm:$0xff]  }
 0x96a   : > { %v9236_v21 = vpop.f32.mrf.mxu1 }
 0x96b   : > { %v9237_v3 = vadd.f32 %v9236_v21, %v9235_v51  ;;  %v10138_v51 = vld [vmem:[#allocation7 + $0x1e8] sm:$0xff]  }
 0x96c   : > { %v9238_v7 = vpop.f32.mrf.mxu1 }
 0x96d   : > { %v5556_v2 = vadd.f32 %v9237_v3, %v5515_v18 }
 0x96e   : > { %v9239_v53 = vpop.f32.mrf.mxu1 }
 0x96f   : > { %v9240_v25 = vadd.f32 %v9239_v53, %v9238_v7  ;;  %v5564_v4 = vmul.f32 0.01, %v5556_v2  ;;  %vm5562_vm12 = vcmp.gt.f32.partialorder %v5556_v2, 0.0  ;;  %v10141_v7 = vld [vmem:[#allocation7 + $0x128] sm:$0xff]   ;;  %v10144_v53 = vld [vmem:[#allocation7 + $0x1a0] sm:$0xff]  }
 0x971   : > { %v5559_v26 = vadd.f32 %v9240_v25, %v5518_v24  ;;  %v5566_v22 = vsel %vm5562_vm12, %v5556_v2, %v5564_v4  ;;  %v10143_v2 = vld [vmem:[#allocation7 + $0x160] sm:$0xff]   ;;  %v10146_v24 = vld [vmem:[#allocation7 + $0x1d8] sm:$0xff]  }
 0x972   : > { %v10145_v25 = vld [vmem:[#allocation7 + $0x120] sm:$0xff]   ;;  %v10147_v4 = vld [vmem:[#allocation7 + $0x158] sm:$0xff]  }
 0x973   : > { %vm5563_vm13 = vcmp.gt.f32.partialorder %v5559_v26, 0.0  ;;  %v5565_v39 = vmul.f32 0.01, %v5559_v26 }
 0x975   : > { %v5567_v61 = vsel %vm5563_vm13, %v5559_v26, %v5565_v39  ;;  %v10148_v26 = vld [vmem:[#allocation7 + $0x198] sm:$0xff]   ;;  %v10150_v39 = vld [vmem:[#allocation7 + $0x1d0] sm:$0xff]  }
 0x976   : > { %v5568_v60 = vpack.c.bf16 %v5567_v61, %v5566_v22  ;;  %v10149_v22 = vld [vmem:[#allocation7 + $0x118] sm:$0xff]   ;;  %v10151_v61 = vld [vmem:[#allocation7 + $0x150] sm:$0xff]  }
 0x978   : > { %9547 = vmatprep.subr.bf16.mxu0 %v5568_v60 }
 0x979   : > { %9548 = vmatpush3.bf16.msra.mxu0 %v5568_v60 }
 0x97a   : > { %9250 = vmatprep.subr.bf16.mxu0 %v10099_v27  ;;  %v10152_v27 = vld [vmem:[#allocation7 + $0x190] sm:$0xff]  }
 0x97c   : > { %9550 = vmatmul.mubr.msk.bf16.vlgmr.msra.gmra.mxu0 %vm5625_vm11, %v10091_v43  ;;  %v10154_v43 = vld [vmem:[#allocation7 + $0x1c8] sm:$0xff]  }
 0x97d   : > { %9553 = vmatprep.mubr.msk.bf16.mxu0 %vm5625_vm11, %v10092_v34  ;;  %9251 = vmatpush3.bf16.msra.mxu0 %v10101_v10  ;;  %v10153_v34 = vld [vmem:[#allocation7 + $0x110] sm:$0xff]   ;;  %v10155_v10 = vld [vmem:[#allocation7 + $0x148] sm:$0xff]  }
 0x97e   : > { %9252 = vmatprep.subr.bf16.mxu0 %v10103_v36 }
 0x981   : > { %9253 = vmatpush3.bf16.msra.mxu0 %v10105_v28  ;;  %v10156_v28 = vld [vmem:[#allocation7 + $0x188] sm:$0xff]  }
 0x982   : > { %9254 = vmatprep.subr.bf16.mxu0 %v10107_v12  ;;  %v10158_v12 = vld [vmem:[#allocation7 + $0x1c0] sm:$0xff]  }
 0x984   : > { %9554 = vmatmul.mubr.msk.bf16.gmra.mxu0 %vm5625_vm11, %v10093_v13  ;;  %v10157_v13 = vld [vmem:[#allocation7 + $0x108] sm:$0xff]  }
 0x985   : > { %9557 = vmatprep.mubr.msk.bf16.mxu0 %vm5625_vm11, %v10094_v59  ;;  %9255 = vmatpush3.bf16.msra.mxu0 %v10109_v29  ;;  %v10159_v59 = vld [vmem:[#allocation7 + $0x140] sm:$0xff]  }
 0x986   : > { %9256 = vmatprep.subr.bf16.mxu0 %v10111_v31  ;;  %v10160_v31 = vld [vmem:[#allocation7 + $0x180] sm:$0xff]  }
 0x989   : > { %9257 = vmatpush3.bf16.msra.mxu0 %v10113_v30  ;;  %v10162_v30 = vld [vmem:[#allocation7 + $0x2f8] sm:$0xff]  }
 0x98a   : > { %9258 = vmatprep.subr.bf16.mxu0 %v10115_v14  ;;  %v10161_v14 = vld [vmem:[#allocation7 + $0x100] sm:$0xff]  }
 0x98c   : > { %9558 = vmatmul.mubr.msk.bf16.gmra.mxu0 %vm5625_vm11, %v10095_v6  ;;  %v10163_v6 = vld [vmem:[#allocation7 + $0x278] sm:$0xff]  }
 0x98d   : > { %9561 = vmatprep.mubr.msk.bf16.mxu0 %vm5625_vm11, %v10096_v33  ;;  %9259 = vmatpush3.bf16.msra.mxu0 %v10117_v62  ;;  %v10164_v62 = vld [vmem:[#allocation7 + $0x2b8] sm:$0xff]  }
 0x98e   : > { %9260 = vmatprep.subr.bf16.mxu0 %v10119_v35 }
 0x991   : > { %9261 = vmatpush3.bf16.msra.mxu0 %v10121_v46 }
 0x992   : > { %9262 = vmatprep.subr.bf16.mxu0 %v10123_v55 }
 0x994   : > { %9562 = vmatmul.mubr.msk.bf16.gmra.mxu0 %vm5625_vm11, %v10097_v42  ;;  %v10166_v42 = vld [vmem:[#allocation7 + $0x2f0] sm:$0xff]  }
 0x995   : > { %9263 = vmatpush3.bf16.msra.mxu0 %v10125_v54  ;;  %v10167_v54 = vld [vmem:[#allocation7 + $0x270] sm:$0xff]  }
 0x996   : > { %9264 = vmatprep.subr.bf16.mxu0 %v10127_v19  ;;  %v10169_v19 = vld [vmem:[#allocation7 + $0x230] sm:$0xff]  }
 0x999   : > { %9265 = vmatpush3.bf16.msra.mxu0 %v10129_v32  ;;  %v10171_v32 = vld [vmem:[#allocation7 + $0x268] sm:$0xff]  }
 0x99a   : > { %9294 = vmatprep.subr.bf16.mxu0 %v10131_v44  ;;  %v10174_v44 = vld [vmem:[#allocation7 + $0x2e0] sm:$0xff]  }
 0xa3c   : > { %v9551_v40 = vpop.f32.mrf.mxu0 }
 0xa3d   : > { %v5749_v58 = vpack.c.bf16 %v9551_v40, %v9551_v40  ;;  %v10173_v40 = vld [vmem:[#allocation7 + $0x228] sm:$0xff]  }
 0xa3e   : > { %v5684_v48 = vpop.f32.mrf.mxu0 }
 0xa3f   : > { %v5747_v56 = vpack.c.bf16 %v5684_v48, %v5684_v48  ;;  %v10175_v48 = vld [vmem:[#allocation7 + $0x260] sm:$0xff]  }
 0xa40   : > { %v9552_v50 = vpop.f32.mrf.mxu0 }
 0xa41   : > { %v5750_v20 = vpack.c.bf16 %v9552_v50, %v9552_v50  ;;  %v10176_v50 = vld [vmem:[#allocation7 + $0x2a0] sm:$0xff]  }
 0xa42   : > { %v5687_v45 = vpop.f32.mrf.mxu0 }
 0xa43   : > { %v5748_v52 = vpack.c.bf16 %v5687_v45, %v5687_v45  ;;  %6866 = vmatprep.mubr.bf16.mxu1 %v5750_v20  ;;  %v10178_v20 = vld [vmem:[#allocation7 + $0x2d8] sm:$0xff]  }
 0xa44   : > { %6867 = vmatmul.mubr.bf16.vlgmr.msra.gmra.mxu1 %v5749_v58  ;;  %v10948_v0 = vpop.f32.mrf.mxu0  ;;  %v10179_v58 = vld [vmem:[#allocation7 + $0x258] sm:$0xff]  }
 0xa45   : > { %6826 = vmatprep.mubr.bf16.mxu0 %v5748_v52  ;;  %9317 = vmatpush3.bf16.msra.mxu1 %v10132_v8  ;;  %v5753_v46 = vpack.c.bf16 %v10948_v0, %v10948_v0  ;;  %v10177_v8 = vld [vmem:[#allocation7 + $0x220] sm:$0xff]   ;;  %v10180_v45 = vld [vmem:[#allocation7 + $0x298] sm:$0xff]   ;;  %v10186_v0 = vld [vmem:[#allocation7 + $0x2c8] sm:$0xff]  }
 0xa46   : > { %6827 = vmatmul.mubr.bf16.vlgmr.msra.gmra.mxu0 %v5747_v56  ;;  %9318 = vmatprep.subr.bf16.mxu1 %v10134_v11  ;;  %v10950_v5 = vpop.f32.mrf.mxu0  ;;  %v10182_v11 = vld [vmem:[#allocation7 + $0x2d0] sm:$0xff]   ;;  %v10181_v52 = vld [vmem:[#allocation7 + $0x218] sm:$0xff]  }
 0xa47   : > { %9295 = vmatpush3.bf16.msra.mxu0 %v10133_v1  ;;  %v5751_v55 = vpack.c.bf16 %v10950_v5, %v10950_v5  ;;  %v10183_v1 = vld [vmem:[#allocation7 + $0x250] sm:$0xff]  }
 0xa48   : > { %9296 = vmatprep.subr.bf16.mxu0 %v10135_v38  ;;  %v9556_v21 = vpop.f32.mrf.mxu0  ;;  %v10184_v38 = vld [vmem:[#allocation7 + $0x290] sm:$0xff]  }
 0xa49   : > { %9319 = vmatpush3.bf16.msra.mxu1 %v10136_v9  ;;  %v5754_v18 = vpack.c.bf16 %v9556_v21, %v9556_v21  ;;  %v10185_v9 = vld [vmem:[#allocation7 + $0x210] sm:$0xff]   ;;  %v10189_v21 = vld [vmem:[#allocation7 + $0x208] sm:$0xff]  }
 0xa4a   : > { %9320 = vmatprep.subr.bf16.mxu1 %v10138_v51  ;;  %v5703_v3 = vpop.f32.mrf.mxu0  ;;  %v10187_v51 = vld [vmem:[#allocation7 + $0x248] sm:$0xff]  }
 0xa4b   : > { %9297 = vmatpush3.bf16.msra.mxu0 %v10137_v23  ;;  %v5752_v37 = vpack.c.bf16 %v5703_v3, %v5703_v3  ;;  %6946 = vmatprep.mubr.bf16.mxu1 %v5754_v18  ;;  %v10188_v23 = vld [vmem:[#allocation7 + $0x288] sm:$0xff]   ;;  %v10194_v3 = vld [vmem:[#allocation7 + $0x3f8] sm:$0xff]  }
 0xa4c   : > { %9298 = vmatprep.subr.bf16.mxu0 %v10139_v63  ;;  %v10952_v60 = vpop.f32.mrf.mxu0  ;;  %v10190_v63 = vld [vmem:[#allocation7 + $0x2c0] sm:$0xff]  }
 0xa4d   : > { %9321 = vmatpush3.bf16.msra.mxu1 %v10140_v15  ;;  %6906 = vmatprep.mubr.bf16.mxu0 %v5752_v37  ;;  %v10191_v15 = vld [vmem:[#allocation7 + $0x240] sm:$0xff]   ;;  %v10195_v37 = vld [vmem:[#allocation7 + $0x378] sm:$0xff]  }
 0xa4e   : > { %9322 = vmatprep.subr.bf16.mxu1 %v10142_v57  ;;  %v10954_v36 = vpop.f32.mrf.mxu0  ;;  %v10192_v57 = vld [vmem:[#allocation7 + $0x280] sm:$0xff]  }
 0xa4f   : > { %9299 = vmatpush3.bf16.msra.mxu0 %v10141_v7  ;;  %v10193_v7 = vld [vmem:[#allocation7 + $0x200] sm:$0xff]  }
 0xa50   : > { %9300 = vmatprep.subr.bf16.mxu0 %v10143_v2  ;;  %v9560_v29 = vpop.f32.mrf.mxu0 }
 0xa51   : > { %9323 = vmatpush3.bf16.msra.mxu1 %v10144_v53  ;;  %v5758_v35 = vpack.c.bf16 %v9560_v29, %v9560_v29  ;;  %v10196_v53 = vld [vmem:[#allocation7 + $0x3b8] sm:$0xff]   ;;  %v10209_v29 = vld [vmem:[#allocation7 + $0x320] sm:$0xff]  }
 0xa52   : > { %9324 = vmatprep.subr.bf16.mxu1 %v10146_v24  ;;  %v5719_v33 = vpop.f32.mrf.mxu0 }
 0xa53   : > { %9301 = vmatpush3.bf16.msra.mxu0 %v10145_v25  ;;  %v5756_v41 = vpack.c.bf16 %v5719_v33, %v5719_v33  ;;  %v5757_v25 = vpack.c.bf16 %v10952_v60, %v10952_v60  ;;  %v10203_v60 = vld [vmem:[#allocation7 + $0x368] sm:$0xff]   ;;  %v10215_v33 = vld [vmem:[#allocation7 + $0x350] sm:$0xff]  }
 0xa54   : > { %9302 = vmatprep.subr.bf16.mxu0 %v10147_v4  ;;  %v10960_v56 = vpop.f32.mrf.mxu0  ;;  %v10198_v4 = vld [vmem:[#allocation7 + $0x3f0] sm:$0xff]  }
 0xa55   : > { %9325 = vmatpush3.bf16.msra.mxu1 %v10148_v26  ;;  %v10197_v26 = vld [vmem:[#allocation7 + $0x338] sm:$0xff]  }
 0xa56   : > { %9326 = vmatprep.subr.bf16.mxu1 %v10150_v39  ;;  %v10962_v5 = vpop.f32.mrf.mxu0 }
 0xa57   : > { %9303 = vmatpush3.bf16.msra.mxu0 %v10149_v22  ;;  %v5755_v22 = vpack.c.bf16 %v10954_v36, %v10954_v36  ;;  %v10205_v36 = vld [vmem:[#allocation7 + $0x328] sm:$0xff]  }
 0xa58   : > { %9304 = vmatprep.subr.bf16.mxu0 %v10151_v61  ;;  %v9564_v18 = vpop.f32.mrf.mxu0  ;;  %v10199_v61 = vld [vmem:[#allocation7 + $0x370] sm:$0xff]  }
 0xa59   : > { %9327 = vmatpush3.bf16.msra.mxu1 %v10152_v27  ;;  %v5762_v24 = vpack.c.bf16 %v9564_v18, %v9564_v18  ;;  %v10200_v27 = vld [vmem:[#allocation7 + $0x3b0] sm:$0xff]  }
 0xa5a   : > { %9328 = vmatprep.subr.bf16.mxu1 %v10154_v43  ;;  %v5735_v2 = vpop.f32.mrf.mxu0  ;;  %v10202_v43 = vld [vmem:[#allocation7 + $0x3e8] sm:$0xff]  }
 0xa5b   : > { %9305 = vmatpush3.bf16.msra.mxu0 %v10153_v34  ;;  %v5760_v39 = vpack.c.bf16 %v5735_v2, %v5735_v2  ;;  %v10201_v34 = vld [vmem:[#allocation7 + $0x330] sm:$0xff]  }
 0xa5c   : > { %9306 = vmatprep.subr.bf16.mxu0 %v10155_v10  ;;  %v10204_v10 = vld [vmem:[#allocation7 + $0x3a8] sm:$0xff]  }
 0xa5d   : > { %9329 = vmatpush3.bf16.msra.mxu1 %v10156_v28  ;;  %v10206_v28 = vld [vmem:[#allocation7 + $0x3e0] sm:$0xff]  }
 0xa5e   : > { %9330 = vmatprep.subr.bf16.mxu1 %v10158_v12  ;;  %v10207_v12 = vld [vmem:[#allocation7 + $0x360] sm:$0xff]  }
 0xa5f   : > { %9307 = vmatpush3.bf16.msra.mxu0 %v10157_v13  ;;  %v10208_v13 = vld [vmem:[#allocation7 + $0x3a0] sm:$0xff]  }
 0xa60   : > { %9308 = vmatprep.subr.bf16.mxu0 %v10159_v59  ;;  %v10210_v59 = vld [vmem:[#allocation7 + $0x3d8] sm:$0xff]  }
 0xa61   : > { %9331 = vmatpush3.bf16.msra.mxu1 %v10160_v31  ;;  %v10211_v31 = vld [vmem:[#allocation7 + $0x358] sm:$0xff]  }
 0xa62   : > { %9360 = vmatprep.subr.bf16.mxu1 %v10162_v30  ;;  %v10212_v30 = vld [vmem:[#allocation7 + $0x398] sm:$0xff]  }
 0xa63   : > { %9309 = vmatpush3.bf16.msra.mxu0 %v10161_v14  ;;  %v10214_v14 = vld [vmem:[#allocation7 + $0x3d0] sm:$0xff]  }
 0xa64   : > { %6947 = vmatmul.mubr.bf16.vlgmr.msra.gmra.mxu1 %v5753_v46  ;;  %9338 = vmatprep.subr.bf16.mxu0 %v10163_v6  ;;  %v10213_v6 = vld [vmem:[#allocation7 + $0x318] sm:$0xff]   ;;  %v10217_v46 = vld [vmem:[#allocation7 + $0x310] sm:$0xff]  }
 0xa65   : > { %9361 = vmatpush3.bf16.msra.mxu1 %v10164_v62  ;;  %7026 = vmatprep.mubr.bf16.mxu1 %v5758_v35  ;;  %v10216_v62 = vld [vmem:[#allocation7 + $0x390] sm:$0xff]   ;;  %v10218_v35 = vld [vmem:[#allocation7 + $0x3c8] sm:$0xff]  }
 0xa66   : > { %6907 = vmatmul.mubr.bf16.vlgmr.msra.gmra.mxu0 %v5751_v55  ;;  %9362 = vmatprep.subr.bf16.mxu1 %v10166_v42  ;;  %v10219_v42 = vld [vmem:[#allocation7 + $0x348] sm:$0xff]  }
 0xa67   : > { %9339 = vmatpush3.bf16.msra.mxu0 %v10165_v49  ;;  %6986 = vmatprep.mubr.bf16.mxu0 %v5756_v41  ;;  %v10220_v49 = vld [vmem:[#allocation7 + $0x388] sm:$0xff]   ;;  %v10222_v41 = vld [vmem:[#allocation7 + $0x3c0] sm:$0xff]  }
 0xa68   : > { %9340 = vmatprep.subr.bf16.mxu0 %v10167_v54  ;;  %v10221_v55 = vld [vmem:[#allocation7 + $0x308] sm:$0xff]   ;;  %v10223_v54 = vld [vmem:[#allocation7 + $0x340] sm:$0xff]  }
 0xa69   : > { %9363 = vmatpush3.bf16.msra.mxu1 %v10168_v47  ;;  %v10224_v47 = vld [vmem:[#allocation7 + $0x380] sm:$0xff]  }
 0xa6a   : > { %9364 = vmatprep.subr.bf16.mxu1 %v10170_v17  ;;  %v10225_v17 = vld [vmem:[#allocation7 + $0x300] sm:$0xff]  }
 0xa6b   : > { %9341 = vmatpush3.bf16.msra.mxu0 %v10169_v19  ;;  %v5761_v19 = vpack.c.bf16 %v10960_v56, %v10960_v56  ;;  %v10245_v56 = vld [vmem:[%s11099_s12 + $0xd8] sm:$0xff]  }
 0xa6c   : > { %9342 = vmatprep.subr.bf16.mxu0 %v10171_v32  ;;  %v5759_v32 = vpack.c.bf16 %v10962_v5, %v10962_v5 }
 0xa6d   : > { %9365 = vmatpush3.bf16.msra.mxu1 %v10172_v16  ;;  %v10226_v16 = vld [vmem:[%s11098_s11] sm:$0xff]  }
 0xa6e   : > { %9366 = vmatprep.subr.bf16.mxu1 %v10174_v44  ;;  %v10229_v44 = vld [vmem:[%s11099_s12 + $0xf8] sm:$0xff]  }
 0xa6f   : > { %9343 = vmatpush3.bf16.msra.mxu0 %v10173_v40  ;;  %v10231_v40 = vld [vmem:[%s11099_s12 + $0xb8] sm:$0xff]  }
 0xa70   : > { %9344 = vmatprep.subr.bf16.mxu0 %v10175_v48  ;;  %v10233_v48 = vld [vmem:[%s11099_s12 + $0xf0] sm:$0xff]  }
 0xa71   : > { %9367 = vmatpush3.bf16.msra.mxu1 %v10176_v50  ;;  %v10235_v50 = vld [vmem:[%s11099_s12 + $0xb0] sm:$0xff]  }
 0xa72   : > { %9368 = vmatprep.subr.bf16.mxu1 %v10178_v20  ;;  %v10237_v20 = vld [vmem:[%s11099_s12 + $0xe8] sm:$0xff]  }
 0xa73   : > { %9345 = vmatpush3.bf16.msra.mxu0 %v10177_v8  ;;  %v10239_v8 = vld [vmem:[%s11099_s12 + $0xa8] sm:$0xff]  }
 0xa74   : > { %9346 = vmatprep.subr.bf16.mxu0 %v10179_v58  ;;  %v10241_v58 = vld [vmem:[%s11099_s12 + $0xe0] sm:$0xff]  }
 0xa75   : > { %9369 = vmatpush3.bf16.msra.mxu1 %v10180_v45 }
 0xa76   : > { %9370 = vmatprep.subr.bf16.mxu1 %v10182_v11  ;;  %v10243_v11 = vld [vmem:[%s11099_s12 + $0xa0] sm:$0xff]  }
 0xa77   : > { %9347 = vmatpush3.bf16.msra.mxu0 %v10181_v52 }
 0xa78   : > { %9348 = vmatprep.subr.bf16.mxu0 %v10183_v1 }
 0xa79   : > { %9371 = vmatpush3.bf16.msra.mxu1 %v10184_v38 }
 0xa7a   : > { %9372 = vmatprep.subr.bf16.mxu1 %v10186_v0  ;;  %v8093_v0 = vld [vmem:[%s11097_s10] ss:$0 sm:$0xff] }
 0xa7b   : > { %9349 = vmatpush3.bf16.msra.mxu0 %v10185_v9 }
 0xa7c   : > { %9350 = vmatprep.subr.bf16.mxu0 %v10187_v51 }
 0xa7d   : > { %9373 = vmatpush3.bf16.msra.mxu1 %v10188_v23  ;;  %v10247_v23 = vld [vmem:[%s11099_s12 + $0x98] sm:$0xff]  }
 0xa7e   : > { %9374 = vmatprep.subr.bf16.mxu1 %v10190_v63 }
 0xa7f   : > { %9351 = vmatpush3.bf16.msra.mxu0 %v10189_v21 }
 0xa80   : > { %9352 = vmatprep.subr.bf16.mxu0 %v10191_v15  ;;  %v10249_v15 = vld [vmem:[%s11099_s12 + $0xd0] sm:$0xff]  }
 0xa81   : > { %9375 = vmatpush3.bf16.msra.mxu1 %v10192_v57 }
 0xa82   : > { %9404 = vmatprep.subr.bf16.mxu1 %v10194_v3 }
 0xa83   : > { %9353 = vmatpush3.bf16.msra.mxu0 %v10193_v7  ;;  %v10251_v7 = vld [vmem:[%s11099_s12 + $0x90] sm:$0xff]  }
 0xa84   : > { %7027 = vmatmul.mubr.bf16.vlgmr.msra.gmra.mxu1 %v5757_v25  ;;  %9382 = vmatprep.subr.bf16.mxu0 %v10195_v37 }
 0xa85   : > { %9405 = vmatpush3.bf16.msra.mxu1 %v10196_v53  ;;  %7106 = vmatprep.mubr.bf16.mxu1 %v5762_v24 }
 0xa86   : > { %6987 = vmatmul.mubr.bf16.vlgmr.msra.gmra.mxu0 %v5755_v22  ;;  %9406 = vmatprep.subr.bf16.mxu1 %v10198_v4 }
 0xa87   : > { %9383 = vmatpush3.bf16.msra.mxu0 %v10197_v26  ;;  %7066 = vmatprep.mubr.bf16.mxu0 %v5760_v39 }
 0xa88   : > { %9384 = vmatprep.subr.bf16.mxu0 %v10199_v61 }
 0xa89   : > { %9407 = vmatpush3.bf16.msra.mxu1 %v10200_v27 }
 0xa8a   : > { %9408 = vmatprep.subr.bf16.mxu1 %v10202_v43 }
 0xa8b   : > { %9385 = vmatpush3.bf16.msra.mxu0 %v10201_v34 }
 0xa8c   : > { %9386 = vmatprep.subr.bf16.mxu0 %v10203_v60 }
 0xa8d   : > { %9409 = vmatpush3.bf16.msra.mxu1 %v10204_v10 }
 0xa8e   : > { %9410 = vmatprep.subr.bf16.mxu1 %v10206_v28 }
 0xa8f   : > { %9387 = vmatpush3.bf16.msra.mxu0 %v10205_v36 }
 0xa90   : > { %9388 = vmatprep.subr.bf16.mxu0 %v10207_v12 }
 0xa91   : > { %9411 = vmatpush3.bf16.msra.mxu1 %v10208_v13 }
 0xa92   : > { %9412 = vmatprep.subr.bf16.mxu1 %v10210_v59 }
 0xa93   : > { %9389 = vmatpush3.bf16.msra.mxu0 %v10209_v29 }
 0xa94   : > { %9390 = vmatprep.subr.bf16.mxu0 %v10211_v31 }
 0xa95   : > { %9413 = vmatpush3.bf16.msra.mxu1 %v10212_v30 }
 0xa96   : > { %9414 = vmatprep.subr.bf16.mxu1 %v10214_v14 }
 0xa97   : > { %9391 = vmatpush3.bf16.msra.mxu0 %v10213_v6 }
 0xa98   : > { %9392 = vmatprep.subr.bf16.mxu0 %v10215_v33 }
 0xa99   : > { %9415 = vmatpush3.bf16.msra.mxu1 %v10216_v62 }
 0xa9a   : > { %9416 = vmatprep.subr.bf16.mxu1 %v10218_v35 }
 0xa9b   : > { %9393 = vmatpush3.bf16.msra.mxu0 %v10217_v46 }
 0xa9c   : > { %9394 = vmatprep.subr.bf16.mxu0 %v10219_v42 }
 0xa9d   : > { %9417 = vmatpush3.bf16.msra.mxu1 %v10220_v49 }
 0xa9e   : > { %9418 = vmatprep.subr.bf16.mxu1 %v10222_v41 }
 0xa9f   : > { %9395 = vmatpush3.bf16.msra.mxu0 %v10221_v55 }
 0xaa0   : > { %9396 = vmatprep.subr.bf16.mxu0 %v10223_v54 }
 0xaa1   : > { %9419 = vmatpush3.bf16.msra.mxu1 %v10224_v47 }
 0xaa2   : > { %9451 = vmatprep.subr.bf16.mxu1 %v10229_v44  ;;  %v10228_v44 = vld [vmem:[%s11099_s12 + $0x78] sm:$0xff]  }
 0xaa3   : > { %9397 = vmatpush3.bf16.msra.mxu0 %v10225_v17 }
 0xaa4   : > { %7107 = vmatmul.mubr.bf16.vlgmr.msra.gmra.mxu1 %v5761_v19 }
 0xaa5   : > { %9452 = vmatpush3.bf16.msra.mxu1 %v10231_v40 }
 0xaa6   : > { %7067 = vmatmul.mubr.bf16.vlgmr.msra.gmra.mxu0 %v5759_v32  ;;  %9453 = vmatprep.subr.bf16.mxu1 %v10233_v48  ;;  %v10227_v48 = vld [vmem:[%s11098_s11 + $0x8] sm:$0xff]  }
 0xaa7   : > { %9567 = vmatprep.mubr.msk.bf16.mxu0 %vm7132_vm14, %v10226_v16 }
 0xaa9   : > { %9454 = vmatpush3.bf16.msra.mxu1 %v10235_v50  ;;  %v10230_v50 = vld [vmem:[%s11099_s12 + $0x38] sm:$0xff]  }
 0xaaa   : > { %9455 = vmatprep.subr.bf16.mxu1 %v10237_v20  ;;  %v10232_v20 = vld [vmem:[%s11099_s12 + $0x70] sm:$0xff]  }
 0xaad   : > { %9456 = vmatpush3.bf16.msra.mxu1 %v10239_v8  ;;  %v10234_v8 = vld [vmem:[%s11099_s12 + $0x30] sm:$0xff]  }
 0xaae   : > { %9457 = vmatprep.subr.bf16.mxu1 %v10241_v58  ;;  %v10236_v58 = vld [vmem:[%s11099_s12 + $0x68] sm:$0xff]  }
 0xab1   : > { %9458 = vmatpush3.bf16.msra.mxu1 %v10243_v11  ;;  %v10240_v11 = vld [vmem:[%s11099_s12 + $0x60] sm:$0xff]  }
 0xab2   : > { %9459 = vmatprep.subr.bf16.mxu1 %v10245_v56  ;;  %v10246_v56 = vld [vmem:[%s11099_s12 + $0x18] sm:$0xff]  }
 0xab5   : > { %9460 = vmatpush3.bf16.msra.mxu1 %v10247_v23  ;;  %v10254_v23 = vld [vmem:[%s11099_s12 + $0x8] sm:$0xff]  }
 0xab6   : > { %9461 = vmatprep.subr.bf16.mxu1 %v10249_v15  ;;  %v10256_v15 = vld [vmem:[%s11099_s12 + $0x40] sm:$0xff]  }
 0xab9   : > { %9462 = vmatpush3.bf16.msra.mxu1 %v10251_v7 }
 0xb04   : > { %v9288_v45 = vpop.f32.mrf.mxu1 }
 0xb06   : > { %v9266_v52 = vpop.f32.mrf.mxu0  ;;  %v9289_v1 = vpop.f32.mrf.mxu1 }
 0xb07   : > { %v9290_v38 = vadd.f32 %v9289_v1, %v9288_v45  ;;  %v10238_v45 = vld [vmem:[%s11099_s12 + $0x28] sm:$0xff]   ;;  %v10244_v1 = vld [vmem:[%s11099_s12 + $0x58] sm:$0xff]  }
 0xb08   : > { %v9267_v9 = vpop.f32.mrf.mxu0  ;;  %v9291_v51 = vpop.f32.mrf.mxu1 }
 0xb09   : > { %v9268_v5 = vadd.f32 %v9267_v9, %v9266_v52  ;;  %v10242_v52 = vld [vmem:[%s11099_s12 + $0x20] sm:$0xff]   ;;  %v10253_v9 = vld [vmem:[%s11099_s12 + $0xc8] sm:$0xff]  }
 0xb0a   : > { %v9269_v63 = vpop.f32.mrf.mxu0  ;;  %v9292_v21 = vpop.f32.mrf.mxu1  ;;  %v10255_v51 = vld [vmem:[%s11099_s12 + $0x88] sm:$0xff]   ;;  %9463 = vmatprep.subr.bf16.mxu1 %v10253_v9 }
 0xb0b   : > { %v6829_v18 = vadd.f32 %v9268_v5, %v8093_v0  ;;  %v10250_v0 = vld [vmem:[%s11099_s12 + $0x10] sm:$0xff]   ;;  %v10252_v5 = vld [vmem:[%s11099_s12 + $0x48] sm:$0xff]   ;;  %9464 = vmatpush3.bf16.msra.mxu1 %v10255_v51  ;;  %v10257_v63 = vld [vmem:[%s11099_s12 + $0xc0] sm:$0xff]  }
 0xb0c   : > { %v9270_v57 = vpop.f32.mrf.mxu0  ;;  %v10259_v21 = vld [vmem:[%s11099_s12 + $0x80] sm:$0xff]   ;;  %9465 = vmatprep.subr.bf16.mxu1 %v10257_v63 }
 0xb0d   : > { %v6869_v3 = vadd.f32 %v9290_v38, %v6829_v18  ;;  %v10248_v38 = vld [vmem:[%s11099_s12 + $0x50] sm:$0xff]   ;;  %v10258_v18 = vld [vmem:[%s11099_s12] sm:$0xff]  }
 0xb0f   : > { %9466 = vmatpush3.bf16.msra.mxu1 %v10259_v21 }
 0xb24   : > { %v9332_v37 = vpop.f32.mrf.mxu1 }
 0xb26   : > { %v9310_v2 = vpop.f32.mrf.mxu0  ;;  %v9333_v53 = vpop.f32.mrf.mxu1 }
 0xb27   : > { %v9334_v13 = vadd.f32 %v9333_v53, %v9332_v37 }
 0xb28   : > { %v9311_v24 = vpop.f32.mrf.mxu0  ;;  %v9335_v25 = vpop.f32.mrf.mxu1 }
 0xb29   : > { %v9312_v36 = vadd.f32 %v9311_v24, %v9310_v2 }
 0xb2a   : > { %v9313_v4 = vpop.f32.mrf.mxu0  ;;  %v9336_v26 = vpop.f32.mrf.mxu1 }
 0xb2b   : > { %v6909_v12 = vadd.f32 %v9312_v36, %v6869_v3 }
 0xb2c   : > { %v9314_v39 = vpop.f32.mrf.mxu0 }
 0xb2d   : > { %v6949_v29 = vadd.f32 %v9334_v13, %v6909_v12 }
 0xb44   : > { %v9376_v22 = vpop.f32.mrf.mxu1 }
 0xb46   : > { %v9354_v61 = vpop.f32.mrf.mxu0  ;;  %v9377_v27 = vpop.f32.mrf.mxu1 }
 0xb47   : > { %v9378_v33 = vadd.f32 %v9377_v27, %v9376_v22 }
 0xb48   : > { %v9355_v43 = vpop.f32.mrf.mxu0  ;;  %v9379_v34 = vpop.f32.mrf.mxu1 }
 0xb49   : > { %v9356_v59 = vadd.f32 %v9355_v43, %v9354_v61 }
 0xb4a   : > { %v9357_v60 = vpop.f32.mrf.mxu0  ;;  %v9380_v10 = vpop.f32.mrf.mxu1 }
 0xb4b   : > { %v6989_v30 = vadd.f32 %v9356_v59, %v6949_v29 }
 0xb4c   : > { %v9358_v28 = vpop.f32.mrf.mxu0 }
 0xb4d   : > { %v7029_v46 = vadd.f32 %v9378_v33, %v6989_v30 }
 0xb64   : > { %v9420_v31 = vpop.f32.mrf.mxu1 }
 0xb66   : > { %v9398_v14 = vpop.f32.mrf.mxu0  ;;  %v9421_v6 = vpop.f32.mrf.mxu1 }
 0xb67   : > { %v9422_v55 = vadd.f32 %v9421_v6, %v9420_v31 }
 0xb68   : > { %v9399_v62 = vpop.f32.mrf.mxu0  ;;  %v9423_v35 = vpop.f32.mrf.mxu1 }
 0xb69   : > { %v9400_v42 = vadd.f32 %v9399_v62, %v9398_v14 }
 0xb6a   : > { %v9401_v49 = vpop.f32.mrf.mxu0  ;;  %v9424_v41 = vpop.f32.mrf.mxu1 }
 0xb6b   : > { %v7069_v54 = vadd.f32 %v9400_v42, %v7029_v46 }
 0xb6c   : > { %v9402_v47 = vpop.f32.mrf.mxu0 }
 0xb6d   : > { %v7109_v17 = vadd.f32 %v9422_v55, %v7069_v54 }
 0xb6f   : > { %vm7114_vm15 = vcmp.gt.f32.partialorder %v7109_v17, 0.0  ;;  %v7115_v19 = vmul.f32 0.01, %v7109_v17 }
 0xb71   : > { %v7116_v32 = vsel %vm7114_vm15, %v7109_v17, %v7115_v19 }
 0xb72   : > { %v7117_v16 = vpack.c.bf16 %v7116_v32, %v7116_v32 }
 0xb74   : > { %9572 = vmatprep.subr.msk.bf16.mxu0 %vm7139_vm0, %v7117_v16  ;;  %v7141_v40 = vsel %vm7139_vm0, %v7117_v16, 0 }
 0xb75   : > { %9566 = vmatpush3.bf16.msra.mxu0 %v7141_v40 }
 0xb76   : > { %9429 = vmatprep.subr.bf16.mxu0 %v10228_v44 }
 0xb78   : > { %9568 = vmatmul.mubr.msk.bf16.vlgmr.msra.gmra.mxu0 %vm7132_vm14, %v10227_v48 }
 0xb79   : > { %9430 = vmatpush3.bf16.msra.mxu0 %v10230_v50 }
 0xb7a   : > { %9431 = vmatprep.subr.bf16.mxu0 %v10232_v20 }
 0xb7d   : > { %9432 = vmatpush3.bf16.msra.mxu0 %v10234_v8 }
 0xb7e   : > { %9433 = vmatprep.subr.bf16.mxu0 %v10236_v58 }
 0xb81   : > { %9434 = vmatpush3.bf16.msra.mxu0 %v10238_v45 }
 0xb82   : > { %9435 = vmatprep.subr.bf16.mxu0 %v10240_v11 }
 0xb85   : > { %9436 = vmatpush3.bf16.msra.mxu0 %v10242_v52 }
 0xb86   : > { %9437 = vmatprep.subr.bf16.mxu0 %v10244_v1 }
 0xb89   : > { %9438 = vmatpush3.bf16.msra.mxu0 %v10246_v56 }
 0xb8a   : > { %9439 = vmatprep.subr.bf16.mxu0 %v10248_v38 }
 0xb8d   : > { %9440 = vmatpush3.bf16.msra.mxu0 %v10250_v0 }
 0xb8e   : > { %9441 = vmatprep.subr.bf16.mxu0 %v10252_v5 }
 0xb91   : > { %9442 = vmatpush3.bf16.msra.mxu0 %v10254_v23 }
 0xb92   : > { %9443 = vmatprep.subr.bf16.mxu0 %v10256_v15 }
 0xb95   : > { %9444 = vmatpush3.bf16.msra.mxu0 %v10258_v18 }
 0xc38   : > { %v9569_v57 = vpop.f32.mrf.mxu0 }
 0xc39   : > { %v7194_v2 = vpack.c.bf16 %v9569_v57, %v9569_v57 }
 0xc3a   : > { %v7177_v3 = vpop.f32.mrf.mxu0 }
 0xc3b   : > { %v7192_v25 = vpack.c.bf16 %v7177_v3, %v7177_v3 }
 0xc3c   : > { %v9570_v7 = vpop.f32.mrf.mxu0 }
 0xc3d   : > { %v7195_v37 = vpack.c.bf16 %v9570_v7, %v9570_v7 }
 0xc3e   : > { %v7180_v53 = vpop.f32.mrf.mxu0 }
 0xc3f   : > { %v7193_v24 = vpack.c.bf16 %v7180_v53, %v7180_v53  ;;  %7524 = vmatprep.mubr.bf16.mxu1 %v7195_v37 }
 0xc40   : > { %7525 = vmatmul.mubr.bf16.vlgmr.msra.gmra.mxu1 %v7194_v2 }
 0xc41   : > { %7484 = vmatprep.mubr.bf16.mxu0 %v7193_v24 }
 0xc42   : > { %7485 = vmatmul.mubr.bf16.vlgmr.msra.gmra.mxu0 %v7192_v25 }
 0xd00   : > { %v9467_v4 = vpop.f32.mrf.mxu1 }
 0xd02   : > { %v9445_v26 = vpop.f32.mrf.mxu0  ;;  %v9468_v39 = vpop.f32.mrf.mxu1 }
 0xd03   : > { %v9469_v43 = vadd.f32 %v9468_v39, %v9467_v4 }
 0xd04   : > { %v9446_v22 = vpop.f32.mrf.mxu0  ;;  %v9470_v61 = vpop.f32.mrf.mxu1 }
 0xd05   : > { %v9447_v27 = vadd.f32 %v9446_v22, %v9445_v26 }
 0xd06   : > { %v9448_v34 = vpop.f32.mrf.mxu0  ;;  %v9471_v60 = vpop.f32.mrf.mxu1 }
 0xd07   : > { %v7527_v10 = vadd.f32 %v9469_v43, %v9447_v27 }
 0xd08   : > { %v9449_v28 = vpop.f32.mrf.mxu0 }
 0xd09   : > { %7532 = vst [vmem:[%s499_s23] sm:$0xff] %v7527_v10 }
 0xd0a PF: > { %s26_s25 = sadd.s32 1, %s10382_s25  }
 0xd0b   : > { %p23_p5 = scmp.ge.s32.totalorder %s26_s25, 4  }
 0xd0d   :  { %25 = sbr.rel (!%p23_p5) target bundleno = 3 (0x3), region = 125 }
 0xd12   :  { %7552 = vsyncpa [#allocation3], 1 }
 0xd13   :  { %7554 = vsyncpa [#allocation3 + $0x1], 1 }
 0xd14   :  { %7555 = vsyncpa [#allocation5], 1 }
 0xd15   :  { %7556 = vsyncpa [#allocation8], 1 }

</bundles_post_ra>
